<compile_context>
chip_gen: v7x
topology: tpu7x:2x2x1
jax: 0.10.0
libtpu: 0.0.40
codegen_flags: <defaults>
</compile_context>

<pallas_src>
import numpy as np
import jax
import jax.numpy as jnp
from jax import lax
from jax.experimental import pallas as pl
from jax.experimental.pallas import tpu as pltpu

L = 1000      # backbone feature dim (resnet34 fc output)
LP = 1024     # L padded to a lane-dense multiple of 128 (zero padding is exact)
D = 128       # attention hidden dim
K = 1         # attention "heads"
PROJ = 128    # packed lane-dense output width (col 0 = attention score, col 1 = h @ wc)
W1WC = 2 * D  # merged epilogue RHS width (cols 0:128 = w1, col 129 = wc)

VMEM_TILE_BUDGET = 26 * 1024 * 1024   # explicit-buffer budget for the tile plan
VMEM_LIMIT_BYTES = 40 * 1024 * 1024   # < 64 MiB (v7x/TC physical), > 16 MiB (v5e scoped default)


def _round_up(v, m):
    return ((v + m - 1) // m) * m


def _est_vmem_bytes(tm, tk):
    """Rough VMEM footprint of the fused kernel's buffers for a (TM, TK) tile plan."""
    acc = tm * LP * 4                       # f32 accumulator scratch
    x_t = 2 * tm * tk * 2                   # double-buffered bf16 x tile
    wf_t = 2 * tk * LP * 2                  # double-buffered bf16 wf tile
    out_t = 2 * tm * PROJ * 4               # double-buffered f32 packed output tile
    consts = 2 * (LP * 4 + LP * W1WC * 2 + D * 4 + D * PROJ * 2 + PROJ * 4)
    return acc + x_t + wf_t + out_t + consts


def _plan_tiles(bn_pad, f_pad, budget):
    """Pick (TM, TK).  TM as large as possible (ideally all rows): wf is re-streamed from HBM
    once per row tile and the kernel is weight-stream bound.  TK capped at 1024 so the
    double-buffered wf tile stays comfortably inside every generation's VMEM."""
    tk_cands = [d for d in range(min(f_pad, 1024), 127, -128) if f_pad % d == 0]
    tm_cands = [d for d in range(bn_pad, 127, -128) if bn_pad % d == 0]
    for tm in tm_cands:
        for tk in tk_cands:
            if _est_vmem_bytes(tm, tk) <= budget:
                return tm, tk
    return tm_cands[-1], tk_cands[-1]


# ----------------------------- Pallas kernels -------------------------------

def fused_feat_score_kernel(x_ref, wf_ref, bf_ref, w1wc_ref, b1_ref,
                            w2p_ref, bproj_ref, out_ref, acc_ref):
    """Tiled backbone matmul + fused attention scoring + per-instance classifier logit.

    grid = (row_tiles, k_tiles).  acc accumulates x @ wf over the K axis; on the last K step:
      h  = acc + bf                                   (never leaves VMEM)
      hm = h @ [w1 | wc]      -- ONE 256-wide MXU pass (cols 0:128 = h@w1, col 129 = h@wc)
      out[:, 0] = tanh(hm[:, :128] + b1) @ w2 + b2    (attention score)
      out[:, 1] = h @ wc                              (per-instance classifier logit)
    """
    k = pl.program_id(1)

    @pl.when(k == 0)
    def _():
        acc_ref[...] = jnp.zeros_like(acc_ref)

    # bf16 MXU operands, f32 accumulation.
    acc_ref[...] += jnp.dot(x_ref[...], wf_ref[...], preferred_element_type=jnp.float32)

    @pl.when(k == pl.num_programs(1) - 1)
    def _():
        h = acc_ref[...] + bf_ref[...]                           # (TM, LP) f32
        h_bf = h.astype(jnp.bfloat16)
        hm = jnp.dot(h_bf, w1wc_ref[...],
                     preferred_element_type=jnp.float32)         # (TM, 256)
        a1 = jnp.tanh(hm[:, :D] + b1_ref[...])                   # f32 vector math (v5e-safe)
        out_ref[...] = (
            jnp.dot(a1.astype(jnp.bfloat16), w2p_ref[...],
                    preferred_element_type=jnp.float32)
            + hm[:, D:2 * D]                                     # wc contribution sits in col 1
            + bproj_ref[...]
        )


def make_pool_kernel(n_valid):
    """Per-bag softmax over instances + attention-weighted pooling, lane-dense padded blocks."""
    def pool_kernel(s_ref, hwc_ref, bc_ref, y_ref, yhat_ref, a_ref):
        s = s_ref[...]                                           # (B, NP) attention scores
        hwc = hwc_ref[...]                                       # (B, NP) per-instance h @ wc
        col = lax.broadcasted_iota(jnp.int32, s.shape, 1)
        valid = col < n_valid
        s_m = jnp.where(valid, s, -jnp.inf)
        m = jnp.max(s_m, axis=1, keepdims=True)
        e = jnp.where(valid, jnp.exp(s - m), 0.0)
        denom = jnp.sum(e, axis=1, keepdims=True)
        a = e * pl.reciprocal(denom, approx=True)                # EUP slot, effectively free
        y = jnp.sum(a * hwc, axis=1, keepdims=True) + bc_ref[0, 0]   # (B, 1)
        yb = jnp.broadcast_to(y, s.shape)                        # lane-dense stores
        y_ref[...] = yb
        yhat_ref[...] = (yb >= 0.5).astype(jnp.float32)
        a_ref[...] = a
    return pool_kernel


# ------------------------------ host wrapper ---------------------------------

def attention_slide_batch(x, params):
    """x: (B, N, 3, H, W) float32.  Returns (Y_prob, Y_hat, A) like the torch module."""
    wf, bf, w1, b1, w2, b2, wc, bc = params
    B, N, C, Hh, Ww = x.shape
    BN = B * N
    F_in = C * Hh * Ww

    # ---- lane/sublane-dense padding (rows to 128 so MXU passes are full height) ----
    F_pad = _round_up(F_in, 128)
    BN_pad = _round_up(BN, 128)

    # bf16 input tile, padded directly (no full-size f32 padded intermediate).
    x_bf = jnp.pad(x.reshape(BN, F_in).astype(jnp.bfloat16),
                   ((0, BN_pad - BN), (0, F_pad - F_in)))

    wf_p = jnp.zeros((F_pad, LP), jnp.float32).at[:F_in, :L].set(wf)
    bf_p = jnp.zeros((1, LP), jnp.float32).at[:, :L].set(bf)

    # Merged epilogue RHS: cols 0:D = w1 (attention), col D+1 = wc (classifier).
    w1wc = jnp.zeros((LP, W1WC), jnp.float32)
    w1wc = w1wc.at[:L, :D].set(w1)
    w1wc = w1wc.at[:L, D + 1:D + 2].set(wc)

    # Packed lane-dense projection head: col 0 <- attention head (w2, b2).
    w2p = jnp.zeros((D, PROJ), jnp.float32).at[:, 0:1].set(w2)
    bproj = jnp.zeros((1, PROJ), jnp.float32).at[:, 0:1].set(b2)

    wf_bf = wf_p.astype(jnp.bfloat16)
    w1wc_bf = w1wc.astype(jnp.bfloat16)
    w2p_bf = w2p.astype(jnp.bfloat16)

    TM, TK = _plan_tiles(BN_pad, F_pad, VMEM_TILE_BUDGET)
    grid = (BN_pad // TM, F_pad // TK)   # one row tile whenever it fits -> wf streamed once

    feats = pl.pallas_call(
        fused_feat_score_kernel,
        grid=grid,
        in_specs=[
            pl.BlockSpec((TM, TK), lambda i, k: (i, k)),     # x row/K tile
            pl.BlockSpec((TK, LP), lambda i, k: (k, 0)),     # wf K tile
            pl.BlockSpec((1, LP), lambda i, k: (0, 0)),      # bf
            pl.BlockSpec((LP, W1WC), lambda i, k: (0, 0)),   # merged [w1 | wc]
            pl.BlockSpec((1, D), lambda i, k: (0, 0)),       # b1
            pl.BlockSpec((D, PROJ), lambda i, k: (0, 0)),    # packed w2
            pl.BlockSpec((1, PROJ), lambda i, k: (0, 0)),    # packed b2
        ],
        out_specs=pl.BlockSpec((TM, PROJ), lambda i, k: (i, 0)),
        out_shape=jax.ShapeDtypeStruct((BN_pad, PROJ), jnp.float32),
        scratch_shapes=[pltpu.VMEM((TM, LP), jnp.float32)],
        compiler_params=pltpu.CompilerParams(
            dimension_semantics=("parallel", "arbitrary"),
            vmem_limit_bytes=VMEM_LIMIT_BYTES),
    )(x_bf, wf_bf, bf_p, w1wc_bf, b1, w2p_bf, bproj)

    # Tiny lane extraction + bag reshape (a few KiB; H itself never touched HBM).
    s_bags = feats[:BN, 0].reshape(B, N)
    hwc_bags = feats[:BN, 1].reshape(B, N)

    # Lane-dense padded blocks for the (tiny) per-bag pooling kernel.
    NP = _round_up(N, 128)
    s_pad = jnp.pad(s_bags, ((0, 0), (0, NP - N)))
    hwc_pad = jnp.pad(hwc_bags, ((0, 0), (0, NP - N)))

    y_slab, yhat_slab, a_pad = pl.pallas_call(
        make_pool_kernel(N),
        grid=(1,),
        in_specs=[
            pl.BlockSpec((B, NP), lambda i: (0, 0)),
            pl.BlockSpec((B, NP), lambda i: (0, 0)),
            pl.BlockSpec((1, 1), lambda i: (0, 0)),
        ],
        out_specs=[
            pl.BlockSpec((B, NP), lambda i: (0, 0)),
            pl.BlockSpec((B, NP), lambda i: (0, 0)),
            pl.BlockSpec((B, NP), lambda i: (0, 0)),
        ],
        out_shape=[
            jax.ShapeDtypeStruct((B, NP), jnp.float32),
            jax.ShapeDtypeStruct((B, NP), jnp.float32),
            jax.ShapeDtypeStruct((B, NP), jnp.float32),
        ],
        compiler_params=pltpu.CompilerParams(
            dimension_semantics=("arbitrary",)),
    )(s_pad, hwc_pad, bc)

    # torch: Y_prob.squeeze(), Y_hat float, A.squeeze() -> (B, N)
    return y_slab[:, 0], yhat_slab[:, 0], a_pad[:, :N]


# -------------------------- deterministic params ------------------------------

def linear_init(key, fan_in, fan_out):
    # torch nn.Linear default: U(-1/sqrt(fan_in), 1/sqrt(fan_in))
    k1, k2 = jax.random.split(key)
    bound = 1.0 / float(np.sqrt(fan_in))
    w = jax.random.uniform(k1, (fan_in, fan_out), jnp.float32, -bound, bound)
    b = jax.random.uniform(k2, (1, fan_out), jnp.float32, -bound, bound)
    return w, b


def make_params(key, f_in):
    kf, k1, k2, kc = jax.random.split(key, 4)
    wf, bf = linear_init(kf, f_in, L)      # stand-in backbone projection
    w1, b1 = linear_init(k1, L, D)         # attention Linear(L, D)
    w2, b2 = linear_init(k2, D, K)         # attention Linear(D, K)
    wc, bc = linear_init(kc, L * K, 1)     # classifier Linear(L*K, 1)
    return (wf, bf, w1, b1, w2, b2, wc, bc)


# ------------------------------- pure-JAX ref ---------------------------------

def reference(x, params):
    B, N, C, Hh, Ww = x.shape
    wf, bf, w1, b1, w2, b2, wc, bc = params
    x_flat = x.reshape(B * N, C * Hh * Ww).astype(jnp.float32)
    Hf = x_flat @ wf + bf                                   # (B*N, L)
    a = jnp.tanh(Hf @ w1 + b1) @ w2 + b2                    # (B*N, K)
    a = a.reshape(B, N, K).transpose(0, 2, 1)               # (B, K, N)
    a = jax.nn.softmax(a, axis=2)
    Hb = Hf.reshape(B, N, L)
    M = jnp.einsum('bkn,bnl->bkl', a, Hb).reshape(B, L * K)
    y = (M @ wc + bc).reshape(B)
    # NOTE: matches the torch module: no sigmoid, Y_hat = (Y_prob >= 0.5).
    return y, (y >= 0.5).astype(jnp.float32), a.reshape(B, N)


# ----------------------------------- main --------------------------------------

if __name__ == "__main__":
    B, N, C, HH, WW = 2, 8, 3, 16, 16
    key = jax.random.PRNGKey(0)
    kx, kp = jax.random.split(key)

    x = jax.random.normal(kx, (B, N, C, HH, WW), jnp.float32)
    params = make_params(kp, C * HH * WW)

    y_prob, y_hat, A = attention_slide_batch(x, params)
    jax.block_until_ready((y_prob, y_hat, A))

    yr, hr, ar = reference(x, params)
    # tolerance widened slightly vs pure-f32: kernel uses bf16 MXU operands (f32 accumulate)
    np.testing.assert_allclose(np.asarray(y_prob), np.asarray(yr), rtol=2e-2, atol=2e-2)
    np.testing.assert_allclose(np.asarray(A), np.asarray(ar), rtol=2e-2, atol=2e-2)

    print("KERNEL_OK")
</pallas_src>

<mosaic_0001>
module attributes {stable_mosaic.version = 11 : i64} {
  func.func @fused_feat_score_kernel(%arg0: i32, %arg1: i32, %arg2: memref<128x768xbf16, #tpu.memory_space<vmem>>, %arg3: memref<768x1024xbf16, #tpu.memory_space<vmem>>, %arg4: memref<1x1024xf32, #tpu.memory_space<vmem>>, %arg5: memref<1024x256xbf16, #tpu.memory_space<vmem>>, %arg6: memref<1x128xf32, #tpu.memory_space<vmem>>, %arg7: memref<128x128xbf16, #tpu.memory_space<vmem>>, %arg8: memref<1x128xf32, #tpu.memory_space<vmem>>, %arg9: memref<128x128xf32, #tpu.memory_space<vmem>>, %arg10: memref<128x1024xf32, #tpu.memory_space<vmem>>) attributes {dimension_semantics = [#tpu.dimension_semantics<parallel>, #tpu.dimension_semantics<arbitrary>], iteration_bounds = array<i64: 1, 1>, scalar_prefetch = 0 : i64, scratch_operands = 1 : i64, tpu.core_type = #tpu.core_type<tc>, window_params = [{transform_indices = @transform_0, window_bounds = array<i64: 128, 768>}, {transform_indices = @transform_1, window_bounds = array<i64: 768, 1024>}, {pipeline_mode = #tpu.pipeline_mode<synchronous>, transform_indices = @transform_2, window_bounds = array<i64: 1, 1024>}, {pipeline_mode = #tpu.pipeline_mode<synchronous>, transform_indices = @transform_3, window_bounds = array<i64: 1024, 256>}, {pipeline_mode = #tpu.pipeline_mode<synchronous>, transform_indices = @transform_4, window_bounds = array<i64: 1, 128>}, {pipeline_mode = #tpu.pipeline_mode<synchronous>, transform_indices = @transform_5, window_bounds = array<i64: 128, 128>}, {pipeline_mode = #tpu.pipeline_mode<synchronous>, transform_indices = @transform_6, window_bounds = array<i64: 1, 128>}, {transform_indices = @transform_7, window_bounds = array<i64: 128, 128>}]} {
    %c0_i32 = arith.constant 0 : i32
    %0 = arith.cmpi eq, %arg1, %c0_i32 : i32
    %1 = arith.extui %0 : i1 to i32
    %c0_i32_0 = arith.constant 0 : i32
    %2 = arith.cmpi ne, %1, %c0_i32_0 : i32
    scf.if %2 {
      %cst_10 = arith.constant 0.000000e+00 : f32
      %12 = vector.broadcast %cst_10 : f32 to vector<128x1024xf32>
      %c0_11 = arith.constant 0 : index
      %c0_12 = arith.constant 0 : index
      %13 = vector.load %arg10[%c0_11, %c0_12] : memref<128x1024xf32, #tpu.memory_space<vmem>>, vector<128x1024xf32>
      tpu.vector_store %arg10[%c0_11, %c0_12], %12 {strides = array<i32>} : memref<128x1024xf32, #tpu.memory_space<vmem>>, vector<128x1024xf32>,
    } else {
    }
    %c0 = arith.constant 0 : index
    %c0_1 = arith.constant 0 : index
    %3 = vector.load %arg10[%c0, %c0_1] : memref<128x1024xf32, #tpu.memory_space<vmem>>, vector<128x1024xf32>
    %c0_2 = arith.constant 0 : index
    %c0_3 = arith.constant 0 : index
    %4 = vector.load %arg2[%c0_2, %c0_3] : memref<128x768xbf16, #tpu.memory_space<vmem>>, vector<128x768xbf16>
    %c0_4 = arith.constant 0 : index
    %c0_5 = arith.constant 0 : index
    %5 = vector.load %arg3[%c0_4, %c0_5] : memref<768x1024xbf16, #tpu.memory_space<vmem>>, vector<768x1024xbf16>
    %cst = arith.constant dense<0.000000e+00> : vector<128x1024xf32>
    %6 = tpu.matmul %4, %5, %cst {dimension_numbers = #tpu.dot_dimension_numbers<[1], [0], [0], [1], [0, 0, 1, 1], [], []>} : vector<128x768xbf16>, vector<768x1024xbf16>, vector<128x1024xf32> -> vector<128x1024xf32>
    %7 = arith.addf %3, %6 : vector<128x1024xf32>
    %c0_6 = arith.constant 0 : index
    %c0_7 = arith.constant 0 : index
    %8 = vector.load %arg10[%c0_6, %c0_7] : memref<128x1024xf32, #tpu.memory_space<vmem>>, vector<128x1024xf32>
    tpu.vector_store %arg10[%c0_6, %c0_7], %7 {strides = array<i32>} : memref<128x1024xf32, #tpu.memory_space<vmem>>, vector<128x1024xf32>,
    %c0_i32_8 = arith.constant 0 : i32
    %9 = arith.cmpi eq, %arg1, %c0_i32_8 : i32
    %10 = arith.extui %9 : i1 to i32
    %c0_i32_9 = arith.constant 0 : i32
    %11 = arith.cmpi ne, %10, %c0_i32_9 : i32
    scf.if %11 {
      %c0_10 = arith.constant 0 : index
      %c0_11 = arith.constant 0 : index
      %12 = vector.load %arg10[%c0_10, %c0_11] : memref<128x1024xf32, #tpu.memory_space<vmem>>, vector<128x1024xf32>
      %c0_12 = arith.constant 0 : index
      %c0_13 = arith.constant 0 : index
      %13 = vector.load %arg4[%c0_12, %c0_13] : memref<1x1024xf32, #tpu.memory_space<vmem>>, vector<1x1024xf32>
      %14 = vector.broadcast %13 : vector<1x1024xf32> to vector<128x1024xf32>
      %15 = arith.addf %12, %14 : vector<128x1024xf32>
      %16 = arith.truncf %15 : vector<128x1024xf32> to vector<128x1024xbf16>
      %c0_14 = arith.constant 0 : index
      %c0_15 = arith.constant 0 : index
      %17 = vector.load %arg5[%c0_14, %c0_15] : memref<1024x256xbf16, #tpu.memory_space<vmem>>, vector<1024x256xbf16>
      %cst_16 = arith.constant dense<0.000000e+00> : vector<128x256xf32>
      %18 = tpu.matmul %16, %17, %cst_16 {dimension_numbers = #tpu.dot_dimension_numbers<[1], [0], [0], [1], [0, 0, 1, 1], [], []>} : vector<128x1024xbf16>, vector<1024x256xbf16>, vector<128x256xf32> -> vector<128x256xf32>
      %19 = vector.extract_strided_slice %18 {offsets = [0, 0], sizes = [128, 128], strides = [1, 1]} : vector<128x256xf32> to vector<128x128xf32>
      %c0_17 = arith.constant 0 : index
      %c0_18 = arith.constant 0 : index
      %20 = vector.load %arg6[%c0_17, %c0_18] : memref<1x128xf32, #tpu.memory_space<vmem>>, vector<1x128xf32>
      %21 = vector.broadcast %20 : vector<1x128xf32> to vector<128x128xf32>
      %22 = arith.addf %19, %21 : vector<128x128xf32>
      %23 = math.tanh %22 : vector<128x128xf32>
      %24 = arith.truncf %23 : vector<128x128xf32> to vector<128x128xbf16>
      %c0_19 = arith.constant 0 : index
      %c0_20 = arith.constant 0 : index
      %25 = vector.load %arg7[%c0_19, %c0_20] : memref<128x128xbf16, #tpu.memory_space<vmem>>, vector<128x128xbf16>
      %cst_21 = arith.constant dense<0.000000e+00> : vector<128x128xf32>
      %26 = tpu.matmul %24, %25, %cst_21 {dimension_numbers = #tpu.dot_dimension_numbers<[1], [0], [0], [1], [0, 0, 1, 1], [], []>} : vector<128x128xbf16>, vector<128x128xbf16>, vector<128x128xf32> -> vector<128x128xf32>
      %27 = vector.extract_strided_slice %18 {offsets = [0, 128], sizes = [128, 128], strides = [1, 1]} : vector<128x256xf32> to vector<128x128xf32>
      %28 = arith.addf %26, %27 : vector<128x128xf32>
      %c0_22 = arith.constant 0 : index
      %c0_23 = arith.constant 0 : index
      %29 = vector.load %arg8[%c0_22, %c0_23] : memref<1x128xf32, #tpu.memory_space<vmem>>, vector<1x128xf32>
      %30 = vector.broadcast %29 : vector<1x128xf32> to vector<128x128xf32>
      %31 = arith.addf %28, %30 : vector<128x128xf32>
      %c0_24 = arith.constant 0 : index
      %c0_25 = arith.constant 0 : index
      %32 = vector.load %arg9[%c0_24, %c0_25] : memref<128x128xf32, #tpu.memory_space<vmem>>, vector<128x128xf32>
      tpu.vector_store %arg9[%c0_24, %c0_25], %31 {strides = array<i32>} : memref<128x128xf32, #tpu.memory_space<vmem>>, vector<128x128xf32>,
    } else {
    }
    return
  }
  func.func @transform_0(%arg0: i32, %arg1: i32) -> (i32, i32) {
    %c0_i32 = arith.constant 0 : i32
    return %arg0, %arg1 : i32, i32
  }
  func.func @transform_1(%arg0: i32, %arg1: i32) -> (i32, i32) {
    %c0_i32 = arith.constant 0 : i32
    %c0_i32_0 = arith.constant 0 : i32
    return %arg1, %c0_i32 : i32, i32
  }
  func.func @transform_2(%arg0: i32, %arg1: i32) -> (i32, i32) {
    %c0_i32 = arith.constant 0 : i32
    %c0_i32_0 = arith.constant 0 : i32
    %c0_i32_1 = arith.constant 0 : i32
    return %c0_i32, %c0_i32_0 : i32, i32
  }
  func.func @transform_3(%arg0: i32, %arg1: i32) -> (i32, i32) {
    %c0_i32 = arith.constant 0 : i32
    %c0_i32_0 = arith.constant 0 : i32
    %c0_i32_1 = arith.constant 0 : i32
    return %c0_i32, %c0_i32_0 : i32, i32
  }
  func.func @transform_4(%arg0: i32, %arg1: i32) -> (i32, i32) {
    %c0_i32 = arith.constant 0 : i32
    %c0_i32_0 = arith.constant 0 : i32
    %c0_i32_1 = arith.constant 0 : i32
    return %c0_i32, %c0_i32_0 : i32, i32
  }
  func.func @transform_5(%arg0: i32, %arg1: i32) -> (i32, i32) {
    %c0_i32 = arith.constant 0 : i32
    %c0_i32_0 = arith.constant 0 : i32
    %c0_i32_1 = arith.constant 0 : i32
    return %c0_i32, %c0_i32_0 : i32, i32
  }
  func.func @transform_6(%arg0: i32, %arg1: i32) -> (i32, i32) {
    %c0_i32 = arith.constant 0 : i32
    %c0_i32_0 = arith.constant 0 : i32
    %c0_i32_1 = arith.constant 0 : i32
    return %c0_i32, %c0_i32_0 : i32, i32
  }
  func.func @transform_7(%arg0: i32, %arg1: i32) -> (i32, i32) {
    %c0_i32 = arith.constant 0 : i32
    %c0_i32_0 = arith.constant 0 : i32
    return %arg0, %c0_i32 : i32, i32
  }
}

</mosaic_0001>

<bundles_post_ra>
// kernel: tpu_custom_call.1
= control target key start
LH: loop header
LB: loop body
LE: loop exit
PB: predicated region body
PF: predicated region fallthrough
CT: control target
= control target key end

     0   :  { %12 = vsyncpa [#allocation4], 0  ;;  %s9108_s0 = inlined_call_operand.hbm [shape: bf16[128,768], index: 0, kind: input, shape index: {}]   ;;  %s9109_s1 = inlined_call_operand.hbm [shape: bf16[768,1024], index: 1, kind: input, shape index: {}]   ;;  %s9110_s2 = inlined_call_operand.hbm [shape: f32[1,1024], index: 2, kind: input, shape index: {}]   ;;  %s9111_s3 = inlined_call_operand.hbm [shape: bf16[1024,256], index: 3, kind: input, shape index: {}]   ;;  %s9112_s4 = inlined_call_operand.hbm [shape: f32[1,128], index: 4, kind: input, shape index: {}]   ;;  %s9113_s5 = inlined_call_operand.hbm [shape: bf16[128,128], index: 5, kind: input, shape index: {}]   ;;  %s9114_s6 = inlined_call_operand.hbm [shape: f32[1,128], index: 6, kind: input, shape index: {}]   ;;  %s9115_s7 = inlined_call_operand.hbm [shape: f32[128,128], index: 7, kind: output, shape index: {}]  }
   0x1   :  { %13 = vsyncpa [#allocation7], 0 }
   0x2   :  { %14 = vsyncpa [#allocation10], 0 }
   0x3   :  { %15 = vsyncpa [#allocation13], 0 }
   0x4   :  { %16 = vsyncpa [#allocation5], 0  ;;  %s8020_s24 = smov [#allocation6]   ;;  %s7834_s28 = scalar_lea.hbm %s9109_s1, 49152 }
   0x5   :  { %s34_s25 = sshll.u32 %s8020_s24, 4  ;;  %p7835_p0 = scmp.ne.s32.totalorder %s9109_s1, %s7834_s28  ;;  %s35_s25 = int_to_ptr.vmem [resolvable:$true] %s34_s25 }
   0x6   :  { %p7838_p1 = scmp.lt.u32.totalorder %s7834_s28, %s9109_s1 }
   0x8   :  { %p7840_p2 = pnand %p7838_p1, %p7835_p0 }
   0xa   :  { %7843 = shalt.err (!%p7840_p2)
}
   0xb   :  { %s7844_s10 = scalar_lea.vmem %s35_s25, 49152  ;;  %p7849_p4 = scmp.lt.s32.totalorder %s35_s25, %s35_s25 }
   0xc   :  { %p7845_p3 = scmp.ne.s32.totalorder %s35_s25, %s7844_s10  ;;  %p7850_p5 = scmp.lt.s32.totalorder %s7844_s10, %s7844_s10 }
   0xe   :  { %p7851_p6 = por %p7850_p5, %p7849_p4 }
  0x10   :  { %p7852_p7 = pnand %p7851_p6, %p7845_p3 }
  0x12   :  { %7855 = shalt.err (!%p7852_p7)
}
  0x13   :  { %s8021_s11 = smov 512   ;;  %s8022_s12 = smov 32  }
  0x14   :  { %40 = dma.hbm_to_vmem [thread:$0]  %s9109_s1, 49152, %s35_s25, [#allocation7], %s8021_s11, %s8021_s11, %s8022_s12  }
  0x15   :  { %s8023_s15 = smov [#allocation9]   ;;  %s7856_s19 = scalar_lea.hbm %s9111_s3, 16384 }
  0x16   :  { %s56_s16 = sshll.u32 %s8023_s15, 4  ;;  %p7857_p8 = scmp.ne.s32.totalorder %s9111_s3, %s7856_s19  ;;  %s57_s16 = int_to_ptr.vmem [resolvable:$true] %s56_s16 }
  0x17   :  { %p7860_p9 = scmp.lt.u32.totalorder %s7856_s19, %s9111_s3 }
  0x19   :  { %p7862_p10 = pnand %p7860_p9, %p7857_p8 }
  0x1b   :  { %7865 = shalt.err (!%p7862_p10)
}
  0x1c   :  { %s7866_s24 = scalar_lea.vmem %s57_s16, 16384  ;;  %p7871_p12 = scmp.lt.s32.totalorder %s57_s16, %s57_s16 }
  0x1d   :  { %p7867_p11 = scmp.ne.s32.totalorder %s57_s16, %s7866_s24  ;;  %p7872_p13 = scmp.lt.s32.totalorder %s7866_s24, %s7866_s24 }
  0x1f   :  { %p7873_p0 = por %p7872_p13, %p7871_p12 }
  0x21   :  { %p7874_p1 = pnand %p7873_p0, %p7867_p11 }
  0x23   :  { %7877 = shalt.err (!%p7874_p1)
}
  0x24   :  { %s8024_s1 = smov 128   ;;  %s8025_s25 = smov 8  }
  0x25   :  { %62 = dma.hbm_to_vmem [thread:$0]  %s9111_s3, 16384, %s57_s16, [#allocation10], %s8024_s1, %s8024_s1, %s8025_s25  }
  0x26   :  { %s8026_s28 = smov [#allocation12]   ;;  %s7878_s9 = scalar_lea.hbm %s9113_s5, 1024 }
  0x27   :  { %s78_s29 = sshll.u32 %s8026_s28, 4  ;;  %p7879_p2 = scmp.ne.s32.totalorder %s9113_s5, %s7878_s9  ;;  %s79_s29 = int_to_ptr.vmem [resolvable:$true] %s78_s29 }
  0x28   :  { %p7882_p3 = scmp.lt.u32.totalorder %s7878_s9, %s9113_s5 }
  0x2a   :  { %p7884_p4 = pnand %p7882_p3, %p7879_p2 }
  0x2c   :  { %7887 = shalt.err (!%p7884_p4)
}
  0x2d   :  { %s7888_s14 = scalar_lea.vmem %s79_s29, 1024  ;;  %p7893_p6 = scmp.lt.s32.totalorder %s79_s29, %s79_s29 }
  0x2e   :  { %p7889_p5 = scmp.ne.s32.totalorder %s79_s29, %s7888_s14  ;;  %p7894_p7 = scmp.lt.s32.totalorder %s7888_s14, %s7888_s14 }
  0x30   :  { %p7895_p8 = por %p7894_p7, %p7893_p6 }
  0x32   :  { %p7896_p9 = pnand %p7895_p8, %p7889_p5 }
  0x34   :  { %7899 = shalt.err (!%p7896_p9)
}
  0x35   :  { %s8027_s3 = smov 64   ;;  %s8028_s15 = smov 4  }
  0x36   :  { %84 = dma.hbm_to_vmem [thread:$0]  %s9113_s5, 1024, %s79_s29, [#allocation13], %s8027_s3, %s8027_s3, %s8028_s15  }
  0x37   :  { %s8029_s18 = smov [#allocation3]   ;;  %s7900_s22 = scalar_lea.hbm %s9108_s0, 6144 }
  0x38   :  { %s22_s19 = sshll.u32 %s8029_s18, 4  ;;  %p7901_p10 = scmp.ne.s32.totalorder %s9108_s0, %s7900_s22  ;;  %s23_s19 = int_to_ptr.vmem [resolvable:$true] %s22_s19 }
  0x39   :  { %p7904_p11 = scmp.lt.u32.totalorder %s7900_s22, %s9108_s0 }
  0x3b   :  { %p7906_p12 = pnand %p7904_p11, %p7901_p10 }
  0x3d   :  { %7909 = shalt.err (!%p7906_p12)
}
  0x3e   :  { %s7910_s28 = scalar_lea.vmem %s23_s19, 6144  ;;  %p7915_p0 = scmp.lt.s32.totalorder %s23_s19, %s23_s19 }
  0x3f   :  { %p7911_p13 = scmp.ne.s32.totalorder %s23_s19, %s7910_s28  ;;  %p7916_p1 = scmp.lt.s32.totalorder %s7910_s28, %s7910_s28 }
  0x41   :  { %p7917_p2 = por %p7916_p1, %p7915_p0 }
  0x43   :  { %p7918_p3 = pnand %p7917_p2, %p7911_p13 }
  0x45   :  { %7921 = shalt.err (!%p7918_p3)
}
  0x46   :  { %s8030_s5 = smov 384   ;;  %s8031_s29 = smov 24  }
  0x47   :  { %28 = dma.hbm_to_vmem [thread:$0]  %s9108_s0, 6144, %s23_s19, [#allocation4], %s8030_s5, %s8030_s5, %s8031_s29  }
  0x48   :  { %s8032_s9 = smov [#allocation8]   ;;  %s8033_s11 = smov [#allocation11]  }
  0x49   :  { %s47_s10 = sshll.u32 %s8032_s9, 4  ;;  %s69_s12 = sshll.u32 %s8033_s11, 4  ;;  %s48_s10 = int_to_ptr.vmem [resolvable:$true] %s47_s10  ;;  %s70_s12 = int_to_ptr.vmem [resolvable:$true] %s69_s12 }
  0x4a   :  { %s7922_s3 = scalar_lea.hbm %s9110_s2, 128 }
  0x4b   :  { %p7923_p4 = scmp.ne.s32.totalorder %s9110_s2, %s7922_s3  ;;  %p7926_p5 = scmp.lt.u32.totalorder %s7922_s3, %s9110_s2 }
  0x4d   :  { %p7928_p6 = pnand %p7926_p5, %p7923_p4 }
  0x4f   :  { %7931 = shalt.err (!%p7928_p6)
}
  0x50   :  { %s7932_s0 = scalar_lea.vmem %s48_s10, 128  ;;  %p7937_p8 = scmp.lt.s32.totalorder %s48_s10, %s48_s10 }
  0x51   :  { %p7933_p7 = scmp.ne.s32.totalorder %s48_s10, %s7932_s0  ;;  %p7938_p9 = scmp.lt.s32.totalorder %s7932_s0, %s7932_s0 }
  0x53   :  { %p7939_p10 = por %p7938_p9, %p7937_p8 }
  0x55   :  { %p7940_p11 = pnand %p7939_p10, %p7933_p7 }
  0x57   :  { %7943 = shalt.err (!%p7940_p11)
}
  0x58   :  { %50 = dma.hbm_to_vmem [thread:$0]  %s9110_s2, 128, %s48_s10, [#allocation7]  }
  0x59   :  { %s7944_s23 = scalar_lea.hbm %s9112_s4, 16 }
  0x5a   :  { %p7945_p12 = scmp.ne.s32.totalorder %s9112_s4, %s7944_s23  ;;  %p7948_p13 = scmp.lt.u32.totalorder %s7944_s23, %s9112_s4 }
  0x5c   :  { %p7950_p0 = pnand %p7948_p13, %p7945_p12 }
  0x5e   :  { %7953 = shalt.err (!%p7950_p0)
}
  0x5f   :  { %s7954_s5 = scalar_lea.vmem %s70_s12, 16  ;;  %s7958_s29 = scalar_lea.vmem %s70_s12, 32 }
  0x60   :  { %p7955_p1 = scmp.ne.s32.totalorder %s70_s12, %s7954_s5  ;;  %p7959_p2 = scmp.lt.s32.totalorder %s70_s12, %s70_s12 }
  0x61   :  { %p7960_p3 = scmp.lt.s32.totalorder %s7958_s29, %s7954_s5 }
  0x63   :  { %p7961_p4 = por %p7960_p3, %p7959_p2 }
  0x65   :  { %p7962_p5 = pnand %p7961_p4, %p7955_p1 }
  0x67   :  { %7965 = shalt.err (!%p7962_p5)
}
  0x68   :  { %72 = dma.hbm_to_vmem [thread:$0]  %s9112_s4, 16, %s70_s12, [#allocation10]  }
  0x69   :  { %s8034_s8 = smov [#allocation14]   ;;  %s7966_s13 = scalar_lea.hbm %s9114_s6, 16 }
  0x6a   :  { %s91_s9 = sshll.u32 %s8034_s8, 4  ;;  %p7967_p6 = scmp.ne.s32.totalorder %s9114_s6, %s7966_s13  ;;  %s92_s9 = int_to_ptr.vmem [resolvable:$true] %s91_s9 }
  0x6b   :  { %p7970_p7 = scmp.lt.u32.totalorder %s7966_s13, %s9114_s6 }
  0x6d   :  { %p7972_p8 = pnand %p7970_p7, %p7967_p6 }
  0x6f   :  { %7975 = shalt.err (!%p7972_p8)
}
  0x70   :  { %s7976_s17 = scalar_lea.vmem %s92_s9, 16  ;;  %s7980_s4 = scalar_lea.vmem %s92_s9, 32 }
  0x71   :  { %p7977_p9 = scmp.ne.s32.totalorder %s92_s9, %s7976_s17  ;;  %p7981_p10 = scmp.lt.s32.totalorder %s92_s9, %s92_s9 }
  0x72   :  { %p7982_p11 = scmp.lt.s32.totalorder %s7980_s4, %s7976_s17 }
  0x74   :  { %p7983_p12 = por %p7982_p11, %p7981_p10 }
  0x76   :  { %p7984_p13 = pnand %p7983_p12, %p7977_p9 }
  0x78   :  { %7987 = shalt.err (!%p7984_p13)
}
  0x79   :  { %94 = dma.hbm_to_vmem [thread:$0]  %s9114_s6, 16, %s92_s9, [#allocation13]  }
  0x7a   :  { %8010 = dma.done.wait [#allocation4], 6144  }
  0x7b   :  { %8011 = vsyncadd [#allocation4], 4294961152 }
  0x7c   :  { %8012 = dma.done.wait [#allocation7], 49280  }
  0x7d   :  { %8013 = vsyncadd [#allocation7], 4294918016 }
  0x7e   :  { %8014 = dma.done.wait [#allocation10], 16400  }
  0x7f   :  { %8015 = vsyncadd [#allocation10], 4294950896 }
  0x80   :  { %8016 = dma.done.wait [#allocation13], 1040  }
  0x81   :  { %8017 = vsyncadd [#allocation13], 4294966256  ;;  %v425_v0 = vld [vmem:[#allocation6] sm:$0xff]  ;;  %s8035_s6 = smov [#allocation15]  }
  0x82   :  { %v429_v1 = vld [vmem:[#allocation6 + $0x20] sm:$0xff]  ;;  %s6418_s0 = sshll.u32 %s8035_s6, 4  ;;  %s6419_s0 = int_to_ptr.vmem [resolvable:$true] %s6418_s0 }
  0x83   :  { %v553_v2 = vld [vmem:[#allocation6 + $0x400] sm:$0xff]  ;;  %v6482_v3 = vcombine.high %v425_v0, %v429_v1  ;;  %v6481_v5 = vcombine.low %v425_v0, %v429_v1  ;;  %s7988_s19 = scalar_lea.vmem %s6419_s0, 2048  ;;  %p7993_p1 = scmp.lt.s32.totalorder %s6419_s0, %s6419_s0 }
  0x84   :  { %v557_v4 = vld [vmem:[#allocation6 + $0x420] sm:$0xff]  ;;  %p7989_p0 = scmp.ne.s32.totalorder %s6419_s0, %s7988_s19  ;;  %p7994_p2 = scmp.lt.s32.totalorder %s7988_s19, %s7988_s19 }
  0x85   :  { %v433_v6 = vld [vmem:[#allocation6 + $0x40] sm:$0xff]  ;;  %v6610_v8 = vcombine.high %v553_v2, %v557_v4  ;;  %v6609_v9 = vcombine.low %v553_v2, %v557_v4  ;;  %2969 = vmatprep.subr.bf16.mxu1 %v6482_v3 }
  0x86   :  { %v437_v7 = vld [vmem:[#allocation6 + $0x60] sm:$0xff]  ;;  %2970 = vmatpush1.bf16.msra.mxu1 %v6481_v5  ;;  %p7995_p3 = por %p7994_p2, %p7993_p1 }
  0x87   :  { %v6490_v10 = vcombine.high %v433_v6, %v437_v7  ;;  %v561_v11 = vld [vmem:[#allocation6 + $0x440] sm:$0xff]  ;;  %3082 = vmatprep.subr.bf16.mxu0 %v6610_v8  ;;  %v6489_v18 = vcombine.low %v433_v6, %v437_v7 }
  0x88   :  { %v565_v12 = vld [vmem:[#allocation6 + $0x460] sm:$0xff]  ;;  %3083 = vmatpush1.bf16.msra.mxu0 %v6609_v9  ;;  %p7996_p4 = pnand %p7995_p3, %p7989_p0 }
  0x89   :  { %v441_v13 = vld [vmem:[#allocation6 + $0x80] sm:$0xff]  ;;  %v6618_v14 = vcombine.high %v561_v11, %v565_v12  ;;  %2971 = vmatprep.subr.bf16.mxu1 %v6490_v10  ;;  %v6617_v19 = vcombine.low %v561_v11, %v565_v12 }
  0x8a   :  { %v445_v15 = vld [vmem:[#allocation6 + $0xa0] sm:$0xff]  ;;  %2972 = vmatpush1.bf16.msra.mxu1 %v6489_v18 }
  0x8b   :  { %v569_v16 = vld [vmem:[#allocation6 + $0x480] sm:$0xff]  ;;  %v6498_v20 = vcombine.high %v441_v13, %v445_v15  ;;  %3084 = vmatprep.subr.bf16.mxu0 %v6618_v14  ;;  %v6497_v26 = vcombine.low %v441_v13, %v445_v15 }
  0x8c   :  { %v573_v17 = vld [vmem:[#allocation6 + $0x4a0] sm:$0xff]  ;;  %3085 = vmatpush1.bf16.msra.mxu0 %v6617_v19 }
  0x8d   :  { %v6626_v21 = vcombine.high %v569_v16, %v573_v17  ;;  %v449_v22 = vld [vmem:[#allocation6 + $0xc0] sm:$0xff]  ;;  %2973 = vmatprep.subr.bf16.mxu1 %v6498_v20  ;;  %v6625_v27 = vcombine.low %v569_v16, %v573_v17 }
  0x8e   :  { %v453_v23 = vld [vmem:[#allocation6 + $0xe0] sm:$0xff]  ;;  %2974 = vmatpush1.bf16.msra.mxu1 %v6497_v26 }
  0x8f   :  { %v577_v24 = vld [vmem:[#allocation6 + $0x4c0] sm:$0xff]  ;;  %v6506_v28 = vcombine.high %v449_v22, %v453_v23  ;;  %3086 = vmatprep.subr.bf16.mxu0 %v6626_v21  ;;  %v6505_v34 = vcombine.low %v449_v22, %v453_v23 }
  0x90   :  { %v581_v25 = vld [vmem:[#allocation6 + $0x4e0] sm:$0xff]  ;;  %3087 = vmatpush1.bf16.msra.mxu0 %v6625_v27 }
  0x91   :  { %v6634_v29 = vcombine.high %v577_v24, %v581_v25  ;;  %v457_v30 = vld [vmem:[#allocation6 + $0x100] sm:$0xff]  ;;  %2975 = vmatprep.subr.bf16.mxu1 %v6506_v28  ;;  %v6633_v35 = vcombine.low %v577_v24, %v581_v25 }
  0x92   :  { %v461_v31 = vld [vmem:[#allocation6 + $0x120] sm:$0xff]  ;;  %2976 = vmatpush1.bf16.msra.mxu1 %v6505_v34 }
  0x93   :  { %v585_v32 = vld [vmem:[#allocation6 + $0x500] sm:$0xff]  ;;  %v6514_v36 = vcombine.high %v457_v30, %v461_v31  ;;  %3088 = vmatprep.subr.bf16.mxu0 %v6634_v29  ;;  %v6513_v42 = vcombine.low %v457_v30, %v461_v31 }
  0x94   :  { %v589_v33 = vld [vmem:[#allocation6 + $0x520] sm:$0xff]  ;;  %3089 = vmatpush1.bf16.msra.mxu0 %v6633_v35 }
  0x95   :  { %v6642_v37 = vcombine.high %v585_v32, %v589_v33  ;;  %v465_v38 = vld [vmem:[#allocation6 + $0x140] sm:$0xff]  ;;  %2977 = vmatprep.subr.bf16.mxu1 %v6514_v36  ;;  %v6641_v43 = vcombine.low %v585_v32, %v589_v33 }
  0x96   :  { %v469_v39 = vld [vmem:[#allocation6 + $0x160] sm:$0xff]  ;;  %2978 = vmatpush1.bf16.msra.mxu1 %v6513_v42 }
  0x97   :  { %v593_v40 = vld [vmem:[#allocation6 + $0x540] sm:$0xff]  ;;  %v6522_v44 = vcombine.high %v465_v38, %v469_v39  ;;  %3090 = vmatprep.subr.bf16.mxu0 %v6642_v37  ;;  %v6521_v50 = vcombine.low %v465_v38, %v469_v39 }
  0x98   :  { %v597_v41 = vld [vmem:[#allocation6 + $0x560] sm:$0xff]  ;;  %3091 = vmatpush1.bf16.msra.mxu0 %v6641_v43 }
  0x99   :  { %v6650_v45 = vcombine.high %v593_v40, %v597_v41  ;;  %v473_v46 = vld [vmem:[#allocation6 + $0x180] sm:$0xff]  ;;  %2979 = vmatprep.subr.bf16.mxu1 %v6522_v44  ;;  %v6649_v52 = vcombine.low %v593_v40, %v597_v41 }
  0x9a   :  { %v477_v47 = vld [vmem:[#allocation6 + $0x1a0] sm:$0xff]  ;;  %2980 = vmatpush1.bf16.msra.mxu1 %v6521_v50 }
  0x9b   :  { %v601_v48 = vld [vmem:[#allocation6 + $0x580] sm:$0xff]  ;;  %v6530_v53 = vcombine.high %v473_v46, %v477_v47  ;;  %3092 = vmatprep.subr.bf16.mxu0 %v6650_v45  ;;  %v6529_v60 = vcombine.low %v473_v46, %v477_v47 }
  0x9c   :  { %v605_v49 = vld [vmem:[#allocation6 + $0x5a0] sm:$0xff]  ;;  %3093 = vmatpush1.bf16.msra.mxu0 %v6649_v52 }
  0x9d   :  { %v481_v51 = vld [vmem:[#allocation6 + $0x1c0] sm:$0xff]  ;;  %v6658_v55 = vcombine.high %v601_v48, %v605_v49  ;;  %2981 = vmatprep.subr.bf16.mxu1 %v6530_v53  ;;  %v6657_v61 = vcombine.low %v601_v48, %v605_v49 }
  0x9e   :  { %v485_v54 = vld [vmem:[#allocation6 + $0x1e0] sm:$0xff]  ;;  %2982 = vmatpush1.bf16.msra.mxu1 %v6529_v60 }
  0x9f   :  { %v8163_v56 = vld [vmem:[#allocation3 + $0x4] ss:$24 sps:$4 sm:$0xff]   ;;  %v6538_v62 = vcombine.high %v481_v51, %v485_v54  ;;  %3094 = vmatprep.subr.bf16.mxu0 %v6658_v55  ;;  %v6537_v4 = vcombine.low %v481_v51, %v485_v54 }
  0xa0   :  { %v609_v57 = vld [vmem:[#allocation6 + $0x5c0] sm:$0xff]  ;;  %3001 = vmatprep.mubr.bf16.mxu1 %v8163_v56  ;;  %3095 = vmatpush1.bf16.msra.mxu0 %v6657_v61 }
  0xa1   :  { %v613_v58 = vld [vmem:[#allocation6 + $0x5e0] sm:$0xff]  ;;  %2983 = vmatprep.subr.bf16.mxu1 %v6538_v62 }
  0xa2   :  { %v7453_v59 = vld [vmem:[#allocation3 + $0xc] ss:$24 sps:$4 sm:$0xff]   ;;  %v6666_v0 = vcombine.high %v609_v57, %v613_v58  ;;  %v6665_v5 = vcombine.low %v609_v57, %v613_v58  ;;  %2984 = vmatpush1.bf16.msra.mxu1 %v6537_v4 }
  0xa3   :  { %v489_v63 = vld [vmem:[#allocation6 + $0x200] sm:$0xff]  ;;  %3114 = vmatprep.mubr.bf16.mxu0 %v7453_v59 }
  0xa4   :  { %v493_v1 = vld [vmem:[#allocation6 + $0x220] sm:$0xff]  ;;  %3096 = vmatprep.subr.bf16.mxu0 %v6666_v0 }
  0xa5   :  { %v617_v2 = vld [vmem:[#allocation6 + $0x600] sm:$0xff]  ;;  %v6546_v6 = vcombine.high %v489_v63, %v493_v1  ;;  %v6545_v12 = vcombine.low %v489_v63, %v493_v1  ;;  %3097 = vmatpush1.bf16.msra.mxu0 %v6665_v5 }
  0xa6   :  { %v621_v3 = vld [vmem:[#allocation6 + $0x620] sm:$0xff] }
  0xa7   :  { %v6674_v7 = vcombine.high %v617_v2, %v621_v3  ;;  %v497_v8 = vld [vmem:[#allocation6 + $0x240] sm:$0xff]  ;;  %2985 = vmatprep.subr.bf16.mxu1 %v6546_v6  ;;  %v6673_v13 = vcombine.low %v617_v2, %v621_v3  ;;  %v426_v2 = vld [vmem:[#allocation6 + $0x8] sm:$0xff] }
  0xa8   :  { %v501_v9 = vld [vmem:[#allocation6 + $0x260] sm:$0xff]  ;;  %2986 = vmatpush1.bf16.msra.mxu1 %v6545_v12  ;;  %v430_v3 = vld [vmem:[#allocation6 + $0x28] sm:$0xff] }
  0xa9   :  { %v625_v10 = vld [vmem:[#allocation6 + $0x640] sm:$0xff]  ;;  %v6554_v14 = vcombine.high %v497_v8, %v501_v9  ;;  %3098 = vmatprep.subr.bf16.mxu0 %v6674_v7  ;;  %v6553_v20 = vcombine.low %v497_v8, %v501_v9  ;;  %v6484_v7 = vcombine.high %v426_v2, %v430_v3  ;;  %v434_v9 = vld [vmem:[#allocation6 + $0x48] sm:$0xff] }
  0xaa   :  { %v629_v11 = vld [vmem:[#allocation6 + $0x660] sm:$0xff]  ;;  %3099 = vmatpush1.bf16.msra.mxu0 %v6673_v13 }
  0xab   :  { %v6682_v15 = vcombine.high %v625_v10, %v629_v11  ;;  %v505_v16 = vld [vmem:[#allocation6 + $0x280] sm:$0xff]  ;;  %2987 = vmatprep.subr.bf16.mxu1 %v6554_v14  ;;  %v6681_v21 = vcombine.low %v625_v10, %v629_v11  ;;  %v438_v10 = vld [vmem:[#allocation6 + $0x68] sm:$0xff] }
  0xac   :  { %v509_v17 = vld [vmem:[#allocation6 + $0x2a0] sm:$0xff]  ;;  %2988 = vmatpush1.bf16.msra.mxu1 %v6553_v20  ;;  %v442_v20 = vld [vmem:[#allocation6 + $0x88] sm:$0xff] }
  0xad   :  { %v633_v18 = vld [vmem:[#allocation6 + $0x680] sm:$0xff]  ;;  %v6562_v22 = vcombine.high %v505_v16, %v509_v17  ;;  %3100 = vmatprep.subr.bf16.mxu0 %v6682_v15  ;;  %v6561_v28 = vcombine.low %v505_v16, %v509_v17  ;;  %v6483_v15 = vcombine.low %v426_v2, %v430_v3  ;;  %v6492_v17 = vcombine.high %v434_v9, %v438_v10 }
  0xae   :  { %v637_v19 = vld [vmem:[#allocation6 + $0x6a0] sm:$0xff]  ;;  %3101 = vmatpush1.bf16.msra.mxu0 %v6681_v21  ;;  %v446_v21 = vld [vmem:[#allocation6 + $0xa8] sm:$0xff] }
  0xaf   :  { %v513_v23 = vld [vmem:[#allocation6 + $0x2c0] sm:$0xff]  ;;  %v6690_v24 = vcombine.high %v633_v18, %v637_v19  ;;  %2989 = vmatprep.subr.bf16.mxu1 %v6562_v22  ;;  %v6689_v29 = vcombine.low %v633_v18, %v637_v19  ;;  %v8168_v19 = vld [vmem:[#allocation3 + $0x34] ss:$24 sps:$4 sm:$0xff]  }
  0xb0   :  { %v517_v25 = vld [vmem:[#allocation6 + $0x2e0] sm:$0xff]  ;;  %2990 = vmatpush1.bf16.msra.mxu1 %v6561_v28  ;;  %v7459_v22 = vld [vmem:[#allocation3 + $0x3c] ss:$24 sps:$4 sm:$0xff]  }
  0xb1   :  { %v641_v26 = vld [vmem:[#allocation6 + $0x6c0] sm:$0xff]  ;;  %v6570_v30 = vcombine.high %v513_v23, %v517_v25  ;;  %3102 = vmatprep.subr.bf16.mxu0 %v6690_v24  ;;  %v6569_v36 = vcombine.low %v513_v23, %v517_v25  ;;  %v6491_v25 = vcombine.low %v434_v9, %v438_v10 }
  0xb2   :  { %v645_v27 = vld [vmem:[#allocation6 + $0x6e0] sm:$0xff]  ;;  %3103 = vmatpush1.bf16.msra.mxu0 %v6689_v29  ;;  %v450_v29 = vld [vmem:[#allocation6 + $0xc8] sm:$0xff] }
  0xb3   :  { %v521_v31 = vld [vmem:[#allocation6 + $0x300] sm:$0xff]  ;;  %v6698_v32 = vcombine.high %v641_v26, %v645_v27  ;;  %2991 = vmatprep.subr.bf16.mxu1 %v6570_v30  ;;  %v6697_v37 = vcombine.low %v641_v26, %v645_v27  ;;  %v6500_v27 = vcombine.high %v442_v20, %v446_v21  ;;  %v454_v30 = vld [vmem:[#allocation6 + $0xe8] sm:$0xff] }
  0xb4   :  { %v525_v33 = vld [vmem:[#allocation6 + $0x320] sm:$0xff]  ;;  %2992 = vmatpush1.bf16.msra.mxu1 %v6569_v36 }
  0xb5   :  { %v649_v34 = vld [vmem:[#allocation6 + $0x700] sm:$0xff]  ;;  %v6578_v38 = vcombine.high %v521_v31, %v525_v33  ;;  %3104 = vmatprep.subr.bf16.mxu0 %v6698_v32  ;;  %v6577_v44 = vcombine.low %v521_v31, %v525_v33  ;;  %v8172_v31 = vld [vmem:[#allocation3 + $0x30] ss:$24 sps:$4 sm:$0xff]  }
  0xb6   :  { %v653_v35 = vld [vmem:[#allocation6 + $0x720] sm:$0xff]  ;;  %3105 = vmatpush1.bf16.msra.mxu0 %v6697_v37  ;;  %v6508_v37 = vcombine.high %v450_v29, %v454_v30 }
  0xb7   :  { %v6706_v39 = vcombine.high %v649_v34, %v653_v35  ;;  %v529_v40 = vld [vmem:[#allocation6 + $0x340] sm:$0xff]  ;;  %2993 = vmatprep.subr.bf16.mxu1 %v6578_v38  ;;  %v6705_v45 = vcombine.low %v649_v34, %v653_v35  ;;  %v7462_v34 = vld [vmem:[#allocation3 + $0x38] ss:$24 sps:$4 sm:$0xff]   ;;  %v6499_v35 = vcombine.low %v442_v20, %v446_v21  ;;  %v494_v20 = vld [vmem:[#allocation6 + $0x228] sm:$0xff] }
  0xb8   :  { %v533_v41 = vld [vmem:[#allocation6 + $0x360] sm:$0xff]  ;;  %2994 = vmatpush1.bf16.msra.mxu1 %v6577_v44 }
  0xb9   :  { %v657_v42 = vld [vmem:[#allocation6 + $0x740] sm:$0xff]  ;;  %v6586_v46 = vcombine.high %v529_v40, %v533_v41  ;;  %3106 = vmatprep.subr.bf16.mxu0 %v6706_v39  ;;  %v6585_v52 = vcombine.low %v529_v40, %v533_v41  ;;  %v458_v40 = vld [vmem:[#allocation6 + $0x108] sm:$0xff] }
  0xba   :  { %v661_v43 = vld [vmem:[#allocation6 + $0x760] sm:$0xff]  ;;  %3107 = vmatpush1.bf16.msra.mxu0 %v6705_v45  ;;  %v462_v41 = vld [vmem:[#allocation6 + $0x128] sm:$0xff]  ;;  %v6507_v45 = vcombine.low %v450_v29, %v454_v30 }
  0xbb   :  { %v6714_v47 = vcombine.high %v657_v42, %v661_v43  ;;  %v537_v48 = vld [vmem:[#allocation6 + $0x380] sm:$0xff]  ;;  %2995 = vmatprep.subr.bf16.mxu1 %v6586_v46  ;;  %v6713_v53 = vcombine.low %v657_v42, %v661_v43  ;;  %v502_v29 = vld [vmem:[#allocation6 + $0x268] sm:$0xff] }
  0xbc   :  { %v541_v49 = vld [vmem:[#allocation6 + $0x3a0] sm:$0xff]  ;;  %2996 = vmatpush1.bf16.msra.mxu1 %v6585_v52 }
  0xbd   :  { %v665_v50 = vld [vmem:[#allocation6 + $0x780] sm:$0xff]  ;;  %v6594_v54 = vcombine.high %v537_v48, %v541_v49  ;;  %3108 = vmatprep.subr.bf16.mxu0 %v6714_v47  ;;  %v6593_v61 = vcombine.low %v537_v48, %v541_v49  ;;  %v6516_v47 = vcombine.high %v458_v40, %v462_v41  ;;  %v466_v49 = vld [vmem:[#allocation6 + $0x148] sm:$0xff] }
  0xbe   :  { %v669_v51 = vld [vmem:[#allocation6 + $0x7a0] sm:$0xff]  ;;  %3109 = vmatpush1.bf16.msra.mxu0 %v6713_v53 }
  0xbf   :  { %v545_v55 = vld [vmem:[#allocation6 + $0x3c0] sm:$0xff]  ;;  %v6722_v57 = vcombine.high %v665_v50, %v669_v51  ;;  %2997 = vmatprep.subr.bf16.mxu1 %v6594_v54  ;;  %v6721_v62 = vcombine.low %v665_v50, %v669_v51  ;;  %v470_v50 = vld [vmem:[#allocation6 + $0x168] sm:$0xff] }
  0xc0   :  { %v549_v58 = vld [vmem:[#allocation6 + $0x3e0] sm:$0xff]  ;;  %2998 = vmatpush1.bf16.msra.mxu1 %v6593_v61  ;;  %v474_v61 = vld [vmem:[#allocation6 + $0x188] sm:$0xff]  ;;  %v6523_v2 = vcombine.low %v466_v49, %v470_v50 }
  0xc1   :  { %v673_v59 = vld [vmem:[#allocation6 + $0x7c0] sm:$0xff]  ;;  %v6602_v63 = vcombine.high %v545_v55, %v549_v58  ;;  %3110 = vmatprep.subr.bf16.mxu0 %v6722_v57  ;;  %v6601_v5 = vcombine.low %v545_v55, %v549_v58  ;;  %v6515_v55 = vcombine.low %v458_v40, %v462_v41  ;;  %v6524_v58 = vcombine.high %v466_v49, %v470_v50  ;;  %v8192_v40 = vld [vmem:[#allocation3 + $0xf4] ss:$24 sps:$4 sm:$0xff]  }
  0xc2   :  { %v677_v60 = vld [vmem:[#allocation6 + $0x7e0] sm:$0xff]  ;;  %3111 = vmatpush1.bf16.msra.mxu0 %v6721_v62  ;;  %v478_v62 = vld [vmem:[#allocation6 + $0x1a8] sm:$0xff] }
  0xc3   :  { %v681_v0 = vld [vmem:[#allocation6 + $0x800] sm:$0xff]  ;;  %v6730_v1 = vcombine.high %v673_v59, %v677_v60  ;;  %2999 = vmatprep.subr.bf16.mxu1 %v6602_v63  ;;  %v6729_v6 = vcombine.low %v673_v59, %v677_v60  ;;  %v8180_v60 = vld [vmem:[#allocation3 + $0x94] ss:$24 sps:$4 sm:$0xff]  }
  0xc4   :  { %v685_v4 = vld [vmem:[#allocation6 + $0x820] sm:$0xff]  ;;  %3000 = vmatpush1.bf16.msra.mxu1 %v6601_v5  ;;  %v7471_v63 = vld [vmem:[#allocation3 + $0x9c] ss:$24 sps:$4 sm:$0xff]   ;;  %v506_v41 = vld [vmem:[#allocation6 + $0x288] sm:$0xff] }
  0xc5   :  { %3112 = vmatprep.subr.bf16.mxu0 %v6730_v1  ;;  %v6738_v8 = vcombine.high %v681_v0, %v685_v4  ;;  %v8166_v11 = vld [vmem:[#allocation3] ss:$24 sps:$4 sm:$0xff]   ;;  %v6737_v16 = vcombine.low %v681_v0, %v685_v4  ;;  %3308 = vmatprep.subr.bf16.mxu1 %v6484_v7  ;;  %v8174_v39 = vld [vmem:[#allocation3 + $0x64] ss:$24 sps:$4 sm:$0xff]   ;;  %v6532_v4 = vcombine.high %v474_v61, %v478_v62  ;;  %v486_v7 = vld [vmem:[#allocation6 + $0x1e8] sm:$0xff] }
  0xc6   :  { %v689_v12 = vld [vmem:[#allocation6 + $0x840] sm:$0xff]  ;;  %3113 = vmatpush1.bf16.msra.mxu0 %v6729_v6  ;;  %v482_v6 = vld [vmem:[#allocation6 + $0x1c8] sm:$0xff] }
  0xc7   :  { %v693_v13 = vld [vmem:[#allocation6 + $0x860] sm:$0xff]  ;;  %3195 = vmatprep.subr.bf16.mxu0 %v6738_v8  ;;  %3002 = vmatmul.mubr.bf16.vlgmr.msra.gmra.mrb[0].mxu1 %v8166_v11  ;;  %v8184_v8 = vld [vmem:[#allocation3 + $0x90] ss:$24 sps:$4 sm:$0xff]  }
  0xc8   :  { %v7456_v14 = vld [vmem:[#allocation3 + $0x8] ss:$24 sps:$4 sm:$0xff]   ;;  %v6746_v18 = vcombine.high %v689_v12, %v693_v13  ;;  %3309 = vmatpush1.bf16.msra.mxu1 %v6483_v15  ;;  %v6745_v26 = vcombine.low %v689_v12, %v693_v13  ;;  %3011 = vmatprep.mubr.bf16.mxu1 %v8168_v19  ;;  %v7465_v42 = vld [vmem:[#allocation3 + $0x6c] ss:$24 sps:$4 sm:$0xff]   ;;  %v7474_v12 = vld [vmem:[#allocation3 + $0x98] ss:$24 sps:$4 sm:$0xff]   ;;  %v6531_v13 = vcombine.low %v474_v61, %v478_v62 }
  0xc9   :  { %v697_v23 = vld [vmem:[#allocation6 + $0x880] sm:$0xff]  ;;  %3115 = vmatmul.mubr.bf16.vlgmr.msra.gmra.mrb[0].mxu0 %v7456_v14  ;;  %3310 = vmatprep.subr.bf16.mxu1 %v6492_v17  ;;  %v6540_v15 = vcombine.high %v482_v6, %v486_v7  ;;  %v514_v50 = vld [vmem:[#allocation6 + $0x2c8] sm:$0xff] }
  0xca   :  { %v701_v24 = vld [vmem:[#allocation6 + $0x8a0] sm:$0xff]  ;;  %3196 = vmatpush1.bf16.msra.mxu0 %v6737_v16  ;;  %3124 = vmatprep.mubr.bf16.mxu0 %v7459_v22 }
  0xcb   :  { %3197 = vmatprep.subr.bf16.mxu0 %v6746_v18  ;;  %v6754_v28 = vcombine.high %v697_v23, %v701_v24  ;;  %v705_v32 = vld [vmem:[#allocation6 + $0x8c0] sm:$0xff]  ;;  %v6753_v36 = vcombine.low %v697_v23, %v701_v24  ;;  %v490_v18 = vld [vmem:[#allocation6 + $0x208] sm:$0xff]  ;;  %v6539_v24 = vcombine.low %v482_v6, %v486_v7 }
  0xcc   :  { %v709_v33 = vld [vmem:[#allocation6 + $0x8e0] sm:$0xff]  ;;  %3311 = vmatpush1.bf16.msra.mxu1 %v6491_v25 }
  0xcd   :  { %3312 = vmatprep.subr.bf16.mxu1 %v6500_v27  ;;  %v6762_v38 = vcombine.high %v705_v32, %v709_v33  ;;  %v713_v43 = vld [vmem:[#allocation6 + $0x900] sm:$0xff]  ;;  %v6761_v46 = vcombine.low %v705_v32, %v709_v33 }
  0xce   :  { %3198 = vmatpush1.bf16.msra.mxu0 %v6745_v26  ;;  %v717_v44 = vld [vmem:[#allocation6 + $0x920] sm:$0xff]  ;;  %v6548_v26 = vcombine.high %v490_v18, %v494_v20 }
  0xcf   :  { %3199 = vmatprep.subr.bf16.mxu0 %v6754_v28  ;;  %3012 = vmatmul.mubr.bf16.gmra.mrb[4].mxu1 %v8172_v31  ;;  %v6770_v48 = vcombine.high %v713_v43, %v717_v44  ;;  %v8178_v51 = vld [vmem:[#allocation3 + $0x60] ss:$24 sps:$4 sm:$0xff]   ;;  %v6769_v57 = vcombine.low %v713_v43, %v717_v44  ;;  %v8186_v17 = vld [vmem:[#allocation3 + $0xc4] ss:$24 sps:$4 sm:$0xff]   ;;  %v498_v28 = vld [vmem:[#allocation6 + $0x248] sm:$0xff] }
  0xd0   :  { %3313 = vmatpush1.bf16.msra.mxu1 %v6499_v35  ;;  %3021 = vmatprep.mubr.bf16.mxu1 %v8174_v39  ;;  %v721_v52 = vld [vmem:[#allocation6 + $0x940] sm:$0xff]  ;;  %v6547_v35 = vcombine.low %v490_v18, %v494_v20  ;;  %v7483_v43 = vld [vmem:[#allocation3 + $0xfc] ss:$24 sps:$4 sm:$0xff]  }
  0xd1   :  { %3125 = vmatmul.mubr.bf16.gmra.mrb[4].mxu0 %v7462_v34  ;;  %3314 = vmatprep.subr.bf16.mxu1 %v6508_v37  ;;  %v725_v53 = vld [vmem:[#allocation6 + $0x960] sm:$0xff]  ;;  %v6556_v37 = vcombine.high %v498_v28, %v502_v29  ;;  %v8204_v20 = vld [vmem:[#allocation3 + $0x154] ss:$24 sps:$4 sm:$0xff]  }
  0xd2   :  { %3200 = vmatpush1.bf16.msra.mxu0 %v6753_v36  ;;  %3134 = vmatprep.mubr.bf16.mxu0 %v7465_v42  ;;  %v7468_v54 = vld [vmem:[#allocation3 + $0x68] ss:$24 sps:$4 sm:$0xff]   ;;  %v6778_v59 = vcombine.high %v721_v52, %v725_v53  ;;  %v6777_v3 = vcombine.low %v721_v52, %v725_v53  ;;  %v7477_v21 = vld [vmem:[#allocation3 + $0xcc] ss:$24 sps:$4 sm:$0xff]  }
  0xd3   :  { %3201 = vmatprep.subr.bf16.mxu0 %v6762_v38  ;;  %v729_v0 = vld [vmem:[#allocation6 + $0x980] sm:$0xff]  ;;  %v510_v42 = vld [vmem:[#allocation6 + $0x2a8] sm:$0xff] }
  0xd4   :  { %3315 = vmatpush1.bf16.msra.mxu1 %v6507_v45  ;;  %v733_v1 = vld [vmem:[#allocation6 + $0x9a0] sm:$0xff]  ;;  %v518_v52 = vld [vmem:[#allocation6 + $0x2e8] sm:$0xff] }
  0xd5   :  { %3316 = vmatprep.subr.bf16.mxu1 %v6516_v47  ;;  %v6786_v5 = vcombine.high %v729_v0, %v733_v1  ;;  %v737_v9 = vld [vmem:[#allocation6 + $0x9c0] sm:$0xff]  ;;  %v6785_v14 = vcombine.low %v729_v0, %v733_v1  ;;  %v8196_v53 = vld [vmem:[#allocation3 + $0xf0] ss:$24 sps:$4 sm:$0xff]   ;;  %v6572_v61 = vcombine.high %v514_v50, %v518_v52 }
  0xd6   :  { %3202 = vmatpush1.bf16.msra.mxu0 %v6761_v46  ;;  %v741_v10 = vld [vmem:[#allocation6 + $0x9e0] sm:$0xff]  ;;  %v6555_v46 = vcombine.low %v498_v28, %v502_v29  ;;  %v522_v0 = vld [vmem:[#allocation6 + $0x308] sm:$0xff] }
  0xd7   :  { %3203 = vmatprep.subr.bf16.mxu0 %v6770_v48  ;;  %3022 = vmatmul.mubr.bf16.gmra.mrb[8].mxu1 %v8178_v51  ;;  %v6794_v16 = vcombine.high %v737_v9, %v741_v10  ;;  %v745_v22 = vld [vmem:[#allocation6 + $0xa00] sm:$0xff]  ;;  %v6793_v25 = vcombine.low %v737_v9, %v741_v10  ;;  %v6564_v48 = vcombine.high %v506_v41, %v510_v42  ;;  %v526_v1 = vld [vmem:[#allocation6 + $0x328] sm:$0xff] }
  0xd8   :  { %3317 = vmatpush1.bf16.msra.mxu1 %v6515_v55  ;;  %3031 = vmatprep.mubr.bf16.mxu1 %v8180_v60  ;;  %v749_v23 = vld [vmem:[#allocation6 + $0xa20] sm:$0xff]  ;;  %v6580_v7 = vcombine.high %v522_v0, %v526_v1  ;;  %v6579_v18 = vcombine.low %v522_v0, %v526_v1  ;;  %v542_v28 = vld [vmem:[#allocation6 + $0x3a8] sm:$0xff]  ;;  %v439_v1 = vld [vmem:[#allocation6 + $0x70] sm:$0xff] }
  0xd9   :  { %3135 = vmatmul.mubr.bf16.gmra.mrb[8].mxu0 %v7468_v54  ;;  %3318 = vmatprep.subr.bf16.mxu1 %v6524_v58  ;;  %v6802_v27 = vcombine.high %v745_v22, %v749_v23  ;;  %v8190_v30 = vld [vmem:[#allocation3 + $0xc0] ss:$24 sps:$4 sm:$0xff]   ;;  %v6801_v36 = vcombine.low %v745_v22, %v749_v23  ;;  %v6563_v58 = vcombine.low %v506_v41, %v510_v42  ;;  %v7495_v23 = vld [vmem:[#allocation3 + $0x15c] ss:$24 sps:$4 sm:$0xff]   ;;  %v550_v42 = vld [vmem:[#allocation6 + $0x3e8] sm:$0xff] }
  0xda   :  { %3204 = vmatpush1.bf16.msra.mxu0 %v6769_v57  ;;  %3144 = vmatprep.mubr.bf16.mxu0 %v7471_v63  ;;  %v753_v32 = vld [vmem:[#allocation6 + $0xa40] sm:$0xff]  ;;  %v7486_v57 = vld [vmem:[#allocation3 + $0xf8] ss:$24 sps:$4 sm:$0xff]  }
  0xdb   :  { %3205 = vmatprep.subr.bf16.mxu0 %v6778_v59  ;;  %v757_v33 = vld [vmem:[#allocation6 + $0xa60] sm:$0xff] }
  0xdc   :  { %3319 = vmatpush1.bf16.msra.mxu1 %v6523_v2  ;;  %v7480_v34 = vld [vmem:[#allocation3 + $0xc8] ss:$24 sps:$4 sm:$0xff]   ;;  %v6810_v38 = vcombine.high %v753_v32, %v757_v33  ;;  %v6809_v47 = vcombine.low %v753_v32, %v757_v33  ;;  %v8198_v63 = vld [vmem:[#allocation3 + $0x124] ss:$24 sps:$4 sm:$0xff]  }
  0xdd   :  { %3320 = vmatprep.subr.bf16.mxu1 %v6532_v4  ;;  %v761_v44 = vld [vmem:[#allocation6 + $0xa80] sm:$0xff]  ;;  %v8207_v33 = vld [vmem:[#allocation3 + $0x150] ss:$24 sps:$4 sm:$0xff]  }
  0xde   :  { %3206 = vmatpush1.bf16.msra.mxu0 %v6777_v3  ;;  %v765_v45 = vld [vmem:[#allocation6 + $0xaa0] sm:$0xff] }
  0xdf   :  { %3207 = vmatprep.subr.bf16.mxu0 %v6786_v5  ;;  %3032 = vmatmul.mubr.bf16.gmra.mrb[12].mxu1 %v8184_v8  ;;  %v6818_v49 = vcombine.high %v761_v44, %v765_v45  ;;  %v769_v54 = vld [vmem:[#allocation6 + $0xac0] sm:$0xff]  ;;  %v6817_v59 = vcombine.low %v761_v44, %v765_v45  ;;  %v6571_v5 = vcombine.low %v514_v50, %v518_v52  ;;  %v7501_v44 = vld [vmem:[#allocation3 + $0x14] ss:$24 sps:$4 sm:$0xff]  }
  0xe0   :  { %3321 = vmatpush1.bf16.msra.mxu1 %v6531_v13  ;;  %3041 = vmatprep.mubr.bf16.mxu1 %v8186_v17  ;;  %v773_v55 = vld [vmem:[#allocation6 + $0xae0] sm:$0xff]  ;;  %v534_v13 = vld [vmem:[#allocation6 + $0x368] sm:$0xff]  ;;  %v431_v52 = vld [vmem:[#allocation6 + $0x30] sm:$0xff] }
  0xe1   :  { %3145 = vmatmul.mubr.bf16.gmra.mrb[12].mxu0 %v7474_v12  ;;  %3322 = vmatprep.subr.bf16.mxu1 %v6540_v15  ;;  %v6826_v62 = vcombine.high %v769_v54, %v773_v55  ;;  %v7489_v2 = vld [vmem:[#allocation3 + $0x12c] ss:$24 sps:$4 sm:$0xff]   ;;  %v6825_v6 = vcombine.low %v769_v54, %v773_v55  ;;  %v8202_v9 = vld [vmem:[#allocation3 + $0x120] ss:$24 sps:$4 sm:$0xff]  }
  0xe2   :  { %3208 = vmatpush1.bf16.msra.mxu0 %v6785_v14  ;;  %3154 = vmatprep.mubr.bf16.mxu0 %v7477_v21  ;;  %v777_v3 = vld [vmem:[#allocation6 + $0xb00] sm:$0xff]  ;;  %v530_v12 = vld [vmem:[#allocation6 + $0x348] sm:$0xff] }
  0xe3   :  { %3209 = vmatprep.subr.bf16.mxu0 %v6794_v16  ;;  %v781_v4 = vld [vmem:[#allocation6 + $0xb20] sm:$0xff]  ;;  %v6588_v22 = vcombine.high %v530_v12, %v534_v13  ;;  %v6587_v29 = vcombine.low %v530_v12, %v534_v13  ;;  %v447_v13 = vld [vmem:[#allocation6 + $0xb0] sm:$0xff] }
  0xe4   :  { %3323 = vmatpush1.bf16.msra.mxu1 %v6539_v24  ;;  %v6834_v10 = vcombine.high %v777_v3, %v781_v4  ;;  %v7492_v14 = vld [vmem:[#allocation3 + $0x128] ss:$24 sps:$4 sm:$0xff]   ;;  %v6833_v21 = vcombine.low %v777_v3, %v781_v4  ;;  %v7502_v3 = vld [vmem:[#allocation3 + $0x44] ss:$24 sps:$4 sm:$0xff]  }
  0xe5   :  { %3324 = vmatprep.subr.bf16.mxu1 %v6548_v26  ;;  %v785_v15 = vld [vmem:[#allocation6 + $0xb40] sm:$0xff]  ;;  %v538_v26 = vld [vmem:[#allocation6 + $0x388] sm:$0xff] }
  0xe6   :  { %3210 = vmatpush1.bf16.msra.mxu0 %v6793_v25  ;;  %v789_v16 = vld [vmem:[#allocation6 + $0xb60] sm:$0xff] }
  0xe7   :  { %3211 = vmatprep.subr.bf16.mxu0 %v6802_v27  ;;  %3042 = vmatmul.mubr.bf16.gmra.mrb[16].mxu1 %v8190_v30  ;;  %v793_v24 = vld [vmem:[#allocation6 + $0xb80] sm:$0xff]  ;;  %v6842_v27 = vcombine.high %v785_v15, %v789_v16  ;;  %v6841_v32 = vcombine.low %v785_v15, %v789_v16  ;;  %v578_v16 = vld [vmem:[#allocation6 + $0x4c8] sm:$0xff] }
  0xe8   :  { %3325 = vmatpush1.bf16.msra.mxu1 %v6547_v35  ;;  %3051 = vmatprep.mubr.bf16.mxu1 %v8192_v40  ;;  %v797_v25 = vld [vmem:[#allocation6 + $0xba0] sm:$0xff] }
  0xe9   :  { %3155 = vmatmul.mubr.bf16.gmra.mrb[16].mxu0 %v7480_v34  ;;  %3326 = vmatprep.subr.bf16.mxu1 %v6556_v37  ;;  %v6596_v34 = vcombine.high %v538_v26, %v542_v28  ;;  %v801_v35 = vld [vmem:[#allocation6 + $0xbc0] sm:$0xff]  ;;  %v546_v37 = vld [vmem:[#allocation6 + $0x3c8] sm:$0xff]  ;;  %v6850_v41 = vcombine.high %v793_v24, %v797_v25  ;;  %v6849_v45 = vcombine.low %v793_v24, %v797_v25  ;;  %v455_v24 = vld [vmem:[#allocation6 + $0xf0] sm:$0xff] }
  0xea   :  { %3212 = vmatpush1.bf16.msra.mxu0 %v6801_v36  ;;  %3164 = vmatprep.mubr.bf16.mxu0 %v7483_v43  ;;  %v805_v36 = vld [vmem:[#allocation6 + $0xbe0] sm:$0xff]  ;;  %v6595_v43 = vcombine.low %v538_v26, %v542_v28  ;;  %v6603_v54 = vcombine.low %v546_v37, %v550_v42  ;;  %v586_v28 = vld [vmem:[#allocation6 + $0x508] sm:$0xff] }
  0xeb   :  { %3213 = vmatprep.subr.bf16.mxu0 %v6810_v38  ;;  %v7498_v38 = vld [vmem:[#allocation3 + $0x158] ss:$24 sps:$4 sm:$0xff]   ;;  %v6858_v50 = vcombine.high %v801_v35, %v805_v36  ;;  %v6857_v55 = vcombine.low %v801_v35, %v805_v36 }
  0xec   :  { %3327 = vmatpush1.bf16.msra.mxu1 %v6555_v46  ;;  %v6604_v46 = vcombine.high %v546_v37, %v550_v42  ;;  %v463_v35 = vld [vmem:[#allocation6 + $0x130] sm:$0xff] }
  0xed   :  { %3328 = vmatprep.subr.bf16.mxu1 %v6564_v48  ;;  %v558_v48 = vld [vmem:[#allocation6 + $0x428] sm:$0xff]  ;;  %v467_v42 = vld [vmem:[#allocation6 + $0x150] sm:$0xff] }
  0xee   :  { %3214 = vmatpush1.bf16.msra.mxu0 %v6809_v47  ;;  %v554_v47 = vld [vmem:[#allocation6 + $0x408] sm:$0xff] }
  0xef   :  { %3215 = vmatprep.subr.bf16.mxu0 %v6818_v49  ;;  %3052 = vmatmul.mubr.bf16.gmra.mrb[20].mxu1 %v8196_v53  ;;  %v427_v49 = vld [vmem:[#allocation6 + $0x10] sm:$0xff] }
  0xf0   :  { %3329 = vmatpush1.bf16.msra.mxu1 %v6563_v58  ;;  %3061 = vmatprep.mubr.bf16.mxu1 %v8198_v63  ;;  %v562_v58 = vld [vmem:[#allocation6 + $0x448] sm:$0xff]  ;;  %v6486_v0 = vcombine.high %v427_v49, %v431_v52  ;;  %v6485_v4 = vcombine.low %v427_v49, %v431_v52  ;;  %v475_v52 = vld [vmem:[#allocation6 + $0x190] sm:$0xff] }
  0xf1   :  { %3165 = vmatmul.mubr.bf16.gmra.mrb[20].mxu0 %v7486_v57  ;;  %3330 = vmatprep.subr.bf16.mxu1 %v6572_v61  ;;  %v6612_v57 = vcombine.high %v554_v47, %v558_v48  ;;  %v435_v61 = vld [vmem:[#allocation6 + $0x50] sm:$0xff]  ;;  %v602_v49 = vld [vmem:[#allocation6 + $0x588] sm:$0xff] }
  0xf2   :  { %3216 = vmatpush1.bf16.msra.mxu0 %v6817_v59  ;;  %3174 = vmatprep.mubr.bf16.mxu0 %v7489_v2  ;;  %v566_v59 = vld [vmem:[#allocation6 + $0x468] sm:$0xff]  ;;  %v6611_v2 = vcombine.low %v554_v47, %v558_v48  ;;  %v6494_v12 = vcombine.high %v435_v61, %v439_v1 }
  0xf3   :  { %3217 = vmatprep.subr.bf16.mxu0 %v6826_v62  ;;  %v7499_v62 = vld [vmem:[#allocation3 + $0x10] ss:$24 sps:$4 sm:$0xff]  }
  0xf4   :  { %3331 = vmatpush1.bf16.msra.mxu1 %v6571_v5  ;;  %v6620_v5 = vcombine.high %v562_v58, %v566_v59 }
  0xf5   :  { %3332 = vmatprep.subr.bf16.mxu1 %v6580_v7  ;;  %v574_v7 = vld [vmem:[#allocation6 + $0x4a8] sm:$0xff] }
  0xf6   :  { %3218 = vmatpush1.bf16.msra.mxu0 %v6825_v6  ;;  %v570_v6 = vld [vmem:[#allocation6 + $0x488] sm:$0xff] }
  0xf7   :  { %3219 = vmatprep.subr.bf16.mxu0 %v6834_v10  ;;  %3062 = vmatmul.mubr.bf16.gmra.mrb[24].mxu1 %v8202_v9  ;;  %v443_v10 = vld [vmem:[#allocation6 + $0x90] sm:$0xff]  ;;  %v6628_v15 = vcombine.high %v570_v6, %v574_v7  ;;  %v6627_v25 = vcombine.low %v570_v6, %v574_v7  ;;  %v618_v6 = vld [vmem:[#allocation6 + $0x608] sm:$0xff] }
  0xf8   :  { %3333 = vmatpush1.bf16.msra.mxu1 %v6579_v18  ;;  %3071 = vmatprep.mubr.bf16.mxu1 %v8204_v20  ;;  %v582_v18 = vld [vmem:[#allocation6 + $0x4e8] sm:$0xff]  ;;  %v6501_v26 = vcombine.low %v443_v10, %v447_v13 }
  0xf9   :  { %3175 = vmatmul.mubr.bf16.gmra.mrb[24].mxu0 %v7492_v14  ;;  %3334 = vmatprep.subr.bf16.mxu1 %v6588_v22  ;;  %v6619_v14 = vcombine.low %v562_v58, %v566_v59  ;;  %v7504_v22 = vld [vmem:[#allocation3 + $0x40] ss:$24 sps:$4 sm:$0xff]   ;;  %v6635_v36 = vcombine.low %v578_v16, %v582_v18  ;;  %v610_v59 = vld [vmem:[#allocation6 + $0x5c8] sm:$0xff] }
  0xfa   :  { %3220 = vmatpush1.bf16.msra.mxu0 %v6833_v21  ;;  %3184 = vmatprep.mubr.bf16.mxu0 %v7495_v23  ;;  %v451_v21 = vld [vmem:[#allocation6 + $0xd0] sm:$0xff]  ;;  %v6502_v23 = vcombine.high %v443_v10, %v447_v13  ;;  %v622_v7 = vld [vmem:[#allocation6 + $0x628] sm:$0xff] }
  0xfb   :  { %3221 = vmatprep.subr.bf16.mxu0 %v6842_v27  ;;  %v6636_v27 = vcombine.high %v578_v16, %v582_v18  ;;  %v491_v10 = vld [vmem:[#allocation6 + $0x210] sm:$0xff]  ;;  %v630_v16 = vld [vmem:[#allocation6 + $0x668] sm:$0xff] }
  0xfc   :  { %3335 = vmatpush1.bf16.msra.mxu1 %v6587_v29  ;;  %v590_v29 = vld [vmem:[#allocation6 + $0x528] sm:$0xff]  ;;  %v495_v13 = vld [vmem:[#allocation6 + $0x230] sm:$0xff] }
  0xfd   :  { %3336 = vmatprep.subr.bf16.mxu1 %v6596_v34  ;;  %v6510_v34 = vcombine.high %v451_v21, %v455_v24  ;;  %v6644_v37 = vcombine.high %v586_v28, %v590_v29  ;;  %v499_v18 = vld [vmem:[#allocation6 + $0x250] sm:$0xff] }
  0xfe   :  { %3222 = vmatpush1.bf16.msra.mxu0 %v6841_v32  ;;  %v459_v32 = vld [vmem:[#allocation6 + $0x110] sm:$0xff] }
  0xff   :  { %3223 = vmatprep.subr.bf16.mxu0 %v6850_v41  ;;  %3072 = vmatmul.mubr.bf16.gmra.mrb[28].mxu1 %v8207_v33  ;;  %v598_v41 = vld [vmem:[#allocation6 + $0x568] sm:$0xff]  ;;  %v6517_v47 = vcombine.low %v459_v32, %v463_v35 }
 0x100   :  { %3337 = vmatpush1.bf16.msra.mxu1 %v6595_v43  ;;  %3340 = vmatprep.mubr.bf16.mxu1 %v8163_v56  ;;  %v6493_v56 = vcombine.low %v435_v61, %v439_v1  ;;  %v7507_v43 = vld [vmem:[#allocation3 + $0x70] ss:$24 sps:$4 sm:$0xff]  }
 0x101   :  { %3185 = vmatmul.mubr.bf16.gmra.mrb[28].mxu0 %v7498_v38  ;;  %3338 = vmatprep.subr.bf16.mxu1 %v6604_v46  ;;  %v594_v38 = vld [vmem:[#allocation6 + $0x548] sm:$0xff]  ;;  %v6643_v46 = vcombine.low %v586_v28, %v590_v29  ;;  %v507_v28 = vld [vmem:[#allocation6 + $0x290] sm:$0xff] }
 0x102   :  { %3224 = vmatpush1.bf16.msra.mxu0 %v6849_v45  ;;  %3227 = vmatprep.mubr.bf16.mxu0 %v7501_v44  ;;  %v6518_v44 = vcombine.high %v459_v32, %v463_v35  ;;  %v471_v45 = vld [vmem:[#allocation6 + $0x170] sm:$0xff]  ;;  %v6652_v48 = vcombine.high %v594_v38, %v598_v41  ;;  %v614_v61 = vld [vmem:[#allocation6 + $0x5e8] sm:$0xff] }
 0x103   :  { %3225 = vmatprep.subr.bf16.mxu0 %v6858_v50  ;;  %v606_v50 = vld [vmem:[#allocation6 + $0x5a8] sm:$0xff]  ;;  %v511_v32 = vld [vmem:[#allocation6 + $0x2b0] sm:$0xff] }
 0x104   :  { %3339 = vmatpush1.bf16.msra.mxu1 %v6603_v54  ;;  %v6526_v54 = vcombine.high %v467_v42, %v471_v45  ;;  %v6660_v58 = vcombine.high %v602_v49, %v606_v50 }
 0x105   :  { %3421 = vmatprep.subr.bf16.mxu1 %v6612_v57  ;;  %v6651_v57 = vcombine.low %v594_v38, %v598_v41  ;;  %v7516_v38 = vld [vmem:[#allocation3 + $0x100] ss:$24 sps:$4 sm:$0xff]   ;;  %v6566_v41 = vcombine.high %v507_v28, %v511_v32 }
 0x106   :  { %3226 = vmatpush1.bf16.msra.mxu0 %v6857_v55  ;;  %v479_v55 = vld [vmem:[#allocation6 + $0x1b0] sm:$0xff] }
 0x107   :  { %3647 = vmatprep.subr.bf16.mxu0 %v6486_v0  ;;  %3341 = vmatmul.mubr.bf16.vlgmr.msra.gmra.mrb[32].mxu1 %v8166_v11  ;;  %v7505_v11 = vld [vmem:[#allocation3 + $0x74] ss:$24 sps:$4 sm:$0xff]   ;;  %v7510_v0 = vld [vmem:[#allocation3 + $0xa0] ss:$24 sps:$4 sm:$0xff]   ;;  %v6534_v1 = vcombine.high %v475_v52, %v479_v55 }
 0x108   :  { %3422 = vmatpush1.bf16.msra.mxu1 %v6611_v2  ;;  %3350 = vmatprep.mubr.bf16.mxu1 %v8168_v19  ;;  %v6509_v19 = vcombine.low %v451_v21, %v455_v24  ;;  %v487_v2 = vld [vmem:[#allocation6 + $0x1f0] sm:$0xff]  ;;  %v6675_v24 = vcombine.low %v618_v6, %v622_v7 }
 0x109   :  { %3228 = vmatmul.mubr.bf16.vlgmr.msra.gmra.mrb[0].mxu0 %v7499_v62  ;;  %3423 = vmatprep.subr.bf16.mxu1 %v6620_v5  ;;  %v483_v62 = vld [vmem:[#allocation6 + $0x1d0] sm:$0xff]  ;;  %v6668_v5 = vcombine.high %v610_v59, %v614_v61 }
 0x10a   :  { %3648 = vmatpush1.bf16.msra.mxu0 %v6485_v4  ;;  %3237 = vmatprep.mubr.bf16.mxu0 %v7502_v3  ;;  %v6659_v3 = vcombine.low %v602_v49, %v606_v50  ;;  %v6533_v4 = vcombine.low %v475_v52, %v479_v55  ;;  %v7513_v21 = vld [vmem:[#allocation3 + $0xd0] ss:$24 sps:$4 sm:$0xff]  }
 0x10b   :  { %3649 = vmatprep.subr.bf16.mxu0 %v6494_v12  ;;  %v6542_v12 = vcombine.high %v483_v62, %v487_v2  ;;  %v527_v49 = vld [vmem:[#allocation6 + $0x330] sm:$0xff]  ;;  %v662_v55 = vld [vmem:[#allocation6 + $0x768] sm:$0xff] }
 0x10c   :  { %3424 = vmatpush1.bf16.msra.mxu1 %v6619_v14  ;;  %v6667_v14 = vcombine.low %v610_v59, %v614_v61  ;;  %v535_v59 = vld [vmem:[#allocation6 + $0x370] sm:$0xff]  ;;  %v8226_v61 = vld [vmem:[#allocation3 + $0x164] ss:$24 sps:$4 sm:$0xff]  }
 0x10d   :  { %3425 = vmatprep.subr.bf16.mxu1 %v6628_v15  ;;  %v626_v15 = vld [vmem:[#allocation6 + $0x648] sm:$0xff] }
 0x10e   :  { %3650 = vmatpush1.bf16.msra.mxu0 %v6493_v56  ;;  %v6676_v56 = vcombine.high %v618_v6, %v622_v7  ;;  %v674_v7 = vld [vmem:[#allocation6 + $0x7c8] sm:$0xff] }
 0x10f   :  { %3651 = vmatprep.subr.bf16.mxu0 %v6502_v23  ;;  %3351 = vmatmul.mubr.bf16.gmra.mrb[36].mxu1 %v8172_v31  ;;  %v7508_v31 = vld [vmem:[#allocation3 + $0xa4] ss:$24 sps:$4 sm:$0xff]   ;;  %v503_v23 = vld [vmem:[#allocation6 + $0x270] sm:$0xff] }
 0x110   :  { %3426 = vmatpush1.bf16.msra.mxu1 %v6627_v25  ;;  %3360 = vmatprep.mubr.bf16.mxu1 %v8174_v39  ;;  %v6525_v39 = vcombine.low %v467_v42, %v471_v45  ;;  %v6549_v25 = vcombine.low %v491_v10, %v495_v13  ;;  %v6558_v29 = vcombine.high %v499_v18, %v503_v23  ;;  %v519_v42 = vld [vmem:[#allocation6 + $0x2f0] sm:$0xff] }
 0x111   :  { %3238 = vmatmul.mubr.bf16.gmra.mrb[4].mxu0 %v7504_v22  ;;  %3427 = vmatprep.subr.bf16.mxu1 %v6636_v27  ;;  %v6550_v22 = vcombine.high %v491_v10, %v495_v13  ;;  %v638_v27 = vld [vmem:[#allocation6 + $0x6a8] sm:$0xff] }
 0x112   :  { %3652 = vmatpush1.bf16.msra.mxu0 %v6501_v26  ;;  %3247 = vmatprep.mubr.bf16.mxu0 %v7505_v11  ;;  %v6684_v11 = vcombine.high %v626_v15, %v630_v16  ;;  %v634_v26 = vld [vmem:[#allocation6 + $0x688] sm:$0xff] }
 0x113   :  { %3653 = vmatprep.subr.bf16.mxu0 %v6510_v34  ;;  %v6683_v34 = vcombine.low %v626_v15, %v630_v16  ;;  %v6692_v35 = vcombine.high %v634_v26, %v638_v27  ;;  %v678_v10 = vld [vmem:[#allocation6 + $0x7e8] sm:$0xff] }
 0x114   :  { %3428 = vmatpush1.bf16.msra.mxu1 %v6635_v36  ;;  %v642_v36 = vld [vmem:[#allocation6 + $0x6c8] sm:$0xff]  ;;  %v6732_v15 = vcombine.high %v674_v7, %v678_v10 }
 0x115   :  { %3429 = vmatprep.subr.bf16.mxu1 %v6644_v37  ;;  %v515_v37 = vld [vmem:[#allocation6 + $0x2d0] sm:$0xff] }
 0x116   :  { %3654 = vmatpush1.bf16.msra.mxu0 %v6509_v19  ;;  %v646_v19 = vld [vmem:[#allocation6 + $0x6e8] sm:$0xff] }
 0x117   :  { %3655 = vmatprep.subr.bf16.mxu0 %v6518_v44  ;;  %3361 = vmatmul.mubr.bf16.gmra.mrb[40].mxu1 %v8178_v51  ;;  %v7511_v51 = vld [vmem:[#allocation3 + $0xd4] ss:$24 sps:$4 sm:$0xff]   ;;  %v6565_v44 = vcombine.low %v507_v28, %v511_v32  ;;  %v6700_v45 = vcombine.high %v642_v36, %v646_v19  ;;  %v6699_v50 = vcombine.low %v642_v36, %v646_v19  ;;  %v8239_v28 = vld [vmem:[#allocation3 + $0x4] ss:$24 sps:$4 sm:$0xff]  }
 0x118   :  { %3430 = vmatpush1.bf16.msra.mxu1 %v6643_v46  ;;  %3370 = vmatprep.mubr.bf16.mxu1 %v8180_v60  ;;  %v6541_v60 = vcombine.low %v483_v62, %v487_v2  ;;  %v650_v46 = vld [vmem:[#allocation6 + $0x708] sm:$0xff] }
 0x119   :  { %3248 = vmatmul.mubr.bf16.gmra.mrb[8].mxu0 %v7507_v43  ;;  %3431 = vmatprep.subr.bf16.mxu1 %v6652_v48  ;;  %v6691_v43 = vcombine.low %v634_v26, %v638_v27  ;;  %v6574_v48 = vcombine.high %v515_v37, %v519_v42  ;;  %v670_v2 = vld [vmem:[#allocation6 + $0x7a8] sm:$0xff] }
 0x11a   :  { %3656 = vmatpush1.bf16.msra.mxu0 %v6517_v47  ;;  %3257 = vmatprep.mubr.bf16.mxu0 %v7508_v31  ;;  %v654_v31 = vld [vmem:[#allocation6 + $0x728] sm:$0xff]  ;;  %v523_v47 = vld [vmem:[#allocation6 + $0x310] sm:$0xff] }
 0x11b   :  { %3657 = vmatprep.subr.bf16.mxu0 %v6526_v54  ;;  %v6708_v52 = vcombine.high %v650_v46, %v654_v31  ;;  %v658_v54 = vld [vmem:[#allocation6 + $0x748] sm:$0xff]  ;;  %v6581_v62 = vcombine.low %v523_v47, %v527_v49 }
 0x11c   :  { %3432 = vmatpush1.bf16.msra.mxu1 %v6651_v57  ;;  %v531_v57 = vld [vmem:[#allocation6 + $0x350] sm:$0xff]  ;;  %v690_v26 = vld [vmem:[#allocation6 + $0x848] sm:$0xff] }
 0x11d   :  { %3433 = vmatprep.subr.bf16.mxu1 %v6660_v58  ;;  %v6582_v58 = vcombine.high %v523_v47, %v527_v49  ;;  %v694_v27 = vld [vmem:[#allocation6 + $0x868] sm:$0xff]  ;;  %v579_v49 = vld [vmem:[#allocation6 + $0x4d0] sm:$0xff] }
 0x11e   :  { %3658 = vmatpush1.bf16.msra.mxu0 %v6525_v39  ;;  %v8223_v39 = vld [vmem:[#allocation3 + $0x130] ss:$24 sps:$4 sm:$0xff]  }
 0x11f   :  { %3659 = vmatprep.subr.bf16.mxu0 %v6534_v1  ;;  %3371 = vmatmul.mubr.bf16.gmra.mrb[44].mxu1 %v8184_v8  ;;  %v7514_v8 = vld [vmem:[#allocation3 + $0x104] ss:$24 sps:$4 sm:$0xff]   ;;  %v666_v1 = vld [vmem:[#allocation6 + $0x788] sm:$0xff] }
 0x120   :  { %3434 = vmatpush1.bf16.msra.mxu1 %v6659_v3  ;;  %3380 = vmatprep.mubr.bf16.mxu1 %v8186_v17  ;;  %v6557_v17 = vcombine.low %v499_v18, %v503_v23  ;;  %v539_v3 = vld [vmem:[#allocation6 + $0x390] sm:$0xff]  ;;  %v6724_v6 = vcombine.high %v666_v1, %v670_v2  ;;  %v682_v18 = vld [vmem:[#allocation6 + $0x808] sm:$0xff] }
 0x121   :  { %3258 = vmatmul.mubr.bf16.gmra.mrb[12].mxu0 %v7510_v0  ;;  %3435 = vmatprep.subr.bf16.mxu1 %v6668_v5  ;;  %v6716_v0 = vcombine.high %v658_v54, %v662_v55  ;;  %v6589_v5 = vcombine.low %v531_v57, %v535_v59  ;;  %v559_v23 = vld [vmem:[#allocation6 + $0x430] sm:$0xff]  ;;  %v698_v36 = vld [vmem:[#allocation6 + $0x888] sm:$0xff] }
 0x122   :  { %3660 = vmatpush1.bf16.msra.mxu0 %v6533_v4  ;;  %3267 = vmatprep.mubr.bf16.mxu0 %v7511_v51  ;;  %v6590_v51 = vcombine.high %v531_v57, %v535_v59  ;;  %v543_v4 = vld [vmem:[#allocation6 + $0x3b0] sm:$0xff]  ;;  %v702_v19 = vld [vmem:[#allocation6 + $0x8a8] sm:$0xff] }
 0x123   :  { %3661 = vmatprep.subr.bf16.mxu0 %v6542_v12  ;;  %v547_v12 = vld [vmem:[#allocation6 + $0x3d0] sm:$0xff]  ;;  %v6598_v13 = vcombine.high %v539_v3, %v543_v4  ;;  %v710_v47 = vld [vmem:[#allocation6 + $0x8e8] sm:$0xff] }
 0x124   :  { %3436 = vmatpush1.bf16.msra.mxu1 %v6667_v14  ;;  %v551_v14 = vld [vmem:[#allocation6 + $0x3f0] sm:$0xff]  ;;  %v714_v57 = vld [vmem:[#allocation6 + $0x908] sm:$0xff] }
 0x125   :  { %3437 = vmatprep.subr.bf16.mxu1 %v6676_v56  ;;  %v6597_v56 = vcombine.low %v539_v3, %v543_v4  ;;  %v6606_v16 = vcombine.high %v547_v12, %v551_v14  ;;  %v8254_v59 = vld [vmem:[#allocation3 + $0x38] ss:$24 sps:$4 sm:$0xff]  }
 0x126   :  { %3662 = vmatpush1.bf16.msra.mxu0 %v6541_v60  ;;  %v6723_v60 = vcombine.low %v666_v1, %v670_v2 }
 0x127   :  { %3663 = vmatprep.subr.bf16.mxu0 %v6550_v22  ;;  %3381 = vmatmul.mubr.bf16.gmra.mrb[48].mxu1 %v8190_v30  ;;  %v7517_v30 = vld [vmem:[#allocation3 + $0x134] ss:$24 sps:$4 sm:$0xff]  }
 0x128   :  { %3438 = vmatpush1.bf16.msra.mxu1 %v6675_v24  ;;  %3390 = vmatprep.mubr.bf16.mxu1 %v8192_v40  ;;  %v6573_v40 = vcombine.low %v515_v37, %v519_v42  ;;  %v555_v22 = vld [vmem:[#allocation6 + $0x410] sm:$0xff]  ;;  %v6605_v24 = vcombine.low %v547_v12, %v551_v14  ;;  %v8242_v37 = vld [vmem:[#allocation3 + $0x8] ss:$24 sps:$4 sm:$0xff]  }
 0x129   :  { %3268 = vmatmul.mubr.bf16.gmra.mrb[16].mxu0 %v7513_v21  ;;  %3439 = vmatprep.subr.bf16.mxu1 %v6684_v11  ;;  %v686_v21 = vld [vmem:[#allocation6 + $0x828] sm:$0xff]  ;;  %v6614_v11 = vcombine.high %v555_v22, %v559_v23  ;;  %v8245_v42 = vld [vmem:[#allocation3] ss:$24 sps:$4 sm:$0xff]  }
 0x12a   :  { %3664 = vmatpush1.bf16.msra.mxu0 %v6549_v25  ;;  %3277 = vmatprep.mubr.bf16.mxu0 %v7514_v8  ;;  %v6740_v8 = vcombine.high %v682_v18, %v686_v21  ;;  %v8236_v25 = vld [vmem:[#allocation3 + $0xc] ss:$24 sps:$4 sm:$0xff]   ;;  %v6739_v32 = vcombine.low %v682_v18, %v686_v21  ;;  %v603_v18 = vld [vmem:[#allocation6 + $0x590] sm:$0xff] }
 0x12b   :  { %3665 = vmatprep.subr.bf16.mxu0 %v6558_v29  ;;  %v567_v29 = vld [vmem:[#allocation6 + $0x470] sm:$0xff] }
 0x12c   :  { %3440 = vmatpush1.bf16.msra.mxu1 %v6683_v34  ;;  %v6613_v34 = vcombine.low %v555_v22, %v559_v23  ;;  %v607_v21 = vld [vmem:[#allocation6 + $0x5b0] sm:$0xff]  ;;  %v8269_v22 = vld [vmem:[#allocation3 + $0x60] ss:$24 sps:$4 sm:$0xff]  }
 0x12d   :  { %3441 = vmatprep.subr.bf16.mxu1 %v6692_v35 }
 0x12e   :  { %3666 = vmatpush1.bf16.msra.mxu0 %v6557_v17  ;;  %v6748_v17 = vcombine.high %v690_v26, %v694_v27 }
 0x12f   :  { %3667 = vmatprep.subr.bf16.mxu0 %v6566_v41  ;;  %3391 = vmatmul.mubr.bf16.gmra.mrb[52].mxu1 %v8196_v53  ;;  %v6707_v53 = vcombine.low %v650_v46, %v654_v31  ;;  %v575_v41 = vld [vmem:[#allocation6 + $0x4b0] sm:$0xff]  ;;  %v706_v31 = vld [vmem:[#allocation6 + $0x8c8] sm:$0xff] }
 0x130   :  { %3442 = vmatpush1.bf16.msra.mxu1 %v6691_v43  ;;  %3400 = vmatprep.mubr.bf16.mxu1 %v8198_v63  ;;  %v6715_v63 = vcombine.low %v658_v54, %v662_v55  ;;  %v6747_v43 = vcombine.low %v690_v26, %v694_v27  ;;  %v6764_v54 = vcombine.high %v706_v31, %v710_v47  ;;  %v738_v26 = vld [vmem:[#allocation6 + $0x9c8] sm:$0xff] }
 0x131   :  { %3278 = vmatmul.mubr.bf16.gmra.mrb[20].mxu0 %v7516_v38  ;;  %3443 = vmatprep.subr.bf16.mxu1 %v6700_v45  ;;  %v571_v38 = vld [vmem:[#allocation6 + $0x490] sm:$0xff]  ;;  %v6763_v1 = vcombine.low %v706_v31, %v710_v47  ;;  %v742_v27 = vld [vmem:[#allocation6 + $0x9e8] sm:$0xff] }
 0x132   :  { %3668 = vmatpush1.bf16.msra.mxu0 %v6565_v44  ;;  %3287 = vmatprep.mubr.bf16.mxu0 %v7517_v30  ;;  %v6756_v44 = vcombine.high %v698_v36, %v702_v19  ;;  %v8248_v45 = vld [vmem:[#allocation3 + $0x3c] ss:$24 sps:$4 sm:$0xff]   ;;  %v6630_v46 = vcombine.high %v571_v38, %v575_v41 }
 0x133   :  { %3669 = vmatprep.subr.bf16.mxu0 %v6574_v48  ;;  %v8251_v48 = vld [vmem:[#allocation3 + $0x34] ss:$24 sps:$4 sm:$0xff]  }
 0x134   :  { %3444 = vmatpush1.bf16.msra.mxu1 %v6699_v50  ;;  %v583_v50 = vld [vmem:[#allocation6 + $0x4f0] sm:$0xff] }
 0x135   :  { %3445 = vmatprep.subr.bf16.mxu1 %v6708_v52  ;;  %v6629_v52 = vcombine.low %v571_v38, %v575_v41  ;;  %v6638_v55 = vcombine.high %v579_v49, %v583_v50  ;;  %v6637_v2 = vcombine.low %v579_v49, %v583_v50  ;;  %v750_v38 = vld [vmem:[#allocation6 + $0xa28] sm:$0xff]  ;;  %v8278_v41 = vld [vmem:[#allocation3 + $0x98] ss:$24 sps:$4 sm:$0xff]  }
 0x136   :  { %3670 = vmatpush1.bf16.msra.mxu0 %v6573_v40  ;;  %v6755_v40 = vcombine.low %v698_v36, %v702_v19  ;;  %v746_v19 = vld [vmem:[#allocation6 + $0xa08] sm:$0xff] }
 0x137   :  { %3671 = vmatprep.subr.bf16.mxu0 %v6582_v58  ;;  %3401 = vmatmul.mubr.bf16.gmra.mrb[56].mxu1 %v8202_v9  ;;  %v8232_v9 = vld [vmem:[#allocation3 + $0x160] ss:$24 sps:$4 sm:$0xff]   ;;  %v718_v58 = vld [vmem:[#allocation6 + $0x928] sm:$0xff]  ;;  %v6804_v47 = vcombine.high %v746_v19, %v750_v38 }
 0x138   :  { %3446 = vmatpush1.bf16.msra.mxu1 %v6707_v53  ;;  %3410 = vmatprep.mubr.bf16.mxu1 %v8204_v20  ;;  %v6731_v20 = vcombine.low %v674_v7, %v678_v10  ;;  %v587_v53 = vld [vmem:[#allocation6 + $0x510] sm:$0xff]  ;;  %v6772_v3 = vcombine.high %v714_v57, %v718_v58  ;;  %v6771_v12 = vcombine.low %v714_v57, %v718_v58  ;;  %v8284_v49 = vld [vmem:[#allocation3 + $0xcc] ss:$24 sps:$4 sm:$0xff]  }
 0x139   :  { %3288 = vmatmul.mubr.bf16.gmra.mrb[24].mxu0 %v8223_v39  ;;  %3447 = vmatprep.subr.bf16.mxu1 %v6716_v0  ;;  %v8257_v0 = vld [vmem:[#allocation3 + $0x30] ss:$24 sps:$4 sm:$0xff]   ;;  %v6803_v58 = vcombine.low %v746_v19, %v750_v38 }
 0x13a   :  { %3672 = vmatpush1.bf16.msra.mxu0 %v6581_v62  ;;  %3297 = vmatprep.mubr.bf16.mxu0 %v8226_v61  ;;  %v591_v62 = vld [vmem:[#allocation6 + $0x530] sm:$0xff] }
 0x13b   :  { %3673 = vmatprep.subr.bf16.mxu0 %v6590_v51  ;;  %v8260_v51 = vld [vmem:[#allocation3 + $0x6c] ss:$24 sps:$4 sm:$0xff]   ;;  %v6646_v4 = vcombine.high %v587_v53, %v591_v62  ;;  %v595_v7 = vld [vmem:[#allocation6 + $0x550] sm:$0xff] }
 0x13c   :  { %3448 = vmatpush1.bf16.msra.mxu1 %v6715_v63  ;;  %v722_v63 = vld [vmem:[#allocation6 + $0x948] sm:$0xff]  ;;  %v599_v10 = vld [vmem:[#allocation6 + $0x570] sm:$0xff] }
 0x13d   :  { %3449 = vmatprep.subr.bf16.mxu1 %v6724_v6  ;;  %v8263_v6 = vld [vmem:[#allocation3 + $0x64] ss:$24 sps:$4 sm:$0xff]   ;;  %v631_v57 = vld [vmem:[#allocation6 + $0x670] sm:$0xff] }
 0x13e   :  { %3674 = vmatpush1.bf16.msra.mxu0 %v6589_v5  ;;  %v726_v5 = vld [vmem:[#allocation6 + $0x968] sm:$0xff] }
 0x13f   :  { %3675 = vmatprep.subr.bf16.mxu0 %v6598_v13  ;;  %3411 = vmatmul.mubr.bf16.gmra.mrb[60].mxu1 %v8207_v33  ;;  %v563_v33 = vld [vmem:[#allocation6 + $0x450] sm:$0xff]  ;;  %v6645_v13 = vcombine.low %v587_v53, %v591_v62  ;;  %v6780_v14 = vcombine.high %v722_v63, %v726_v5  ;;  %v6779_v23 = vcombine.low %v722_v63, %v726_v5 }
 0x140   :  { %3450 = vmatpush1.bf16.msra.mxu1 %v6723_v60  ;;  %3453 = vmatprep.mubr.bf16.mxu1 %v8236_v25  ;;  %v6622_v35 = vcombine.high %v563_v33, %v567_v29  ;;  %v6621_v30 = vcombine.low %v563_v33, %v567_v29  ;;  %v6654_v60 = vcombine.high %v595_v7, %v599_v10  ;;  %v8275_v33 = vld [vmem:[#allocation3 + $0x94] ss:$24 sps:$4 sm:$0xff]  }
 0x141   :  { %3298 = vmatmul.mubr.bf16.gmra.mrb[28].mxu0 %v8232_v9  ;;  %3451 = vmatprep.subr.bf16.mxu1 %v6732_v15  ;;  %v734_v15 = vld [vmem:[#allocation6 + $0x9a8] sm:$0xff]  ;;  %v611_v29 = vld [vmem:[#allocation6 + $0x5d0] sm:$0xff] }
 0x142   :  { %3676 = vmatpush1.bf16.msra.mxu0 %v6597_v56  ;;  %3679 = vmatprep.mubr.bf16.mxu0 %v8239_v28  ;;  %v730_v56 = vld [vmem:[#allocation6 + $0x988] sm:$0xff]  ;;  %v635_v63 = vld [vmem:[#allocation6 + $0x690] sm:$0xff] }
 0x143   :  { %3677 = vmatprep.subr.bf16.mxu0 %v6606_v16  ;;  %v8266_v16 = vld [vmem:[#allocation3 + $0x68] ss:$24 sps:$4 sm:$0xff]   ;;  %v639_v5 = vld [vmem:[#allocation6 + $0x6b0] sm:$0xff] }
 0x144   :  { %3452 = vmatpush1.bf16.msra.mxu1 %v6731_v20  ;;  %v6653_v20 = vcombine.low %v595_v7, %v599_v10  ;;  %v8293_v7 = vld [vmem:[#allocation3 + $0xc0] ss:$24 sps:$4 sm:$0xff]  }
 0x145   :  { %3534 = vmatprep.subr.bf16.mxu1 %v6740_v8  ;;  %v8272_v8 = vld [vmem:[#allocation3 + $0x9c] ss:$24 sps:$4 sm:$0xff]  }
 0x146   :  { %3678 = vmatpush1.bf16.msra.mxu0 %v6605_v24  ;;  %v6788_v24 = vcombine.high %v730_v56, %v734_v15 }
 0x147   :  { %3760 = vmatprep.subr.bf16.mxu0 %v6614_v11  ;;  %3454 = vmatmul.mubr.bf16.vlgmr.msra.gmra.mrb[32].mxu1 %v8242_v37  ;;  %v6662_v11 = vcombine.high %v603_v18, %v607_v21 }
 0x148   :  { %3535 = vmatpush1.bf16.msra.mxu1 %v6739_v32  ;;  %3463 = vmatprep.mubr.bf16.mxu1 %v8248_v45  ;;  %v615_v32 = vld [vmem:[#allocation6 + $0x5f0] sm:$0xff] }
 0x149   :  { %3680 = vmatmul.mubr.bf16.vlgmr.msra.gmra.mrb[32].mxu0 %v8245_v42  ;;  %3536 = vmatprep.subr.bf16.mxu1 %v6748_v17  ;;  %v6661_v17 = vcombine.low %v603_v18, %v607_v21  ;;  %v6670_v36 = vcombine.high %v611_v29, %v615_v32  ;;  %v6669_v31 = vcombine.low %v611_v29, %v615_v32  ;;  %v8299_v18 = vld [vmem:[#allocation3 + $0xf4] ss:$24 sps:$4 sm:$0xff]   ;;  %v8302_v32 = vld [vmem:[#allocation3 + $0xf8] ss:$24 sps:$4 sm:$0xff]  }
 0x14a   :  { %3761 = vmatpush1.bf16.msra.mxu0 %v6613_v34  ;;  %3689 = vmatprep.mubr.bf16.mxu0 %v8251_v48  ;;  %v6787_v34 = vcombine.low %v730_v56, %v734_v15  ;;  %v770_v56 = vld [vmem:[#allocation6 + $0xac8] sm:$0xff]  ;;  %v643_v21 = vld [vmem:[#allocation6 + $0x6d0] sm:$0xff] }
 0x14b   :  { %3762 = vmatprep.subr.bf16.mxu0 %v6622_v35  ;;  %v6796_v35 = vcombine.high %v738_v26, %v742_v27  ;;  %v774_v15 = vld [vmem:[#allocation6 + $0xae8] sm:$0xff] }
 0x14c   :  { %3537 = vmatpush1.bf16.msra.mxu1 %v6747_v43  ;;  %v619_v43 = vld [vmem:[#allocation6 + $0x610] sm:$0xff]  ;;  %v782_v29 = vld [vmem:[#allocation6 + $0xb28] sm:$0xff] }
 0x14d   :  { %3538 = vmatprep.subr.bf16.mxu1 %v6756_v44  ;;  %v8281_v44 = vld [vmem:[#allocation3 + $0x90] ss:$24 sps:$4 sm:$0xff]  }
 0x14e   :  { %3763 = vmatpush1.bf16.msra.mxu0 %v6621_v30  ;;  %v623_v30 = vld [vmem:[#allocation6 + $0x630] sm:$0xff] }
 0x14f   :  { %3764 = vmatprep.subr.bf16.mxu0 %v6630_v46  ;;  %3464 = vmatmul.mubr.bf16.gmra.mrb[36].mxu1 %v8254_v59  ;;  %v6795_v46 = vcombine.low %v738_v26, %v742_v27  ;;  %v6678_v50 = vcombine.high %v619_v43, %v623_v30  ;;  %v6677_v53 = vcombine.low %v619_v43, %v623_v30  ;;  %v778_v27 = vld [vmem:[#allocation6 + $0xb08] sm:$0xff] }
 0x150   :  { %3539 = vmatpush1.bf16.msra.mxu1 %v6755_v40  ;;  %3473 = vmatprep.mubr.bf16.mxu1 %v8260_v51  ;;  %v754_v40 = vld [vmem:[#allocation6 + $0xa48] sm:$0xff]  ;;  %v6836_v38 = vcombine.high %v778_v27, %v782_v29 }
 0x151   :  { %3690 = vmatmul.mubr.bf16.gmra.mrb[36].mxu0 %v8257_v0  ;;  %3540 = vmatprep.subr.bf16.mxu1 %v6764_v54  ;;  %v8287_v54 = vld [vmem:[#allocation3 + $0xc4] ss:$24 sps:$4 sm:$0xff]  }
 0x152   :  { %3765 = vmatpush1.bf16.msra.mxu0 %v6629_v52  ;;  %3699 = vmatprep.mubr.bf16.mxu0 %v8263_v6  ;;  %v758_v52 = vld [vmem:[#allocation6 + $0xa68] sm:$0xff] }
 0x153   :  { %3766 = vmatprep.subr.bf16.mxu0 %v6638_v55  ;;  %v627_v55 = vld [vmem:[#allocation6 + $0x650] sm:$0xff]  ;;  %v6812_v62 = vcombine.high %v754_v40, %v758_v52  ;;  %v6811_v10 = vcombine.low %v754_v40, %v758_v52  ;;  %v8308_v43 = vld [vmem:[#allocation3 + $0x12c] ss:$24 sps:$4 sm:$0xff]   ;;  %v6835_v52 = vcombine.low %v778_v27, %v782_v29  ;;  %v428_v29 = vld [vmem:[#allocation6 + $0x18] sm:$0xff] }
 0x154   :  { %3541 = vmatpush1.bf16.msra.mxu1 %v6763_v1  ;;  %v6686_v1 = vcombine.high %v627_v55, %v631_v57  ;;  %v663_v40 = vld [vmem:[#allocation6 + $0x770] sm:$0xff] }
 0x155   :  { %3542 = vmatprep.subr.bf16.mxu1 %v6772_v3  ;;  %v766_v3 = vld [vmem:[#allocation6 + $0xaa8] sm:$0xff] }
 0x156   :  { %3767 = vmatpush1.bf16.msra.mxu0 %v6637_v2  ;;  %v762_v2 = vld [vmem:[#allocation6 + $0xa88] sm:$0xff] }
 0x157   :  { %3768 = vmatprep.subr.bf16.mxu0 %v6646_v4  ;;  %3474 = vmatmul.mubr.bf16.gmra.mrb[40].mxu1 %v8266_v16  ;;  %v8290_v4 = vld [vmem:[#allocation3 + $0xc8] ss:$24 sps:$4 sm:$0xff]  }
 0x158   :  { %3543 = vmatpush1.bf16.msra.mxu1 %v6771_v12  ;;  %3483 = vmatprep.mubr.bf16.mxu1 %v8272_v8  ;;  %v6685_v12 = vcombine.low %v627_v55, %v631_v57 }
 0x159   :  { %3700 = vmatmul.mubr.bf16.gmra.mrb[40].mxu0 %v8269_v22  ;;  %3544 = vmatprep.subr.bf16.mxu1 %v6780_v14  ;;  %v8296_v14 = vld [vmem:[#allocation3 + $0xfc] ss:$24 sps:$4 sm:$0xff]  }
 0x15a   :  { %3769 = vmatpush1.bf16.msra.mxu0 %v6645_v13  ;;  %3709 = vmatprep.mubr.bf16.mxu0 %v8275_v33  ;;  %v6820_v13 = vcombine.high %v762_v2, %v766_v3 }
 0x15b   :  { %3770 = vmatprep.subr.bf16.mxu0 %v6654_v60  ;;  %v6694_v60 = vcombine.high %v635_v63, %v639_v5 }
 0x15c   :  { %3545 = vmatpush1.bf16.msra.mxu1 %v6779_v23  ;;  %v647_v23 = vld [vmem:[#allocation6 + $0x6f0] sm:$0xff] }
 0x15d   :  { %3546 = vmatprep.subr.bf16.mxu1 %v6788_v24  ;;  %v6693_v24 = vcombine.low %v635_v63, %v639_v5  ;;  %v6702_v26 = vcombine.high %v643_v21, %v647_v23  ;;  %v6701_v19 = vcombine.low %v643_v21, %v647_v23  ;;  %v8317_v63 = vld [vmem:[#allocation3 + $0x120] ss:$24 sps:$4 sm:$0xff]   ;;  %v8323_v21 = vld [vmem:[#allocation3 + $0x154] ss:$24 sps:$4 sm:$0xff]  }
 0x15e   :  { %3771 = vmatpush1.bf16.msra.mxu0 %v6653_v20  ;;  %v6819_v20 = vcombine.low %v762_v2, %v766_v3  ;;  %v667_v2 = vld [vmem:[#allocation6 + $0x790] sm:$0xff]  ;;  %9121 = vst [vmem:[#allocation22_spill] sm:$0xff] %v8317_v63  ;;  %9122 = vst [vmem:[#allocation23_spill] sm:$0xff] %v8323_v21 }
 0x15f   :  { %3772 = vmatprep.subr.bf16.mxu0 %v6662_v11  ;;  %3484 = vmatmul.mubr.bf16.gmra.mrb[44].mxu1 %v8278_v41  ;;  %v6828_v11 = vcombine.high %v770_v56, %v774_v15  ;;  %v671_v3 = vld [vmem:[#allocation6 + $0x7b0] sm:$0xff] }
 0x160   :  { %3547 = vmatpush1.bf16.msra.mxu1 %v6787_v34  ;;  %3493 = vmatprep.mubr.bf16.mxu1 %v8284_v49  ;;  %v651_v34 = vld [vmem:[#allocation6 + $0x710] sm:$0xff] }
 0x161   :  { %3710 = vmatmul.mubr.bf16.gmra.mrb[44].mxu0 %v8281_v44  ;;  %3548 = vmatprep.subr.bf16.mxu1 %v6796_v35  ;;  %v8305_v35 = vld [vmem:[#allocation3 + $0xf0] ss:$24 sps:$4 sm:$0xff]  }
 0x162   :  { %3773 = vmatpush1.bf16.msra.mxu0 %v6661_v17  ;;  %3719 = vmatprep.mubr.bf16.mxu0 %v8287_v54  ;;  %v655_v17 = vld [vmem:[#allocation6 + $0x730] sm:$0xff] }
 0x163   :  { %3774 = vmatprep.subr.bf16.mxu0 %v6670_v36  ;;  %v6827_v36 = vcombine.low %v770_v56, %v774_v15  ;;  %v6710_v30 = vcombine.high %v651_v34, %v655_v17  ;;  %v6709_v55 = vcombine.low %v651_v34, %v655_v17  ;;  %v802_v56 = vld [vmem:[#allocation6 + $0xbc8] sm:$0xff]  ;;  %v675_v23 = vld [vmem:[#allocation6 + $0x7d0] sm:$0xff]  ;;  %v432_v34 = vld [vmem:[#allocation6 + $0x38] sm:$0xff] }
 0x164   :  { %3549 = vmatpush1.bf16.msra.mxu1 %v6795_v46  ;;  %v786_v46 = vld [vmem:[#allocation6 + $0xb48] sm:$0xff]  ;;  %v8326_v17 = vld [vmem:[#allocation3 + $0x158] ss:$24 sps:$4 sm:$0xff]  }
 0x165   :  { %3550 = vmatprep.subr.bf16.mxu1 %v6804_v47  ;;  %v8311_v47 = vld [vmem:[#allocation3 + $0x124] ss:$24 sps:$4 sm:$0xff]   ;;  %v806_v15 = vld [vmem:[#allocation6 + $0xbe8] sm:$0xff] }
 0x166   :  { %3775 = vmatpush1.bf16.msra.mxu0 %v6669_v31  ;;  %v790_v31 = vld [vmem:[#allocation6 + $0xb68] sm:$0xff]  ;;  %9120 = vst [vmem:[#allocation21_spill] sm:$0xff] %v8311_v47 }
 0x167   :  { %3776 = vmatprep.subr.bf16.mxu0 %v6678_v50  ;;  %3494 = vmatmul.mubr.bf16.gmra.mrb[48].mxu1 %v8290_v4  ;;  %v659_v50 = vld [vmem:[#allocation6 + $0x750] sm:$0xff]  ;;  %v6844_v57 = vcombine.high %v786_v46, %v790_v31  ;;  %v6843_v5 = vcombine.low %v786_v46, %v790_v31  ;;  %v6488_v31 = vcombine.high %v428_v29, %v432_v34 }
 0x168   :  { %3551 = vmatpush1.bf16.msra.mxu1 %v6803_v58  ;;  %3503 = vmatprep.mubr.bf16.mxu1 %v8296_v14  ;;  %v6718_v58 = vcombine.high %v659_v50, %v663_v40 }
 0x169   :  { %3720 = vmatmul.mubr.bf16.gmra.mrb[48].mxu0 %v8293_v7  ;;  %3552 = vmatprep.subr.bf16.mxu1 %v6812_v62  ;;  %v798_v62 = vld [vmem:[#allocation6 + $0xba8] sm:$0xff] }
 0x16a   :  { %3777 = vmatpush1.bf16.msra.mxu0 %v6677_v53  ;;  %3729 = vmatprep.mubr.bf16.mxu0 %v8299_v18  ;;  %v794_v53 = vld [vmem:[#allocation6 + $0xb88] sm:$0xff] }
 0x16b   :  { %3778 = vmatprep.subr.bf16.mxu0 %v6686_v1  ;;  %v8314_v1 = vld [vmem:[#allocation3 + $0x128] ss:$24 sps:$4 sm:$0xff]  }
 0x16c   :  { %3553 = vmatpush1.bf16.msra.mxu1 %v6811_v10  ;;  %v6717_v10 = vcombine.low %v659_v50, %v663_v40  ;;  %v8329_v50 = vld [vmem:[#allocation3 + $0x14] ss:$24 sps:$4 sm:$0xff]  }
 0x16d   :  { %3554 = vmatprep.subr.bf16.mxu1 %v6820_v13  ;;  %v8320_v13 = vld [vmem:[#allocation3 + $0x15c] ss:$24 sps:$4 sm:$0xff]  }
 0x16e   :  { %3779 = vmatpush1.bf16.msra.mxu0 %v6685_v12  ;;  %v6852_v12 = vcombine.high %v794_v53, %v798_v62 }
 0x16f   :  { %3780 = vmatprep.subr.bf16.mxu0 %v6694_v60  ;;  %3504 = vmatmul.mubr.bf16.gmra.mrb[52].mxu1 %v8302_v32  ;;  %v6726_v60 = vcombine.high %v667_v2, %v671_v3 }
 0x170   :  { %3555 = vmatpush1.bf16.msra.mxu1 %v6819_v20  ;;  %3513 = vmatprep.mubr.bf16.mxu1 %v8308_v43  ;;  %v679_v20 = vld [vmem:[#allocation6 + $0x7f0] sm:$0xff] }
 0x171   :  { %3730 = vmatmul.mubr.bf16.gmra.mrb[52].mxu0 %v8305_v35  ;;  %3556 = vmatprep.subr.bf16.mxu1 %v6828_v11  ;;  %v6725_v11 = vcombine.low %v667_v2, %v671_v3  ;;  %v6734_v27 = vcombine.high %v675_v23, %v679_v20  ;;  %v6733_v46 = vcombine.low %v675_v23, %v679_v20  ;;  %v8337_v20 = vld [vmem:[#allocation3 + $0x44] ss:$24 sps:$4 sm:$0xff]  }
 0x172   :  { %3781 = vmatpush1.bf16.msra.mxu0 %v6693_v24  ;;  %3739 = vmatprep.mubr.bf16.mxu0 %v8311_v47  ;;  %v6851_v24 = vcombine.low %v794_v53, %v798_v62  ;;  %v6487_v53 = vcombine.low %v428_v29, %v432_v34  ;;  %v711_v29 = vld [vmem:[#allocation6 + $0x8f0] sm:$0xff] }
 0x173   :  { %3782 = vmatprep.subr.bf16.mxu0 %v6702_v26  ;;  %v6860_v26 = vcombine.high %v802_v56, %v806_v15  ;;  %v783_v47 = vld [vmem:[#allocation6 + $0xb30] sm:$0xff] }
 0x174   :  { %3557 = vmatpush1.bf16.msra.mxu1 %v6827_v36  ;;  %v683_v36 = vld [vmem:[#allocation6 + $0x810] sm:$0xff] }
 0x175   :  { %3558 = vmatprep.subr.bf16.mxu1 %v6836_v38  ;;  %v7786_v38 = vld [vmem:[#allocation3 + $0x150] ss:$24 sps:$4 sm:$0xff]  }
 0x176   :  { %3783 = vmatpush1.bf16.msra.mxu0 %v6701_v19  ;;  %v687_v19 = vld [vmem:[#allocation6 + $0x830] sm:$0xff] }
 0x177   :  { %3784 = vmatprep.subr.bf16.mxu0 %v6710_v30  ;;  %3514 = vmatmul.mubr.bf16.gmra.mrb[56].mxu1 %v8314_v1  ;;  %v6859_v30 = vcombine.low %v802_v56, %v806_v15  ;;  %v6742_v40 = vcombine.high %v683_v36, %v687_v19  ;;  %v6741_v62 = vcombine.low %v683_v36, %v687_v19  ;;  %v703_v56 = vld [vmem:[#allocation6 + $0x8b0] sm:$0xff] }
 0x178   :  { %3559 = vmatpush1.bf16.msra.mxu1 %v6835_v52  ;;  %3523 = vmatprep.mubr.bf16.mxu1 %v8320_v13  ;;  %v436_v52 = vld [vmem:[#allocation6 + $0x58] sm:$0xff] }
 0x179   :  { %3740 = vmatmul.mubr.bf16.gmra.mrb[56].mxu0 %v8317_v63  ;;  %3560 = vmatprep.subr.bf16.mxu1 %v6844_v57  ;;  %v691_v57 = vld [vmem:[#allocation6 + $0x850] sm:$0xff]  ;;  %v8397_v63 = vld [vmem:[#allocation3 + $0x100] ss:$24 sps:$4 sm:$0xff]  }
 0x17a   :  { %3785 = vmatpush1.bf16.msra.mxu0 %v6709_v55  ;;  %3749 = vmatprep.mubr.bf16.mxu0 %v8323_v21  ;;  %v440_v55 = vld [vmem:[#allocation6 + $0x78] sm:$0xff]  ;;  %9123 = vst [vmem:[#allocation24_spill] sm:$0xff] %v8397_v63 }
 0x17b   :  { %3786 = vmatprep.subr.bf16.mxu0 %v6718_v58  ;;  %v695_v58 = vld [vmem:[#allocation6 + $0x870] sm:$0xff]  ;;  %v6496_v2 = vcombine.high %v436_v52, %v440_v55  ;;  %v528_v21 = vld [vmem:[#allocation6 + $0x338] sm:$0xff] }
 0x17c   :  { %3561 = vmatpush1.bf16.msra.mxu1 %v6843_v5  ;;  %v6750_v3 = vcombine.high %v691_v57, %v695_v58  ;;  %v444_v5 = vld [vmem:[#allocation6 + $0x98] sm:$0xff]  ;;  %v6749_v15 = vcombine.low %v691_v57, %v695_v58  ;;  %v8345_v57 = vld [vmem:[#allocation3 + $0x74] ss:$24 sps:$4 sm:$0xff]  }
 0x17d   :  { %3562 = vmatprep.subr.bf16.mxu1 %v6852_v12  ;;  %v8333_v12 = vld [vmem:[#allocation3 + $0x10] ss:$24 sps:$4 sm:$0xff]  }
 0x17e   :  { %3787 = vmatpush1.bf16.msra.mxu0 %v6717_v10  ;;  %v448_v10 = vld [vmem:[#allocation6 + $0xb8] sm:$0xff] }
 0x17f   :  { %3788 = vmatprep.subr.bf16.mxu0 %v6726_v60  ;;  %3524 = vmatmul.mubr.bf16.gmra.mrb[60].mxu1 %v8326_v17  ;;  %v699_v60 = vld [vmem:[#allocation6 + $0x890] sm:$0xff]  ;;  %v6504_v23 = vcombine.high %v444_v5, %v448_v10 }
 0x180   :  { %3563 = vmatpush1.bf16.msra.mxu1 %v6851_v24  ;;  %3566 = vmatprep.mubr.bf16.mxu1 %v8329_v50  ;;  %v6758_v24 = vcombine.high %v699_v60, %v703_v56  ;;  %v6757_v34 = vcombine.low %v699_v60, %v703_v56  ;;  %v476_v56 = vld [vmem:[#allocation6 + $0x198] sm:$0xff] }
 0x181   :  { %3750 = vmatmul.mubr.bf16.gmra.mrb[60].mxu0 %v7786_v38  ;;  %3564 = vmatprep.subr.bf16.mxu1 %v6860_v26  ;;  %v456_v26 = vld [vmem:[#allocation6 + $0xf8] sm:$0xff] }
 0x182   :  { %3789 = vmatpush1.bf16.msra.mxu0 %v6725_v11  ;;  %3792 = vmatprep.mubr.bf16.mxu0 %v8236_v25  ;;  %v6495_v25 = vcombine.low %v436_v52, %v440_v55  ;;  %v452_v11 = vld [vmem:[#allocation6 + $0xd8] sm:$0xff] }
 0x183   :  { %3790 = vmatprep.subr.bf16.mxu0 %v6734_v27  ;;  %v707_v27 = vld [vmem:[#allocation6 + $0x8d0] sm:$0xff]  ;;  %v6512_v36 = vcombine.high %v452_v11, %v456_v26  ;;  %v460_v38 = vld [vmem:[#allocation6 + $0x118] sm:$0xff] }
 0x184   :  { %3565 = vmatpush1.bf16.msra.mxu1 %v6859_v30  ;;  %v6766_v19 = vcombine.high %v707_v27, %v711_v29  ;;  %v464_v30 = vld [vmem:[#allocation6 + $0x138] sm:$0xff]  ;;  %v6765_v52 = vcombine.low %v707_v27, %v711_v29 }
 0x185   :  { %3986 = vmatprep.subr.bf16.mxu1 %v6488_v31  ;;  %v715_v31 = vld [vmem:[#allocation6 + $0x910] sm:$0xff]  ;;  %v6520_v55 = vcombine.high %v460_v38, %v464_v30  ;;  %v8355_v29 = vld [vmem:[#allocation3 + $0xa4] ss:$24 sps:$4 sm:$0xff]  }
 0x186   :  { %3791 = vmatpush1.bf16.msra.mxu0 %v6733_v46  ;;  %v8341_v46 = vld [vmem:[#allocation3 + $0x40] ss:$24 sps:$4 sm:$0xff]  }
 0x187   :  { %3873 = vmatprep.subr.bf16.mxu0 %v6742_v40  ;;  %3567 = vmatmul.mubr.bf16.vlgmr.msra.gmra.mrb[32].mxu1 %v8333_v12  ;;  %v719_v40 = vld [vmem:[#allocation6 + $0x930] sm:$0xff] }
 0x188   :  { %3987 = vmatpush1.bf16.msra.mxu1 %v6487_v53  ;;  %3576 = vmatprep.mubr.bf16.mxu1 %v8337_v20  ;;  %v6774_v58 = vcombine.high %v715_v31, %v719_v40  ;;  %v468_v53 = vld [vmem:[#allocation6 + $0x158] sm:$0xff] }
 0x189   :  { %3793 = vmatmul.mubr.bf16.vlgmr.msra.gmra.mrb[32].mxu0 %v8242_v37  ;;  %3988 = vmatprep.subr.bf16.mxu1 %v6496_v2  ;;  %v6503_v37 = vcombine.low %v444_v5, %v448_v10  ;;  %v723_v2 = vld [vmem:[#allocation6 + $0x950] sm:$0xff]  ;;  %v6773_v5 = vcombine.low %v715_v31, %v719_v40 }
 0x18a   :  { %3874 = vmatpush1.bf16.msra.mxu0 %v6741_v62  ;;  %3802 = vmatprep.mubr.bf16.mxu0 %v8248_v45  ;;  %v6511_v45 = vcombine.low %v452_v11, %v456_v26  ;;  %v472_v62 = vld [vmem:[#allocation6 + $0x178] sm:$0xff] }
 0x18b   :  { %3875 = vmatprep.subr.bf16.mxu0 %v6750_v3  ;;  %v727_v3 = vld [vmem:[#allocation6 + $0x970] sm:$0xff]  ;;  %v6528_v10 = vcombine.high %v468_v53, %v472_v62 }
 0x18c   :  { %3989 = vmatpush1.bf16.msra.mxu1 %v6495_v25  ;;  %v6782_v60 = vcombine.high %v723_v2, %v727_v3  ;;  %v480_v25 = vld [vmem:[#allocation6 + $0x1b8] sm:$0xff]  ;;  %v6781_v11 = vcombine.low %v723_v2, %v727_v3  ;;  %v751_v2 = vld [vmem:[#allocation6 + $0xa30] sm:$0xff] }
 0x18d   :  { %3990 = vmatprep.subr.bf16.mxu1 %v6504_v23  ;;  %v731_v23 = vld [vmem:[#allocation6 + $0x990] sm:$0xff]  ;;  %v6536_v26 = vcombine.high %v476_v56, %v480_v25  ;;  %v6535_v31 = vcombine.low %v476_v56, %v480_v25  ;;  %v500_v25 = vld [vmem:[#allocation6 + $0x258] sm:$0xff] }
 0x18e   :  { %3876 = vmatpush1.bf16.msra.mxu0 %v6749_v15  ;;  %v8349_v15 = vld [vmem:[#allocation3 + $0x70] ss:$24 sps:$4 sm:$0xff]  }
 0x18f   :  { %3877 = vmatprep.subr.bf16.mxu0 %v6758_v24  ;;  %3577 = vmatmul.mubr.bf16.gmra.mrb[36].mxu1 %v8341_v46  ;;  %v735_v24 = vld [vmem:[#allocation6 + $0x9b0] sm:$0xff] }
 0x190   :  { %3991 = vmatpush1.bf16.msra.mxu1 %v6503_v37  ;;  %3586 = vmatprep.mubr.bf16.mxu1 %v8345_v57  ;;  %v6790_v37 = vcombine.high %v731_v23, %v735_v24 }
 0x191   :  { %3803 = vmatmul.mubr.bf16.gmra.mrb[36].mxu0 %v8254_v59  ;;  %3992 = vmatprep.subr.bf16.mxu1 %v6512_v36  ;;  %v6519_v59 = vcombine.low %v460_v38, %v464_v30  ;;  %v488_v36 = vld [vmem:[#allocation6 + $0x1f8] sm:$0xff]  ;;  %v743_v38 = vld [vmem:[#allocation6 + $0x9f0] sm:$0xff] }
 0x192   :  { %3878 = vmatpush1.bf16.msra.mxu0 %v6757_v34  ;;  %3812 = vmatprep.mubr.bf16.mxu0 %v8260_v51  ;;  %v6527_v51 = vcombine.low %v468_v53, %v472_v62  ;;  %v484_v34 = vld [vmem:[#allocation6 + $0x1d8] sm:$0xff] }
 0x193   :  { %3879 = vmatprep.subr.bf16.mxu0 %v6766_v19  ;;  %v496_v53 = vld [vmem:[#allocation6 + $0x238] sm:$0xff]  ;;  %v6543_v3 = vcombine.low %v484_v34, %v488_v36 }
 0x194   :  { %3993 = vmatpush1.bf16.msra.mxu1 %v6511_v45  ;;  %v6789_v45 = vcombine.low %v731_v23, %v735_v24  ;;  %v8365_v62 = vld [vmem:[#allocation3 + $0xa0] ss:$24 sps:$4 sm:$0xff]  }
 0x195   :  { %3994 = vmatprep.subr.bf16.mxu1 %v6520_v55  ;;  %v504_v23 = vld [vmem:[#allocation6 + $0x278] sm:$0xff] }
 0x196   :  { %3880 = vmatpush1.bf16.msra.mxu0 %v6765_v52  ;;  %v6544_v52 = vcombine.high %v484_v34, %v488_v36  ;;  %v6560_v36 = vcombine.high %v500_v25, %v504_v23 }
 0x197   :  { %3881 = vmatprep.subr.bf16.mxu0 %v6774_v58  ;;  %3587 = vmatmul.mubr.bf16.gmra.mrb[40].mxu1 %v8349_v15  ;;  %v492_v58 = vld [vmem:[#allocation6 + $0x218] sm:$0xff] }
 0x198   :  { %3995 = vmatpush1.bf16.msra.mxu1 %v6519_v59  ;;  %3596 = vmatprep.mubr.bf16.mxu1 %v8355_v29 }
 0x199   :  { %3813 = vmatmul.mubr.bf16.gmra.mrb[40].mxu0 %v8266_v16  ;;  %3996 = vmatprep.subr.bf16.mxu1 %v6528_v10  ;;  %v739_v16 = vld [vmem:[#allocation6 + $0x9d0] sm:$0xff] }
 0x19a   :  { %3882 = vmatpush1.bf16.msra.mxu0 %v6773_v5  ;;  %v8353_v27 = vpop.f32.mrb[0].mxu1  ;;  %3822 = vmatprep.mubr.bf16.mxu0 %v8272_v8  ;;  %v6798_v55 = vcombine.high %v739_v16, %v743_v38  ;;  %v747_v8 = vld [vmem:[#allocation6 + $0xa10] sm:$0xff]  ;;  %v6797_v59 = vcombine.low %v739_v16, %v743_v38  ;;  %v6552_v5 = vcombine.high %v492_v58, %v496_v53  ;;  %v508_v38 = vld [vmem:[#allocation6 + $0x298] sm:$0xff] }
 0x19b   :  { %3883 = vmatprep.subr.bf16.mxu0 %v6782_v60  ;;  %v8358_v19 = vpop.f32.mrb[1].mxu1  ;;  %v8371_v60 = vld [vmem:[#allocation3 + $0xd4] ss:$24 sps:$4 sm:$0xff]   ;;  %v6806_v56 = vcombine.high %v747_v8, %v751_v2  ;;  %v6805_v34 = vcombine.low %v747_v8, %v751_v2  ;;  %v8387_v2 = vld [vmem:[#allocation3 + $0x104] ss:$24 sps:$4 sm:$0xff]  }
 0x19c   :  { %v8361_v30 = vpop.f32.mrb[2].mxu1  ;;  %3997 = vmatpush1.bf16.msra.mxu1 %v6527_v51  ;;  %v759_v51 = vld [vmem:[#allocation6 + $0xa70] sm:$0xff] }
 0x19d   :  { %v8363_v40 = vpop.f32.mrb[3].mxu1  ;;  %3998 = vmatprep.subr.bf16.mxu1 %v6536_v26  ;;  %v6551_v26 = vcombine.low %v492_v58, %v496_v53 }
 0x19e   :  { %3884 = vmatpush1.bf16.msra.mxu0 %v6781_v11 }
 0x19f   :  { %3885 = vmatprep.subr.bf16.mxu0 %v6790_v37  ;;  %3597 = vmatmul.mubr.bf16.gmra.mrb[44].mxu1 %v8365_v62 }
 0x1a0   :  { %3999 = vmatpush1.bf16.msra.mxu1 %v6535_v31  ;;  %3606 = vmatprep.mubr.bf16.mxu1 %v8371_v60  ;;  %v512_v31 = vld [vmem:[#allocation6 + $0x2b8] sm:$0xff] }
 0x1a1   :  { %3823 = vmatmul.mubr.bf16.gmra.mrb[44].mxu0 %v8278_v41  ;;  %4000 = vmatprep.subr.bf16.mxu1 %v6544_v52  ;;  %v755_v41 = vld [vmem:[#allocation6 + $0xa50] sm:$0xff]  ;;  %v6568_v53 = vcombine.high %v508_v38, %v512_v31 }
 0x1a2   :  { %3886 = vmatpush1.bf16.msra.mxu0 %v6789_v45  ;;  %v8369_v10 = vpop.f32.mrb[4].mxu1  ;;  %3832 = vmatprep.mubr.bf16.mxu0 %v8284_v49  ;;  %v6814_v16 = vcombine.high %v755_v41, %v759_v51  ;;  %v8381_v45 = vld [vmem:[#allocation3 + $0xd0] ss:$24 sps:$4 sm:$0xff]   ;;  %v6813_v58 = vcombine.low %v755_v41, %v759_v51  ;;  %v6567_v41 = vcombine.low %v508_v38, %v512_v31 }
 0x1a3   :  { %3887 = vmatprep.subr.bf16.mxu0 %v6798_v55  ;;  %v8374_v24 = vpop.f32.mrb[5].mxu1  ;;  %v763_v49 = vld [vmem:[#allocation6 + $0xa90] sm:$0xff]  ;;  %v6559_v55 = vcombine.low %v500_v25, %v504_v23 }
 0x1a4   :  { %v8377_v11 = vpop.f32.mrb[6].mxu1  ;;  %4001 = vmatpush1.bf16.msra.mxu1 %v6543_v3  ;;  %v767_v52 = vld [vmem:[#allocation6 + $0xab0] sm:$0xff] }
 0x1a5   :  { %v8379_v37 = vpop.f32.mrb[7].mxu1  ;;  %4002 = vmatprep.subr.bf16.mxu1 %v6552_v5  ;;  %v6822_v3 = vcombine.high %v763_v49, %v767_v52  ;;  %v520_v5 = vld [vmem:[#allocation6 + $0x2f8] sm:$0xff]  ;;  %v775_v25 = vld [vmem:[#allocation6 + $0xaf0] sm:$0xff] }
 0x1a6   :  { %3888 = vmatpush1.bf16.msra.mxu0 %v6797_v59  ;;  %v516_v59 = vld [vmem:[#allocation6 + $0x2d8] sm:$0xff] }
 0x1a7   :  { %3889 = vmatprep.subr.bf16.mxu0 %v6806_v56  ;;  %3607 = vmatmul.mubr.bf16.gmra.mrb[48].mxu1 %v8381_v45  ;;  %v6575_v38 = vcombine.low %v516_v59, %v520_v5 }
 0x1a8   :  { %4003 = vmatpush1.bf16.msra.mxu1 %v6551_v26  ;;  %3616 = vmatprep.mubr.bf16.mxu1 %v8387_v2  ;;  %v6821_v26 = vcombine.low %v763_v49, %v767_v52 }
 0x1a9   :  { %3833 = vmatmul.mubr.bf16.gmra.mrb[48].mxu0 %v8290_v4  ;;  %4004 = vmatprep.subr.bf16.mxu1 %v6560_v36  ;;  %v771_v4 = vld [vmem:[#allocation6 + $0xad0] sm:$0xff] }
 0x1aa   :  { %3890 = vmatpush1.bf16.msra.mxu0 %v6805_v34  ;;  %v8385_v8 = vpop.f32.mrb[8].mxu1  ;;  %3842 = vmatprep.mubr.bf16.mxu0 %v8296_v14  ;;  %v6576_v34 = vcombine.high %v516_v59, %v520_v5  ;;  %v6830_v36 = vcombine.high %v771_v4, %v775_v25  ;;  %v779_v14 = vld [vmem:[#allocation6 + $0xb10] sm:$0xff]  ;;  %v6829_v31 = vcombine.low %v771_v4, %v775_v25 }
 0x1ab   :  { %3891 = vmatprep.subr.bf16.mxu0 %v6814_v16  ;;  %v8390_v56 = vpop.f32.mrb[9].mxu1  ;;  %v524_v16 = vld [vmem:[#allocation6 + $0x318] sm:$0xff]  ;;  %v791_v59 = vld [vmem:[#allocation6 + $0xb70] sm:$0xff] }
 0x1ac   :  { %v8393_v23 = vpop.f32.mrb[10].mxu1  ;;  %4005 = vmatpush1.bf16.msra.mxu1 %v6559_v55  ;;  %v6584_v49 = vcombine.high %v524_v16, %v528_v21  ;;  %v8403_v55 = vld [vmem:[#allocation3 + $0x134] ss:$24 sps:$4 sm:$0xff]   ;;  %v6583_v4 = vcombine.low %v524_v16, %v528_v21 }
 0x1ad   :  { %v8395_v51 = vpop.f32.mrb[11].mxu1  ;;  %4006 = vmatprep.subr.bf16.mxu1 %v6568_v53  ;;  %v532_v53 = vld [vmem:[#allocation6 + $0x358] sm:$0xff] }
 0x1ae   :  { %3892 = vmatpush1.bf16.msra.mxu0 %v6813_v58  ;;  %v6838_v58 = vcombine.high %v779_v14, %v783_v47 }
 0x1af   :  { %3893 = vmatprep.subr.bf16.mxu0 %v6822_v3  ;;  %3617 = vmatmul.mubr.bf16.gmra.mrb[52].mxu1 %v8397_v63  ;;  %v536_v3 = vld [vmem:[#allocation6 + $0x378] sm:$0xff] }
 0x1b0   :  { %4007 = vmatpush1.bf16.msra.mxu1 %v6567_v41  ;;  %3626 = vmatprep.mubr.bf16.mxu1 %v8403_v55  ;;  %v6837_v41 = vcombine.low %v779_v14, %v783_v47  ;;  %v548_v14 = vld [vmem:[#allocation6 + $0x3d8] sm:$0xff] }
 0x1b1   :  { %3843 = vmatmul.mubr.bf16.gmra.mrb[52].mxu0 %v8302_v32  ;;  %4008 = vmatprep.subr.bf16.mxu1 %v6576_v34  ;;  %v787_v32 = vld [vmem:[#allocation6 + $0xb50] sm:$0xff] }
 0x1b2   :  { %3894 = vmatpush1.bf16.msra.mxu0 %v6821_v26  ;;  %v8401_v52 = vpop.f32.mrb[12].mxu1  ;;  %3852 = vmatprep.mubr.bf16.mxu0 %v8308_v43  ;;  %v6592_v26 = vcombine.high %v532_v53, %v536_v3  ;;  %v6846_v34 = vcombine.high %v787_v32, %v791_v59  ;;  %v799_v43 = vld [vmem:[#allocation6 + $0xbb0] sm:$0xff]  ;;  %v6845_v21 = vcombine.low %v787_v32, %v791_v59 }
 0x1b3   :  { %9124 = vst [vmem:[#allocation25_spill] sm:$0xff] %v8401_v52  ;;  %3895 = vmatprep.subr.bf16.mxu0 %v6830_v36  ;;  %v8406_v63 = vpop.f32.mrb[13].mxu1  ;;  %v540_v36 = vld [vmem:[#allocation6 + $0x398] sm:$0xff] }
 0x1b4   :  { %9125 = vst [vmem:[#allocation26_spill] sm:$0xff] %v8406_v63  ;;  %v8409_v5 = vpop.f32.mrb[14].mxu1  ;;  %4009 = vmatpush1.bf16.msra.mxu1 %v6575_v38  ;;  %v544_v52 = vld [vmem:[#allocation6 + $0x3b8] sm:$0xff]  ;;  %v795_v63 = vld [vmem:[#allocation6 + $0xb90] sm:$0xff] }
 0x1b5   :  { %9126 = vst [vmem:[#allocation27_spill] sm:$0xff] %v8409_v5  ;;  %v8411_v25 = vpop.f32.mrb[15].mxu1  ;;  %4010 = vmatprep.subr.bf16.mxu1 %v6584_v49  ;;  %v6591_v5 = vcombine.low %v532_v53, %v536_v3  ;;  %v6600_v16 = vcombine.high %v540_v36, %v544_v52  ;;  %v6854_v47 = vcombine.high %v795_v63, %v799_v43 }
 0x1b6   :  { %3896 = vmatpush1.bf16.msra.mxu0 %v6829_v31  ;;  %v552_v31 = vld [vmem:[#allocation6 + $0x3f8] sm:$0xff]  ;;  %v6599_v53 = vcombine.low %v540_v36, %v544_v52  ;;  %v6853_v32 = vcombine.low %v795_v63, %v799_v43  ;;  %v7525_v63 = vld [vmem:[#allocation9 + $0x4] ss:$8 sps:$4 sm:$0xff]  }
 0x1b7   :  { %3897 = vmatprep.subr.bf16.mxu0 %v6838_v58  ;;  %3627 = vmatmul.mubr.bf16.gmra.mrb[56].mxu1 %v8223_v39  ;;  %v803_v39 = vld [vmem:[#allocation6 + $0xbd0] sm:$0xff]  ;;  %v6608_v59 = vcombine.high %v548_v14, %v552_v31  ;;  %v568_v36 = vld [vmem:[#allocation6 + $0x478] sm:$0xff] }
 0x1b8   :  { %4011 = vmatpush1.bf16.msra.mxu1 %v6583_v4  ;;  %3636 = vmatprep.mubr.bf16.mxu1 %v8226_v61  ;;  %v556_v4 = vld [vmem:[#allocation6 + $0x418] sm:$0xff] }
 0x1b9   :  { %3853 = vmatmul.mubr.bf16.gmra.mrb[56].mxu0 %v8314_v1  ;;  %4012 = vmatprep.subr.bf16.mxu1 %v6592_v26  ;;  %v807_v1 = vld [vmem:[#allocation6 + $0xbf0] sm:$0xff] }
 0x1ba   :  { %3898 = vmatpush1.bf16.msra.mxu0 %v6837_v41  ;;  %v8415_v38 = vpop.f32.mrb[16].mxu1  ;;  %3862 = vmatprep.mubr.bf16.mxu0 %v8320_v13  ;;  %v6862_v61 = vcombine.high %v803_v39, %v807_v1  ;;  %v560_v41 = vld [vmem:[#allocation6 + $0x438] sm:$0xff]  ;;  %v6607_v13 = vcombine.low %v548_v14, %v552_v31  ;;  %v6861_v26 = vcombine.low %v803_v39, %v807_v1 }
 0x1bb   :  { %3899 = vmatprep.subr.bf16.mxu0 %v6846_v34  ;;  %v8418_v49 = vpop.f32.mrb[17].mxu1  ;;  %v6616_v52 = vcombine.high %v556_v4, %v560_v41  ;;  %v564_v34 = vld [vmem:[#allocation6 + $0x458] sm:$0xff] }
 0x1bc   :  { %v8421_v58 = vpop.f32.mrb[18].mxu1  ;;  %4013 = vmatpush1.bf16.msra.mxu1 %v6591_v5  ;;  %v7528_v14 = vld [vmem:[#allocation9 + $0x14] ss:$8 sps:$4 sm:$0xff]   ;;  %v7526_v39 = vld [vmem:[#allocation9 + $0x10] ss:$8 sps:$4 sm:$0xff]  }
 0x1bd   :  { %v8423_v3 = vpop.f32.mrb[19].mxu1  ;;  %4014 = vmatprep.subr.bf16.mxu1 %v6600_v16  ;;  %v7523_v16 = vld [vmem:[#allocation9] ss:$8 sps:$4 sm:$0xff]   ;;  %v576_v31 = vld [vmem:[#allocation6 + $0x4b8] sm:$0xff] }
 0x1be   :  { %3900 = vmatpush1.bf16.msra.mxu0 %v6845_v21 }
 0x1bf   :  { %3901 = vmatprep.subr.bf16.mxu0 %v6854_v47  ;;  %3637 = vmatmul.mubr.bf16.gmra.mrb[60].mxu1 %v8232_v9  ;;  %v6624_v47 = vcombine.high %v564_v34, %v568_v36 }
 0x1c0   :  { %4015 = vmatpush1.bf16.msra.mxu1 %v6599_v53  ;;  %4018 = vmatprep.mubr.bf16.mxu1 %v8239_v28  ;;  %v6623_v28 = vcombine.low %v564_v34, %v568_v36  ;;  %v4714_v34 = vlaneseq  ;;  %v7532_v36 = vld [vmem:[#allocation9 + $0x30] ss:$8 sps:$4 sm:$0xff]  }
 0x1c1   :  { %3863 = vmatmul.mubr.bf16.gmra.mrb[60].mxu0 %v8326_v17  ;;  %4016 = vmatprep.subr.bf16.mxu1 %v6608_v59  ;;  %v6615_v17 = vcombine.low %v556_v4, %v560_v41  ;;  %v580_v59 = vld [vmem:[#allocation6 + $0x4d8] sm:$0xff] }
 0x1c2   :  { %3902 = vmatpush1.bf16.msra.mxu0 %v6853_v32  ;;  %v8427_v5 = vpop.f32.mrb[20].mxu1  ;;  %3905 = vmatprep.mubr.bf16.mxu0 %v8329_v50  ;;  %v572_v50 = vld [vmem:[#allocation6 + $0x498] sm:$0xff]  ;;  %v7531_v32 = vld [vmem:[#allocation9 + $0x24] ss:$8 sps:$4 sm:$0xff]  }
 0x1c3   :  { %3903 = vmatprep.subr.bf16.mxu0 %v6862_v61  ;;  %v8430_v43 = vpop.f32.mrb[21].mxu1  ;;  %v6632_v1 = vcombine.high %v572_v50, %v576_v31  ;;  %v584_v61 = vld [vmem:[#allocation6 + $0x4f8] sm:$0xff] }
 0x1c4   :  { %v8433_v9 = vpop.f32.mrb[22].mxu1  ;;  %4017 = vmatpush1.bf16.msra.mxu1 %v6607_v13  ;;  %v7529_v13 = vld [vmem:[#allocation9 + $0x20] ss:$8 sps:$4 sm:$0xff]  }
 0x1c5   :  { %v8435_v21 = vpop.f32.mrb[23].mxu1  ;;  %4099 = vmatprep.subr.bf16.mxu1 %v6616_v52  ;;  %v7534_v52 = vld [vmem:[#allocation9 + $0x34] ss:$8 sps:$4 sm:$0xff]  }
 0x1c6   :  { %3904 = vmatpush1.bf16.msra.mxu0 %v6861_v26  ;;  %v6640_v26 = vcombine.high %v580_v59, %v584_v61 }
 0x1c7   :  { %5714 = vmatprep.subr.bf16.mxu0 %v7525_v63  ;;  %4019 = vmatmul.mubr.bf16.vlgmr.msra.gmra.mrb[64].mxu1 %v8245_v42  ;;  %v592_v63 = vld [vmem:[#allocation6 + $0x538] sm:$0xff] }
 0x1c8   :  { %4100 = vmatpush1.bf16.msra.mxu1 %v6615_v17  ;;  %4028 = vmatprep.mubr.bf16.mxu1 %v8251_v48  ;;  %v6639_v48 = vcombine.low %v580_v59, %v584_v61  ;;  %v604_v59 = vld [vmem:[#allocation6 + $0x598] sm:$0xff] }
 0x1c9   :  { %3906 = vmatmul.mubr.bf16.vlgmr.msra.gmra.mrb[32].mxu0 %v8333_v12  ;;  %4101 = vmatprep.subr.bf16.mxu1 %v6624_v47  ;;  %v6631_v12 = vcombine.low %v572_v50, %v576_v31  ;;  %v7537_v47 = vld [vmem:[#allocation9 + $0x44] ss:$8 sps:$4 sm:$0xff]   ;;  %v600_v50 = vld [vmem:[#allocation6 + $0x578] sm:$0xff] }
 0x1ca   :  { %5715 = vmatpush1.bf16.msra.mxu0 %v7523_v16  ;;  %v8439_v53 = vpop.f32.mrb[24].mxu1  ;;  %3915 = vmatprep.mubr.bf16.mxu0 %v8337_v20  ;;  %v588_v20 = vld [vmem:[#allocation6 + $0x518] sm:$0xff] }
 0x1cb   :  { %5716 = vmatprep.subr.bf16.mxu0 %v7528_v14  ;;  %v8442_v4 = vpop.f32.mrb[25].mxu1  ;;  %v6648_v17 = vcombine.high %v588_v20, %v592_v63  ;;  %v596_v14 = vld [vmem:[#allocation6 + $0x558] sm:$0xff] }
 0x1cc   :  { %v8445_v42 = vpop.f32.mrb[26].mxu1  ;;  %4102 = vmatpush1.bf16.msra.mxu1 %v6623_v28  ;;  %v8459_v28 = vshrl.u32 %v4714_v34, 7  ;;  %v608_v61 = vld [vmem:[#allocation6 + $0x5b8] sm:$0xff] }
 0x1cd   :  { %v8447_v41 = vpop.f32.mrb[27].mxu1  ;;  %4103 = vmatprep.subr.bf16.mxu1 %v6632_v1  ;;  %v7535_v1 = vld [vmem:[#allocation9 + $0x40] ss:$8 sps:$4 sm:$0xff]  }
 0x1ce   :  { %5717 = vmatpush1.bf16.msra.mxu0 %v7526_v39 }
 0x1cf   :  { %5718 = vmatprep.subr.bf16.mxu0 %v7531_v32  ;;  %4029 = vmatmul.mubr.bf16.gmra.mrb[68].mxu1 %v8257_v0  ;;  %v6656_v32 = vcombine.high %v596_v14, %v600_v50 }
 0x1d0   :  { %4104 = vmatpush1.bf16.msra.mxu1 %v6631_v12  ;;  %4038 = vmatprep.mubr.bf16.mxu1 %v8263_v6  ;;  %v4716_v6 = vsub.s32 0, %v8459_v28  ;;  %v6655_v12 = vcombine.low %v596_v14, %v600_v50 }
 0x1d1   :  { %3916 = vmatmul.mubr.bf16.gmra.mrb[36].mxu0 %v8341_v46  ;;  %4105 = vmatprep.subr.bf16.mxu1 %v6640_v26  ;;  %v6647_v46 = vcombine.low %v588_v20, %v592_v63  ;;  %v4720_v26 = vsub.s32 1, %v8459_v28  ;;  %v6664_v20 = vcombine.high %v604_v59, %v608_v61  ;;  %v7543_v63 = vld [vmem:[#allocation9 + $0x64] ss:$8 sps:$4 sm:$0xff]  }
 0x1d2   :  { %5719 = vmatpush1.bf16.msra.mxu0 %v7529_v13  ;;  %v8451_v16 = vpop.f32.mrb[28].mxu1  ;;  %3925 = vmatprep.mubr.bf16.mxu0 %v8345_v57  ;;  %v7540_v57 = vld [vmem:[#allocation9 + $0x54] ss:$8 sps:$4 sm:$0xff]  }
 0x1d3   :  { %5720 = vmatprep.subr.bf16.mxu0 %v7534_v52  ;;  %v8454_v31 = vpop.f32.mrb[29].mxu1  ;;  %v8466_v13 = vld [vmem:[#allocation8] sm:$0xff] }
 0x1d4   :  { %v8457_v0 = vpop.f32.mrb[30].mxu1  ;;  %4106 = vmatpush1.bf16.msra.mxu1 %v6639_v48  ;;  %v7538_v52 = vld [vmem:[#allocation9 + $0x50] ss:$8 sps:$4 sm:$0xff]   ;;  %v8477_v50 = vrot.slane %v8466_v13, %v4720_v26 }
 0x1d5   :  { %v8461_v39 = vpop.f32.mrb[31].mxu1  ;;  %4107 = vmatprep.subr.bf16.mxu1 %v6648_v17  ;;  %v612_v48 = vld [vmem:[#allocation6 + $0x5d8] sm:$0xff] }
 0x1d6   :  { %5721 = vmatpush1.bf16.msra.mxu0 %v7532_v36  ;;  %v8473_v36 = vrot.slane %v8466_v13, %v4716_v6  ;;  %v624_v6 = vld [vmem:[#allocation6 + $0x638] sm:$0xff] }
 0x1d7   :  { %5722 = vmatprep.subr.bf16.mxu0 %v7537_v47  ;;  %4039 = vmatmul.mubr.bf16.gmra.mrb[72].mxu1 %v8269_v22  ;;  %v616_v22 = vld [vmem:[#allocation6 + $0x5f8] sm:$0xff]  ;;  %v6663_v47 = vcombine.low %v604_v59, %v608_v61 }
 0x1d8   :  { %4108 = vmatpush1.bf16.msra.mxu1 %v6647_v46  ;;  %4048 = vmatprep.mubr.bf16.mxu1 %v8275_v33  ;;  %v7541_v46 = vld [vmem:[#allocation9 + $0x60] ss:$8 sps:$4 sm:$0xff]   ;;  %v6671_v61 = vcombine.low %v612_v48, %v616_v22 }
 0x1d9   :  { %3926 = vmatmul.mubr.bf16.gmra.mrb[40].mxu0 %v8349_v15  ;;  %4109 = vmatprep.subr.bf16.mxu1 %v6656_v32 }
 0x1da   :  { %5723 = vmatpush1.bf16.msra.mxu0 %v7535_v1  ;;  %3935 = vmatprep.mubr.bf16.mxu0 %v8355_v29  ;;  %v6672_v1 = vcombine.high %v612_v48, %v616_v22 }
 0x1db   :  { %5724 = vmatprep.subr.bf16.mxu0 %v7540_v57  ;;  %v620_v57 = vld [vmem:[#allocation6 + $0x618] sm:$0xff] }
 0x1dc   :  { %v3229_v34 = vpop.f32.mrb[0].mxu0  ;;  %4110 = vmatpush1.bf16.msra.mxu1 %v6655_v12 }
 0x1dd   :  { %v7083_v15 = vadd.f32 %v3229_v34, %v8353_v27  ;;  %v3231_v17 = vpop.f32.mrb[1].mxu0  ;;  %4111 = vmatprep.subr.bf16.mxu1 %v6664_v20  ;;  %v7546_v27 = vld [vmem:[#allocation9 + $0x74] ss:$8 sps:$4 sm:$0xff]   ;;  %v7549_v20 = vld [vmem:[#allocation9 + $0x84] ss:$8 sps:$4 sm:$0xff]  }
 0x1de   :  { %v7084_v14 = vadd.f32 %v3231_v17, %v8358_v19  ;;  %v3233_v29 = vpop.f32.mrb[2].mxu0  ;;  %5725 = vmatpush1.bf16.msra.mxu0 %v7538_v52  ;;  %v6679_v17 = vcombine.low %v620_v57, %v624_v6 }
 0x1df   :  { %v7085_v33 = vadd.f32 %v3233_v29, %v8361_v30  ;;  %v3235_v32 = vpop.f32.mrb[3].mxu0  ;;  %5726 = vmatprep.subr.bf16.mxu0 %v7543_v63  ;;  %4049 = vmatmul.mubr.bf16.gmra.mrb[76].mxu1 %v8281_v44  ;;  %v8483_v19 = vadd.f32 %v7083_v15, %v8473_v36  ;;  %v6680_v44 = vcombine.high %v620_v57, %v624_v6  ;;  %v632_v63 = vld [vmem:[#allocation6 + $0x678] sm:$0xff] }
 0x1e0   :  { %v7086_v12 = vadd.f32 %v3235_v32, %v8363_v40  ;;  %4112 = vmatpush1.bf16.msra.mxu1 %v6663_v47  ;;  %v8490_v30 = vadd.f32 %v7084_v14, %v8477_v50  ;;  %v7544_v40 = vld [vmem:[#allocation9 + $0x70] ss:$8 sps:$4 sm:$0xff]   ;;  %4058 = vmatprep.mubr.bf16.mxu1 %v8287_v54  ;;  %v7552_v54 = vld [vmem:[#allocation9 + $0x94] ss:$8 sps:$4 sm:$0xff]  }
 0x1e1   :  { %v8486_v59 = vadd.f32 %v7085_v33, %v8473_v36  ;;  %3936 = vmatmul.mubr.bf16.gmra.mrb[44].mxu0 %v8365_v62  ;;  %4113 = vmatprep.subr.bf16.mxu1 %v6672_v1  ;;  %v628_v62 = vld [vmem:[#allocation6 + $0x658] sm:$0xff] }
 0x1e2   :  { %v8493_v26 = vadd.f32 %v7086_v12, %v8477_v50  ;;  %5727 = vmatpush1.bf16.msra.mxu0 %v7541_v46  ;;  %3945 = vmatprep.mubr.bf16.mxu0 %v8371_v60  ;;  %v7547_v60 = vld [vmem:[#allocation9 + $0x80] ss:$8 sps:$4 sm:$0xff]   ;;  %v6688_v29 = vcombine.high %v628_v62, %v632_v63  ;;  %v636_v33 = vld [vmem:[#allocation6 + $0x698] sm:$0xff]  ;;  %v6687_v57 = vcombine.low %v628_v62, %v632_v63  ;;  %v7555_v12 = vld [vmem:[#allocation9 + $0xa4] ss:$8 sps:$4 sm:$0xff]  }
 0x1e3   :  { %v4882_v52 = vpack.c.bf16 %v8486_v59, %v8483_v19  ;;  %5728 = vmatprep.subr.bf16.mxu0 %v7546_v27  ;;  %v640_v32 = vld [vmem:[#allocation6 + $0x6b8] sm:$0xff] }
 0x1e4   :  { %v3239_v48 = vpop.f32.mrb[4].mxu0  ;;  %v4883_v22 = vpack.c.bf16 %v8493_v26, %v8490_v30  ;;  %4114 = vmatpush1.bf16.msra.mxu1 %v6671_v61  ;;  %v644_v61 = vld [vmem:[#allocation6 + $0x6d8] sm:$0xff] }
 0x1e5   :  { %v7087_v34 = vadd.f32 %v3239_v48, %v8369_v10  ;;  %v3241_v15 = vpop.f32.mrb[5].mxu0  ;;  %4115 = vmatprep.subr.bf16.mxu1 %v6680_v44  ;;  %v6695_v48 = vcombine.low %v636_v33, %v640_v32  ;;  %v7574_v19 = vld [vmem:[#allocation9 + $0x110] ss:$8 sps:$4 sm:$0xff]  }
 0x1e6   :  { %v7088_v47 = vadd.f32 %v3241_v15, %v8374_v24  ;;  %v3243_v14 = vpop.f32.mrb[6].mxu0  ;;  %5729 = vmatpush1.bf16.msra.mxu0 %v7544_v40  ;;  %v648_v40 = vld [vmem:[#allocation6 + $0x6f8] sm:$0xff]  ;;  %v7553_v15 = vld [vmem:[#allocation9 + $0xa0] ss:$8 sps:$4 sm:$0xff]  }
 0x1e7   :  { %v7089_v46 = vadd.f32 %v3243_v14, %v8377_v11  ;;  %v3245_v1 = vpop.f32.mrb[7].mxu0  ;;  %5730 = vmatprep.subr.bf16.mxu0 %v7549_v20  ;;  %4059 = vmatmul.mubr.bf16.gmra.mrb[80].mxu1 %v8293_v7  ;;  %v8507_v10 = vadd.f32 %v7087_v34, %v8473_v36  ;;  %v6696_v7 = vcombine.high %v636_v33, %v640_v32  ;;  %v7561_v32 = vld [vmem:[#allocation9 + $0xc4] ss:$8 sps:$4 sm:$0xff]  }
 0x1e8   :  { %v7090_v27 = vadd.f32 %v3245_v1, %v8379_v37  ;;  %4116 = vmatpush1.bf16.msra.mxu1 %v6679_v17  ;;  %v8514_v11 = vadd.f32 %v7088_v47, %v8477_v50  ;;  %v7550_v37 = vld [vmem:[#allocation9 + $0x90] ss:$8 sps:$4 sm:$0xff]   ;;  %4068 = vmatprep.mubr.bf16.mxu1 %v8299_v18  ;;  %v6704_v17 = vcombine.high %v644_v61, %v648_v40  ;;  %v7558_v18 = vld [vmem:[#allocation9 + $0xb4] ss:$8 sps:$4 sm:$0xff]  }
 0x1e9   :  { %v8510_v24 = vadd.f32 %v7089_v46, %v8473_v36  ;;  %3946 = vmatmul.mubr.bf16.gmra.mrb[48].mxu0 %v8381_v45  ;;  %4117 = vmatprep.subr.bf16.mxu1 %v6688_v29  ;;  %v656_v29 = vld [vmem:[#allocation6 + $0x738] sm:$0xff]  ;;  %v9127_v1 = vld [vmem:[#allocation24_spill] sm:$0xff] }
 0x1ea   :  { %v8517_v6 = vadd.f32 %v7090_v27, %v8477_v50  ;;  %5731 = vmatpush1.bf16.msra.mxu0 %v7547_v60  ;;  %3955 = vmatprep.mubr.bf16.mxu0 %v8387_v2  ;;  %v652_v60 = vld [vmem:[#allocation6 + $0x718] sm:$0xff] }
 0x1eb   :  { %5732 = vmatprep.subr.bf16.mxu0 %v7552_v54  ;;  %v4890_v45 = vpack.c.bf16 %v8510_v24, %v8507_v10  ;;  %v6703_v54 = vcombine.low %v644_v61, %v648_v40  ;;  %v660_v27 = vld [vmem:[#allocation6 + $0x758] sm:$0xff]  ;;  %v9129_v40 = vld [vmem:[#allocation25_spill] sm:$0xff] }
 0x1ec   :  { %v3249_v44 = vpop.f32.mrb[8].mxu0  ;;  %v4891_v20 = vpack.c.bf16 %v8517_v6, %v8514_v11  ;;  %4118 = vmatpush1.bf16.msra.mxu1 %v6687_v57  ;;  %v664_v57 = vld [vmem:[#allocation6 + $0x778] sm:$0xff] }
 0x1ed   :  { %v7091_v62 = vadd.f32 %v3249_v44, %v8385_v8  ;;  %v3251_v63 = vpop.f32.mrb[9].mxu0  ;;  %4119 = vmatprep.subr.bf16.mxu1 %v6696_v7  ;;  %v688_v61 = vld [vmem:[#allocation6 + $0x838] sm:$0xff] }
 0x1ee   :  { %v7092_v34 = vadd.f32 %v3251_v63, %v8390_v56  ;;  %v3253_v2 = vpop.f32.mrb[10].mxu0  ;;  %5733 = vmatpush1.bf16.msra.mxu0 %v7550_v37  ;;  %v6711_v63 = vcombine.low %v652_v60, %v656_v29  ;;  %v684_v37 = vld [vmem:[#allocation6 + $0x818] sm:$0xff] }
 0x1ef   :  { %v7093_v47 = vadd.f32 %v3253_v2, %v8393_v23  ;;  %v3255_v14 = vpop.f32.mrb[11].mxu0  ;;  %5734 = vmatprep.subr.bf16.mxu0 %v7555_v12  ;;  %4069 = vmatmul.mubr.bf16.gmra.mrb[84].mxu1 %v8305_v35  ;;  %v8531_v8 = vadd.f32 %v7091_v62, %v8473_v36  ;;  %v6712_v35 = vcombine.high %v652_v60, %v656_v29  ;;  %v9128_v12 = vld [vmem:[#allocation21_spill] sm:$0xff]  ;;  %v7580_v10 = vld [vmem:[#allocation9 + $0x130] ss:$8 sps:$4 sm:$0xff]  }
 0x1f0   :  { %v7094_v46 = vadd.f32 %v3255_v14, %v8395_v51  ;;  %4120 = vmatpush1.bf16.msra.mxu1 %v6695_v48  ;;  %v8538_v23 = vadd.f32 %v7092_v34, %v8477_v50  ;;  %v7556_v51 = vld [vmem:[#allocation9 + $0xb0] ss:$8 sps:$4 sm:$0xff]   ;;  %4078 = vmatprep.mubr.bf16.mxu1 %v9128_v12  ;;  %v7559_v2 = vld [vmem:[#allocation9 + $0xc0] ss:$8 sps:$4 sm:$0xff]   ;;  %v6743_v26 = vcombine.low %v684_v37, %v688_v61 }
 0x1f1   :  { %v8534_v56 = vadd.f32 %v7093_v47, %v8473_v36  ;;  %3956 = vmatmul.mubr.bf16.gmra.mrb[52].mxu0 %v9127_v1  ;;  %4121 = vmatprep.subr.bf16.mxu1 %v6704_v17  ;;  %v9130_v48 = vld [vmem:[#allocation26_spill] sm:$0xff]  ;;  %v9131_v17 = vld [vmem:[#allocation27_spill] sm:$0xff] }
 0x1f2   :  { %v8541_v33 = vadd.f32 %v7094_v46, %v8477_v50  ;;  %5735 = vmatpush1.bf16.msra.mxu0 %v7553_v15  ;;  %3965 = vmatprep.mubr.bf16.mxu0 %v8403_v55  ;;  %v6720_v15 = vcombine.high %v660_v27, %v664_v57  ;;  %v668_v46 = vld [vmem:[#allocation6 + $0x798] sm:$0xff] }
 0x1f3   :  { %5736 = vmatprep.subr.bf16.mxu0 %v7558_v18  ;;  %v7564_v18 = vld [vmem:[#allocation9 + $0xd4] ss:$8 sps:$4 sm:$0xff]  }
 0x1f4   :  { %v3259_v7 = vpop.f32.mrb[12].mxu0  ;;  %4122 = vmatpush1.bf16.msra.mxu1 %v6703_v54  ;;  %v672_v1 = vld [vmem:[#allocation6 + $0x7b8] sm:$0xff]  ;;  %v8560_v54 = vld [vmem:[#allocation3 + $0x130] ss:$24 sps:$4 sm:$0xff]  }
 0x1f5   :  { %v7095_v44 = vadd.f32 %v3259_v7, %v9129_v40  ;;  %v3261_v62 = vpop.f32.mrb[13].mxu0  ;;  %4123 = vmatprep.subr.bf16.mxu1 %v6712_v35  ;;  %v9132_v7 = vld [vmem:[#allocation22_spill] sm:$0xff]  ;;  %v6728_v40 = vcombine.high %v668_v46, %v672_v1 }
 0x1f6   :  { %v7096_v34 = vadd.f32 %v3261_v62, %v9130_v48  ;;  %v3263_v55 = vpop.f32.mrb[14].mxu0  ;;  %5737 = vmatpush1.bf16.msra.mxu0 %v7556_v51  ;;  %v6719_v51 = vcombine.low %v660_v27, %v664_v57  ;;  %v7567_v62 = vld [vmem:[#allocation9 + $0xe4] ss:$8 sps:$4 sm:$0xff]   ;;  %v9133_v57 = vld [vmem:[#allocation23_spill] sm:$0xff] }
 0x1f7   :  { %v7097_v47 = vadd.f32 %v3263_v55, %v9131_v17  ;;  %v3265_v14 = vpop.f32.mrb[15].mxu0  ;;  %5738 = vmatprep.subr.bf16.mxu0 %v7561_v32  ;;  %4079 = vmatmul.mubr.bf16.gmra.mrb[88].mxu1 %v9132_v7  ;;  %v8555_v60 = vadd.f32 %v7095_v44, %v8473_v36  ;;  %v8569_v44 = vld [vmem:[#allocation3 + $0x164] ss:$24 sps:$4 sm:$0xff]   ;;  %v6727_v17 = vcombine.low %v668_v46, %v672_v1  ;;  %v8587_v1 = vld [vmem:[#allocation3 + $0x160] ss:$24 sps:$4 sm:$0xff]  }
 0x1f8   :  { %v7098_v12 = vadd.f32 %v3265_v14, %v8411_v25  ;;  %4124 = vmatpush1.bf16.msra.mxu1 %v6711_v63  ;;  %v8564_v35 = vadd.f32 %v7096_v34, %v8477_v50  ;;  %v7562_v25 = vld [vmem:[#allocation9 + $0xd0] ss:$8 sps:$4 sm:$0xff]   ;;  %4088 = vmatprep.mubr.bf16.mxu1 %v9133_v57  ;;  %v7570_v63 = vld [vmem:[#allocation9 + $0xf4] ss:$8 sps:$4 sm:$0xff]  }
 0x1f9   :  { %v8558_v29 = vadd.f32 %v7097_v47, %v8473_v36  ;;  %3966 = vmatmul.mubr.bf16.gmra.mrb[56].mxu0 %v8560_v54  ;;  %4125 = vmatprep.subr.bf16.mxu1 %v6720_v15  ;;  %v676_v48 = vld [vmem:[#allocation6 + $0x7d8] sm:$0xff] }
 0x1fa   :  { %v8567_v32 = vadd.f32 %v7098_v12, %v8477_v50  ;;  %5739 = vmatpush1.bf16.msra.mxu0 %v7559_v2  ;;  %3975 = vmatprep.mubr.bf16.mxu0 %v8569_v44  ;;  %v680_v34 = vld [vmem:[#allocation6 + $0x7f8] sm:$0xff] }
 0x1fb   :  { %5740 = vmatprep.subr.bf16.mxu0 %v7564_v18  ;;  %v7565_v18 = vld [vmem:[#allocation9 + $0xe0] ss:$8 sps:$4 sm:$0xff]   ;;  %v6736_v57 = vcombine.high %v676_v48, %v680_v34 }
 0x1fc   :  { %v3269_v27 = vpop.f32.mrb[16].mxu0  ;;  %4126 = vmatpush1.bf16.msra.mxu1 %v6719_v51 }
 0x1fd   :  { %v7099_v2 = vadd.f32 %v3269_v27, %v8415_v38  ;;  %v3271_v15 = vpop.f32.mrb[17].mxu0  ;;  %4127 = vmatprep.subr.bf16.mxu1 %v6728_v40  ;;  %v7802_v38 = vld [vmem:[#allocation3 + $0x150] ss:$24 sps:$4 sm:$0xff]   ;;  %v6744_v40 = vcombine.high %v684_v37, %v688_v61  ;;  %v696_v27 = vld [vmem:[#allocation6 + $0x878] sm:$0xff] }
 0x1fe   :  { %v7100_v47 = vadd.f32 %v3271_v15, %v8418_v49  ;;  %v3273_v14 = vpop.f32.mrb[18].mxu0  ;;  %5741 = vmatpush1.bf16.msra.mxu0 %v7562_v25  ;;  %v7804_v15 = vld [vmem:[#allocation3 + $0xc] ss:$24 sps:$4 sm:$0xff]  }
 0x1ff   :  { %v7101_v12 = vadd.f32 %v3273_v14, %v8421_v58  ;;  %v3275_v7 = vpop.f32.mrb[19].mxu0  ;;  %5742 = vmatprep.subr.bf16.mxu0 %v7567_v62  ;;  %4089 = vmatmul.mubr.bf16.gmra.mrb[92].mxu1 %v7802_v38  ;;  %v8582_v46 = vadd.f32 %v7099_v2, %v8473_v36  ;;  %v6735_v58 = vcombine.low %v676_v48, %v680_v34  ;;  %v692_v62 = vld [vmem:[#allocation6 + $0x858] sm:$0xff]  ;;  %v7573_v2 = vld [vmem:[#allocation9 + $0x104] ss:$8 sps:$4 sm:$0xff]  }
 0x200   :  { %v7102_v55 = vadd.f32 %v3275_v7, %v8423_v3  ;;  %4128 = vmatpush1.bf16.msra.mxu1 %v6727_v17  ;;  %v8591_v51 = vadd.f32 %v7100_v47, %v8477_v50  ;;  %v7568_v3 = vld [vmem:[#allocation9 + $0xf0] ss:$8 sps:$4 sm:$0xff]   ;;  %4131 = vmatprep.mubr.bf16.mxu1 %v7804_v15  ;;  %v6752_v47 = vcombine.high %v692_v62, %v696_v27 }
 0x201   :  { %v8585_v49 = vadd.f32 %v7101_v12, %v8473_v36  ;;  %3976 = vmatmul.mubr.bf16.gmra.mrb[60].mxu0 %v8587_v1  ;;  %4129 = vmatprep.subr.bf16.mxu1 %v6736_v57  ;;  %v700_v12 = vld [vmem:[#allocation6 + $0x898] sm:$0xff]  ;;  %v7571_v57 = vld [vmem:[#allocation9 + $0x100] ss:$8 sps:$4 sm:$0xff]  }
 0x202   :  { %v8594_v25 = vadd.f32 %v7102_v55, %v8477_v50  ;;  %5743 = vmatpush1.bf16.msra.mxu0 %v7565_v18  ;;  %5746 = vmatprep.mubr.bf16.mxu0 %v4883_v22  ;;  %v704_v7 = vld [vmem:[#allocation6 + $0x8b8] sm:$0xff]  ;;  %v7805_v15 = vld [vmem:[#allocation3 + $0x8] ss:$24 sps:$4 sm:$0xff]  }
 0x203   :  { %5744 = vmatprep.subr.bf16.mxu0 %v7570_v63  ;;  %v4914_v48 = vpack.c.bf16 %v8585_v49, %v8582_v46  ;;  %v780_v49 = vld [vmem:[#allocation6 + $0xb18] sm:$0xff] }
 0x204   :  { %v3279_v34 = vpop.f32.mrb[20].mxu0  ;;  %v4915_v55 = vpack.c.bf16 %v8594_v25, %v8591_v51  ;;  %4130 = vmatpush1.bf16.msra.mxu1 %v6735_v58  ;;  %v6760_v58 = vcombine.high %v700_v12, %v704_v7  ;;  %v7813_v51 = vld [vmem:[#allocation3 + $0xc8] ss:$24 sps:$4 sm:$0xff]   ;;  %v7600_v25 = vld [vmem:[#allocation9 + $0x194] ss:$8 sps:$4 sm:$0xff]  }
 0x205   :  { %v7103_v17 = vadd.f32 %v3279_v34, %v8427_v5  ;;  %v3281_v30 = vpop.f32.mrb[21].mxu0  ;;  %4212 = vmatprep.subr.bf16.mxu1 %v6744_v40  ;;  %v7576_v5 = vld [vmem:[#allocation9 + $0x114] ss:$8 sps:$4 sm:$0xff]  }
 0x206   :  { %v7104_v22 = vadd.f32 %v3281_v30, %v8430_v43  ;;  %v3283_v63 = vpop.f32.mrb[22].mxu0  ;;  %5745 = vmatpush1.bf16.msra.mxu0 %v7568_v3  ;;  %v7806_v3 = vld [vmem:[#allocation3 + $0x3c] ss:$24 sps:$4 sm:$0xff]  }
 0x207   :  { %v7105_v14 = vadd.f32 %v3283_v63, %v8433_v9  ;;  %v3285_v18 = vpop.f32.mrb[23].mxu0  ;;  %5827 = vmatprep.subr.bf16.mxu0 %v7573_v2  ;;  %4132 = vmatmul.mubr.bf16.vlgmr.msra.gmra.mrb[64].mxu1 %v7805_v15  ;;  %v8608_v37 = vadd.f32 %v7103_v17, %v8473_v36  ;;  %v6751_v9 = vcombine.low %v692_v62, %v696_v27  ;;  %v708_v40 = vld [vmem:[#allocation6 + $0x8d8] sm:$0xff]  ;;  %v7579_v27 = vld [vmem:[#allocation9 + $0x124] ss:$8 sps:$4 sm:$0xff]  }
 0x208   :  { %v7106_v38 = vadd.f32 %v3285_v18, %v8435_v21  ;;  %4213 = vmatpush1.bf16.msra.mxu1 %v6743_v26  ;;  %v8617_v61 = vadd.f32 %v7104_v22, %v8477_v50  ;;  %4141 = vmatprep.mubr.bf16.mxu1 %v7806_v3  ;;  %v712_v2 = vld [vmem:[#allocation6 + $0x8f8] sm:$0xff] }
 0x209   :  { %v8611_v43 = vadd.f32 %v7105_v14, %v8473_v36  ;;  %5747 = vmatmul.mubr.bf16.vlgmr.msra.gmra.mrb[64].mxu0 %v4882_v52  ;;  %4214 = vmatprep.subr.bf16.mxu1 %v6752_v47  ;;  %v6768_v30 = vcombine.high %v708_v40, %v712_v2  ;;  %v716_v63 = vld [vmem:[#allocation6 + $0x918] sm:$0xff]  ;;  %v7577_v14 = vld [vmem:[#allocation9 + $0x120] ss:$8 sps:$4 sm:$0xff]  }
 0x20a   :  { %v8620_v21 = vadd.f32 %v7106_v38, %v8477_v50  ;;  %5756 = vmatprep.mubr.bf16.mxu0 %v4891_v20  ;;  %5828 = vmatpush1.bf16.msra.mxu0 %v7571_v57  ;;  %v6759_v20 = vcombine.low %v700_v12, %v704_v7  ;;  %v720_v47 = vld [vmem:[#allocation6 + $0x938] sm:$0xff]  ;;  %v9134_v38 = vpack.c.bf16 %v8541_v33, %v8538_v23 }
 0x20b   :  { %v4922_v59 = vpack.c.bf16 %v8611_v43, %v8608_v37  ;;  %5829 = vmatprep.subr.bf16.mxu0 %v7576_v5  ;;  %v7807_v57 = vld [vmem:[#allocation3 + $0x38] ss:$24 sps:$4 sm:$0xff]   ;;  %v6776_v15 = vcombine.high %v716_v63, %v720_v47  ;;  %v7808_v5 = vld [vmem:[#allocation3 + $0x6c] ss:$24 sps:$4 sm:$0xff]  }
 0x20c   :  { %v3289_v52 = vpop.f32.mrb[24].mxu0  ;;  %v4923_v62 = vpack.c.bf16 %v8620_v21, %v8617_v61  ;;  %4215 = vmatpush1.bf16.msra.mxu1 %v6751_v9  ;;  %v724_v9 = vld [vmem:[#allocation6 + $0x958] sm:$0xff] }
 0x20d   :  { %v7107_v11 = vadd.f32 %v3289_v52, %v8439_v53  ;;  %v3291_v6 = vpop.f32.mrb[25].mxu0  ;;  %4216 = vmatprep.subr.bf16.mxu1 %v6760_v58  ;;  %v7582_v53 = vld [vmem:[#allocation9 + $0x134] ss:$8 sps:$4 sm:$0xff]   ;;  %v7815_v61 = vld [vmem:[#allocation3 + $0xf8] ss:$24 sps:$4 sm:$0xff]  }
 0x20e   :  { %v7108_v34 = vadd.f32 %v3291_v6, %v8442_v4  ;;  %v3293_v17 = vpop.f32.mrb[26].mxu0  ;;  %5830 = vmatpush1.bf16.msra.mxu0 %v7574_v19  ;;  %v728_v58 = vld [vmem:[#allocation6 + $0x978] sm:$0xff] }
 0x20f   :  { %v7109_v26 = vadd.f32 %v3293_v17, %v8445_v42  ;;  %v3295_v22 = vpop.f32.mrb[27].mxu0  ;;  %4142 = vmatmul.mubr.bf16.gmra.mrb[68].mxu1 %v7807_v57  ;;  %5831 = vmatprep.subr.bf16.mxu0 %v7579_v27  ;;  %v8634_v12 = vadd.f32 %v7107_v11, %v8473_v36  ;;  %v6767_v42 = vcombine.low %v708_v40, %v712_v2  ;;  %v7585_v40 = vld [vmem:[#allocation9 + $0x144] ss:$8 sps:$4 sm:$0xff]   ;;  %v7583_v17 = vld [vmem:[#allocation9 + $0x140] ss:$8 sps:$4 sm:$0xff]   ;;  %v740_v57 = vld [vmem:[#allocation6 + $0x9d8] sm:$0xff] }
 0x210   :  { %v7110_v18 = vadd.f32 %v3295_v22, %v8447_v41  ;;  %4217 = vmatpush1.bf16.msra.mxu1 %v6759_v20  ;;  %v8643_v7 = vadd.f32 %v7108_v34, %v8477_v50  ;;  %4151 = vmatprep.mubr.bf16.mxu1 %v7808_v5  ;;  %v6775_v2 = vcombine.low %v716_v63, %v720_v47  ;;  %v732_v20 = vld [vmem:[#allocation6 + $0x998] sm:$0xff]  ;;  %v7589_v5 = vld [vmem:[#allocation9 + $0x160] ss:$8 sps:$4 sm:$0xff]  }
 0x211   :  { %v8637_v4 = vadd.f32 %v7109_v26, %v8473_v36  ;;  %5757 = vmatmul.mubr.bf16.gmra.mrb[68].mxu0 %v4890_v45  ;;  %4218 = vmatprep.subr.bf16.mxu1 %v6768_v30  ;;  %v6784_v27 = vcombine.high %v724_v9, %v728_v58  ;;  %v736_v34 = vld [vmem:[#allocation6 + $0x9b8] sm:$0xff]  ;;  %v7809_v26 = vld [vmem:[#allocation3 + $0x68] ss:$24 sps:$4 sm:$0xff]   ;;  %v6783_v63 = vcombine.low %v724_v9, %v728_v58 }
 0x212   :  { %v8646_v41 = vadd.f32 %v7110_v18, %v8477_v50  ;;  %5766 = vmatprep.mubr.bf16.mxu0 %v9134_v38  ;;  %5832 = vmatpush1.bf16.msra.mxu0 %v7577_v14  ;;  %v9136_v14 = vpack.c.bf16 %v8567_v32, %v8564_v35  ;;  %v6792_v18 = vcombine.high %v732_v20, %v736_v34  ;;  %v748_v32 = vld [vmem:[#allocation6 + $0xa18] sm:$0xff] }
 0x213   :  { %v4930_v24 = vpack.c.bf16 %v8637_v4, %v8634_v12  ;;  %5833 = vmatprep.subr.bf16.mxu0 %v7582_v53  ;;  %v744_v53 = vld [vmem:[#allocation6 + $0x9f8] sm:$0xff]  ;;  %v6791_v38 = vcombine.low %v732_v20, %v736_v34  ;;  %v7613_v4 = vld [vmem:[#allocation9 + $0x1e0] ss:$8 sps:$4 sm:$0xff]  }
 0x214   :  { %v3299_v45 = vpop.f32.mrb[28].mxu0  ;;  %v4931_v3 = vpack.c.bf16 %v8646_v41, %v8643_v7  ;;  %4219 = vmatpush1.bf16.msra.mxu1 %v6767_v42  ;;  %v7591_v42 = vld [vmem:[#allocation9 + $0x164] ss:$8 sps:$4 sm:$0xff]   ;;  %v6800_v35 = vcombine.high %v740_v57, %v744_v53  ;;  %v7811_v9 = vld [vmem:[#allocation3 + $0x98] ss:$24 sps:$4 sm:$0xff]  }
 0x215   :  { %v7111_v23 = vadd.f32 %v3299_v45, %v8451_v16  ;;  %v3301_v33 = vpop.f32.mrb[29].mxu0  ;;  %4220 = vmatprep.subr.bf16.mxu1 %v6776_v15  ;;  %v7588_v16 = vld [vmem:[#allocation9 + $0x154] ss:$8 sps:$4 sm:$0xff]   ;;  %v6799_v45 = vcombine.low %v740_v57, %v744_v53  ;;  %v7604_v53 = vld [vmem:[#allocation9 + $0x1b0] ss:$8 sps:$4 sm:$0xff]  }
 0x216   :  { %v7112_v19 = vadd.f32 %v3301_v33, %v8454_v31  ;;  %v3303_v52 = vpop.f32.mrb[30].mxu0  ;;  %5834 = vmatpush1.bf16.msra.mxu0 %v7580_v10  ;;  %v752_v15 = vld [vmem:[#allocation6 + $0xa38] sm:$0xff]  ;;  %v9137_v10 = vpack.c.bf16 %v8558_v29, %v8555_v60  ;;  %v7817_v7 = vld [vmem:[#allocation3 + $0x128] ss:$24 sps:$4 sm:$0xff]  }
 0x217   :  { %v7113_v11 = vadd.f32 %v3303_v52, %v8457_v0  ;;  %v3305_v6 = vpop.f32.mrb[31].mxu0  ;;  %4152 = vmatmul.mubr.bf16.gmra.mrb[72].mxu1 %v7809_v26  ;;  %5835 = vmatprep.subr.bf16.mxu0 %v7585_v40  ;;  %v8660_v22 = vadd.f32 %v7111_v23, %v8473_v36  ;;  %v9135_v0 = vpack.c.bf16 %v8534_v56, %v8531_v8  ;;  %v7586_v8 = vld [vmem:[#allocation9 + $0x150] ss:$8 sps:$4 sm:$0xff]   ;;  %v7594_v58 = vld [vmem:[#allocation9 + $0x174] ss:$8 sps:$4 sm:$0xff]  }
 0x218   :  { %v7114_v30 = vadd.f32 %v3305_v6, %v8461_v39  ;;  %4221 = vmatpush1.bf16.msra.mxu1 %v6775_v2  ;;  %v8669_v47 = vadd.f32 %v7112_v19, %v8477_v50  ;;  %v6808_v40 = vcombine.high %v748_v32, %v752_v15  ;;  %v7812_v23 = vld [vmem:[#allocation3 + $0xcc] ss:$24 sps:$4 sm:$0xff]   ;;  %v756_v33 = vld [vmem:[#allocation6 + $0xa58] sm:$0xff]  ;;  %v7595_v6 = vld [vmem:[#allocation9 + $0x180] ss:$8 sps:$4 sm:$0xff]  }
 0x219   :  { %v8663_v31 = vadd.f32 %v7113_v11, %v8473_v36  ;;  %5767 = vmatmul.mubr.bf16.gmra.mrb[72].mxu0 %v9135_v0  ;;  %4222 = vmatprep.subr.bf16.mxu1 %v6784_v27  ;;  %v7810_v36 = vld [vmem:[#allocation3 + $0x9c] ss:$24 sps:$4 sm:$0xff]   ;;  %v7592_v19 = vld [vmem:[#allocation9 + $0x170] ss:$8 sps:$4 sm:$0xff]   ;;  %v6807_v27 = vcombine.low %v748_v32, %v752_v15 }
 0x21a   :  { %v8672_v39 = vadd.f32 %v7114_v30, %v8477_v50  ;;  %5776 = vmatprep.mubr.bf16.mxu0 %v9136_v14  ;;  %4161 = vmatprep.mubr.bf16.mxu1 %v7810_v36  ;;  %v760_v2 = vld [vmem:[#allocation6 + $0xa78] sm:$0xff]  ;;  %v7597_v52 = vld [vmem:[#allocation9 + $0x184] ss:$8 sps:$4 sm:$0xff]  }
 0x21b   :  { %5836 = vmatpush1.bf16.msra.mxu0 %v7583_v17  ;;  %v4938_v56 = vpack.c.bf16 %v8663_v31, %v8660_v22  ;;  %v6816_v60 = vcombine.high %v756_v33, %v760_v2  ;;  %v764_v29 = vld [vmem:[#allocation6 + $0xa98] sm:$0xff]  ;;  %v7824_v22 = vld [vmem:[#allocation3 + $0x74] ss:$24 sps:$4 sm:$0xff]   ;;  %v4724_v31 = vsub.s32 2, %v8459_v28 }
 0x21c   :  { %5837 = vmatprep.subr.bf16.mxu0 %v7588_v16  ;;  %v4939_v50 = vpack.c.bf16 %v8672_v39, %v8669_v47  ;;  %4223 = vmatpush1.bf16.msra.mxu1 %v6783_v63  ;;  %v768_v11 = vld [vmem:[#allocation6 + $0xab8] sm:$0xff]  ;;  %v7603_v16 = vld [vmem:[#allocation9 + $0x1a4] ss:$8 sps:$4 sm:$0xff]   ;;  %v7601_v63 = vld [vmem:[#allocation9 + $0x1a0] ss:$8 sps:$4 sm:$0xff]  }
 0x21d   :  { %4224 = vmatprep.subr.bf16.mxu1 %v6792_v18  ;;  %v6824_v20 = vcombine.high %v764_v29, %v768_v11  ;;  %v7814_v34 = vld [vmem:[#allocation3 + $0xfc] ss:$24 sps:$4 sm:$0xff]   ;;  %v7598_v26 = vld [vmem:[#allocation9 + $0x190] ss:$8 sps:$4 sm:$0xff]   ;;  %v6823_v0 = vcombine.low %v764_v29, %v768_v11  ;;  %v7816_v18 = vld [vmem:[#allocation3 + $0x12c] ss:$24 sps:$4 sm:$0xff]  }
 0x21e   :  { %v772_v17 = vld [vmem:[#allocation6 + $0xad8] sm:$0xff] }
 0x21f   :  { %5838 = vmatpush1.bf16.msra.mxu0 %v7586_v8  ;;  %4162 = vmatmul.mubr.bf16.gmra.mrb[76].mxu1 %v7811_v9  ;;  %v776_v30 = vld [vmem:[#allocation6 + $0xaf8] sm:$0xff]  ;;  %v7609_v8 = vld [vmem:[#allocation9 + $0x1c4] ss:$8 sps:$4 sm:$0xff]  }
 0x220   :  { %5839 = vmatprep.subr.bf16.mxu0 %v7591_v42  ;;  %4225 = vmatpush1.bf16.msra.mxu1 %v6791_v38  ;;  %v6832_v46 = vcombine.high %v772_v17, %v776_v30  ;;  %v7606_v21 = vld [vmem:[#allocation9 + $0x1b4] ss:$8 sps:$4 sm:$0xff]   ;;  %v7607_v38 = vld [vmem:[#allocation9 + $0x1c0] ss:$8 sps:$4 sm:$0xff]   ;;  %v7610_v9 = vld [vmem:[#allocation9 + $0x1d0] ss:$8 sps:$4 sm:$0xff]  }
 0x221   :  { %5777 = vmatmul.mubr.bf16.gmra.mrb[76].mxu0 %v9137_v10  ;;  %4226 = vmatprep.subr.bf16.mxu1 %v6800_v35  ;;  %v788_v36 = vld [vmem:[#allocation6 + $0xb58] sm:$0xff] }
 0x222   :  { %5786 = vmatprep.mubr.bf16.mxu0 %v4915_v55  ;;  %4171 = vmatprep.mubr.bf16.mxu1 %v7812_v23  ;;  %v6815_v55 = vcombine.low %v756_v33, %v760_v2  ;;  %v792_v57 = vld [vmem:[#allocation6 + $0xb78] sm:$0xff]  ;;  %v7821_v23 = vld [vmem:[#allocation3 + $0x10] ss:$24 sps:$4 sm:$0xff]  }
 0x223   :  { %5840 = vmatpush1.bf16.msra.mxu0 %v7589_v5  ;;  %v6848_v37 = vcombine.high %v788_v36, %v792_v57  ;;  %v796_v43 = vld [vmem:[#allocation6 + $0xb98] sm:$0xff] }
 0x224   :  { %5841 = vmatprep.subr.bf16.mxu0 %v7594_v58  ;;  %4227 = vmatpush1.bf16.msra.mxu1 %v6799_v45  ;;  %v7612_v41 = vld [vmem:[#allocation9 + $0x1d4] ss:$8 sps:$4 sm:$0xff]   ;;  %v7615_v58 = vld [vmem:[#allocation9 + $0x1e4] ss:$8 sps:$4 sm:$0xff]   ;;  %v7616_v45 = vld [vmem:[#allocation9 + $0x1f0] ss:$8 sps:$4 sm:$0xff]  }
 0x225   :  { %4228 = vmatprep.subr.bf16.mxu1 %v6808_v40  ;;  %v7818_v32 = vld [vmem:[#allocation3 + $0x15c] ss:$24 sps:$4 sm:$0xff]   ;;  %v7823_v2 = vld [vmem:[#allocation3 + $0x40] ss:$24 sps:$4 sm:$0xff]  }
 0x226   :  { %v804_v15 = vld [vmem:[#allocation6 + $0xbd8] sm:$0xff]  ;;  %v7621_v40 = vld [vmem:[#allocation9 + $0x204] ss:$8 sps:$4 sm:$0xff]  }
 0x227   :  { %5842 = vmatpush1.bf16.msra.mxu0 %v7592_v19  ;;  %4172 = vmatmul.mubr.bf16.gmra.mrb[80].mxu1 %v7813_v51  ;;  %v808_v5 = vld [vmem:[#allocation6 + $0xbf8] sm:$0xff]  ;;  %v7825_v19 = vld [vmem:[#allocation3 + $0x70] ss:$24 sps:$4 sm:$0xff]   ;;  %v8716_v51 = vld [vmem:[#allocation9 + $0x304] ss:$8 sps:$4 sm:$0xff]  }
 0x228   :  { %5843 = vmatprep.subr.bf16.mxu0 %v7597_v52  ;;  %4229 = vmatpush1.bf16.msra.mxu1 %v6807_v27  ;;  %v6864_v12 = vcombine.high %v804_v15, %v808_v5  ;;  %v7618_v47 = vld [vmem:[#allocation9 + $0x1f4] ss:$8 sps:$4 sm:$0xff]   ;;  %v6863_v39 = vcombine.low %v804_v15, %v808_v5  ;;  %v8711_v27 = vrot.slane %v8466_v13, %v4724_v31  ;;  %v7832_v31 = vld [vmem:[#allocation3 + $0x134] ss:$24 sps:$4 sm:$0xff]  }
 0x229   :  { %5787 = vmatmul.mubr.bf16.gmra.mrb[80].mxu0 %v4914_v48  ;;  %4230 = vmatprep.subr.bf16.mxu1 %v6816_v60  ;;  %v784_v48 = vld [vmem:[#allocation6 + $0xb38] sm:$0xff] }
 0x22a   :  { %5796 = vmatprep.mubr.bf16.mxu0 %v4923_v62  ;;  %4181 = vmatprep.mubr.bf16.mxu1 %v7814_v34  ;;  %v6831_v62 = vcombine.low %v772_v17, %v776_v30  ;;  %v6840_v14 = vcombine.high %v780_v49, %v784_v48  ;;  %v6839_v42 = vcombine.low %v780_v49, %v784_v48  ;;  %v7822_v33 = vld [vmem:[#allocation3 + $0x44] ss:$24 sps:$4 sm:$0xff]   ;;  %v8722_v30 = vld [vmem:[#allocation9 + $0x300] ss:$8 sps:$4 sm:$0xff]   ;;  %v7828_v49 = vld [vmem:[#allocation3 + $0xd4] ss:$24 sps:$4 sm:$0xff]  }
 0x22b   :  { %5844 = vmatpush1.bf16.msra.mxu0 %v7595_v6  ;;  %v7826_v52 = vld [vmem:[#allocation3 + $0xa4] ss:$24 sps:$4 sm:$0xff]  }
 0x22c   :  { %5845 = vmatprep.subr.bf16.mxu0 %v7600_v25  ;;  %4231 = vmatpush1.bf16.msra.mxu1 %v6815_v55  ;;  %v7624_v48 = vld [vmem:[#allocation9 + $0x214] ss:$8 sps:$4 sm:$0xff]  }
 0x22d   :  { %4232 = vmatprep.subr.bf16.mxu1 %v6824_v20 }
 0x22f   :  { %5846 = vmatpush1.bf16.msra.mxu0 %v7598_v26  ;;  %4182 = vmatmul.mubr.bf16.gmra.mrb[84].mxu1 %v7815_v61  ;;  %v8729_v61 = vld [vmem:[#allocation9 + $0x310] ss:$8 sps:$4 sm:$0xff]  }
 0x230   :  { %5847 = vmatprep.subr.bf16.mxu0 %v7603_v16  ;;  %4233 = vmatpush1.bf16.msra.mxu1 %v6823_v0  ;;  %v8725_v16 = vld [vmem:[#allocation9 + $0x314] ss:$8 sps:$4 sm:$0xff]  }
 0x231   :  { %5797 = vmatmul.mubr.bf16.gmra.mrb[84].mxu0 %v4922_v59  ;;  %4234 = vmatprep.subr.bf16.mxu1 %v6832_v46  ;;  %v800_v59 = vld [vmem:[#allocation6 + $0xbb8] sm:$0xff]  ;;  %v7619_v46 = vld [vmem:[#allocation9 + $0x200] ss:$8 sps:$4 sm:$0xff]  }
 0x232   :  { %5806 = vmatprep.mubr.bf16.mxu0 %v4931_v3  ;;  %4191 = vmatprep.mubr.bf16.mxu1 %v7816_v18  ;;  %v6847_v3 = vcombine.low %v788_v36, %v792_v57  ;;  %v6856_v35 = vcombine.high %v796_v43, %v800_v59  ;;  %v6855_v10 = vcombine.low %v796_v43, %v800_v59  ;;  %v7622_v18 = vld [vmem:[#allocation9 + $0x210] ss:$8 sps:$4 sm:$0xff]   ;;  %v7829_v59 = vld [vmem:[#allocation3 + $0xd0] ss:$24 sps:$4 sm:$0xff]  }
 0x233   :  { %5848 = vmatpush1.bf16.msra.mxu0 %v7601_v63 }
 0x234   :  { %5849 = vmatprep.subr.bf16.mxu0 %v7606_v21  ;;  %4235 = vmatpush1.bf16.msra.mxu1 %v6831_v62  ;;  %v8731_v62 = vld [vmem:[#allocation9 + $0x324] ss:$8 sps:$4 sm:$0xff]  }
 0x235   :  { %4236 = vmatprep.subr.bf16.mxu1 %v6840_v14 }
 0x237   :  { %5850 = vmatpush1.bf16.msra.mxu0 %v7604_v53  ;;  %4192 = vmatmul.mubr.bf16.gmra.mrb[88].mxu1 %v7817_v7 }
 0x238   :  { %5851 = vmatprep.subr.bf16.mxu0 %v7609_v8  ;;  %4237 = vmatpush1.bf16.msra.mxu1 %v6839_v42  ;;  %v7627_v8 = vld [vmem:[#allocation9 + $0x224] ss:$8 sps:$4 sm:$0xff]  }
 0x239   :  { %5807 = vmatmul.mubr.bf16.gmra.mrb[88].mxu0 %v4930_v24  ;;  %4238 = vmatprep.subr.bf16.mxu1 %v6848_v37  ;;  %v7819_v24 = vld [vmem:[#allocation3 + $0x158] ss:$24 sps:$4 sm:$0xff]  }
 0x23a   :  { %5816 = vmatprep.mubr.bf16.mxu0 %v4939_v50  ;;  %4201 = vmatprep.mubr.bf16.mxu1 %v7818_v32  ;;  %v7820_v50 = vld [vmem:[#allocation3 + $0x14] ss:$24 sps:$4 sm:$0xff]   ;;  %v7630_v32 = vld [vmem:[#allocation9 + $0x234] ss:$8 sps:$4 sm:$0xff]  }
 0x23b   :  { %5852 = vmatpush1.bf16.msra.mxu0 %v7607_v38  ;;  %v8739_v38 = vld [vmem:[#allocation9 + $0x320] ss:$8 sps:$4 sm:$0xff]  }
 0x23c   :  { %5853 = vmatprep.subr.bf16.mxu0 %v7612_v41  ;;  %4239 = vmatpush1.bf16.msra.mxu1 %v6847_v3  ;;  %v7625_v41 = vld [vmem:[#allocation9 + $0x220] ss:$8 sps:$4 sm:$0xff]   ;;  %v7830_v3 = vld [vmem:[#allocation3 + $0x104] ss:$24 sps:$4 sm:$0xff]  }
 0x23d   :  { %4240 = vmatprep.subr.bf16.mxu1 %v6856_v35  ;;  %v8741_v35 = vld [vmem:[#allocation9 + $0x334] ss:$8 sps:$4 sm:$0xff]  }
 0x23f   :  { %5854 = vmatpush1.bf16.msra.mxu0 %v7610_v9  ;;  %4202 = vmatmul.mubr.bf16.gmra.mrb[92].mxu1 %v7819_v24  ;;  %v8745_v9 = vld [vmem:[#allocation9 + $0x330] ss:$8 sps:$4 sm:$0xff]  }
 0x240   :  { %5855 = vmatprep.subr.bf16.mxu0 %v7615_v58  ;;  %4241 = vmatpush1.bf16.msra.mxu1 %v6855_v10  ;;  %v7628_v10 = vld [vmem:[#allocation9 + $0x230] ss:$8 sps:$4 sm:$0xff]  }
 0x241   :  { %5817 = vmatmul.mubr.bf16.gmra.mrb[92].mxu0 %v4938_v56  ;;  %4242 = vmatprep.subr.bf16.mxu1 %v6864_v12  ;;  %v4728_v56 = vsub.s32 3, %v8459_v28  ;;  %v8747_v12 = vld [vmem:[#allocation9 + $0x344] ss:$8 sps:$4 sm:$0xff]  }
 0x242   :  { %4244 = vmatprep.mubr.bf16.mxu1 %v7820_v50 }
 0x243   :  { %5856 = vmatpush1.bf16.msra.mxu0 %v7613_v4  ;;  %v8714_v29 = vrot.slane %v8466_v13, %v4728_v56  ;;  %v7827_v13 = vld [vmem:[#allocation3 + $0xa0] ss:$24 sps:$4 sm:$0xff]   ;;  %v8757_v56 = vld [vmem:[#allocation9 + $0x354] ss:$8 sps:$4 sm:$0xff]  }
 0x244   :  { %5857 = vmatprep.subr.bf16.mxu0 %v7618_v47  ;;  %4243 = vmatpush1.bf16.msra.mxu1 %v6863_v39  ;;  %v7633_v39 = vld [vmem:[#allocation9 + $0x244] ss:$8 sps:$4 sm:$0xff]  }
 0x245   :  { %7051 = vmatprep.subr.bf16.mxu1 %v8716_v51 }
 0x247   :  { %5858 = vmatpush1.bf16.msra.mxu0 %v7616_v45  ;;  %4245 = vmatmul.mubr.bf16.vlgmr.msra.gmra.mrb[64].mxu1 %v7821_v23  ;;  %v7831_v23 = vld [vmem:[#allocation3 + $0x100] ss:$24 sps:$4 sm:$0xff]  }
 0x248   :  { %5940 = vmatprep.subr.bf16.mxu0 %v7621_v40  ;;  %4254 = vmatprep.mubr.bf16.mxu1 %v7822_v33  ;;  %v8755_v33 = vld [vmem:[#allocation9 + $0x340] ss:$8 sps:$4 sm:$0xff]  }
 0x249   :  { %7067 = vmatpush1.bf16.msra.mxu1 %v8722_v30 }
 0x24a   :  { %7052 = vmatprep.subr.bf16.mxu1 %v8725_v16 }
 0x24d   :  { %7068 = vmatpush1.bf16.msra.mxu1 %v8729_v61 }
 0x24e   :  { %7053 = vmatprep.subr.bf16.mxu1 %v8731_v62 }
 0x24f   :  { %4255 = vmatmul.mubr.bf16.gmra.mrb[68].mxu1 %v7823_v2 }
 0x250   :  { %4264 = vmatprep.mubr.bf16.mxu1 %v7824_v22  ;;  %v7631_v22 = vld [vmem:[#allocation9 + $0x240] ss:$8 sps:$4 sm:$0xff]  }
 0x251   :  { %7069 = vmatpush1.bf16.msra.mxu1 %v8739_v38 }
 0x252   :  { %7054 = vmatprep.subr.bf16.mxu1 %v8741_v35 }
 0x255   :  { %7070 = vmatpush1.bf16.msra.mxu1 %v8745_v9 }
 0x256   :  { %7055 = vmatprep.subr.bf16.mxu1 %v8747_v12 }
 0x257   :  { %4265 = vmatmul.mubr.bf16.gmra.mrb[72].mxu1 %v7825_v19  ;;  %v7636_v19 = vld [vmem:[#allocation9 + $0x254] ss:$8 sps:$4 sm:$0xff]  }
 0x258   :  { %4274 = vmatprep.mubr.bf16.mxu1 %v7826_v52 }
 0x259   :  { %7071 = vmatpush1.bf16.msra.mxu1 %v8755_v33 }
 0x25a   :  { %v3568_v60 = vpop.f32.mrb[32].mxu1  ;;  %7056 = vmatprep.subr.bf16.mxu1 %v8757_v56 }
 0x25b   :  { %v3570_v11 = vpop.f32.mrb[33].mxu1  ;;  %v4756_v25 = vadd.f32 %v8711_v27, %v3568_v60 }
 0x25c   :  { %v3572_v6 = vpop.f32.mrb[34].mxu1  ;;  %v4757_v34 = vadd.f32 %v8714_v29, %v3570_v11  ;;  %v8761_v11 = vld [vmem:[#allocation9 + $0x350] ss:$8 sps:$4 sm:$0xff]  }
 0x25d   :  { %v4764_v55 = vadd.f32 %v8711_v27, %v3572_v6  ;;  %v3574_v20 = vpop.f32.mrb[35].mxu1  ;;  %7072 = vmatpush1.bf16.msra.mxu1 %v8761_v11 }
 0x25e   :  { %v4765_v17 = vadd.f32 %v8714_v29, %v3574_v20 }
 0x25f   :  { %v4884_v26 = vpack.c.bf16 %v4764_v55, %v4756_v25  ;;  %4275 = vmatmul.mubr.bf16.gmra.mrb[76].mxu1 %v7827_v13  ;;  %v7634_v25 = vld [vmem:[#allocation9 + $0x250] ss:$8 sps:$4 sm:$0xff]   ;;  %v8763_v55 = vld [vmem:[#allocation9 + $0x364] ss:$8 sps:$4 sm:$0xff]  }
 0x260   :  { %v4885_v0 = vpack.c.bf16 %v4765_v17, %v4757_v34  ;;  %4284 = vmatprep.mubr.bf16.mxu1 %v7828_v49  ;;  %7057 = vmatprep.subr.bf16.mxu1 %v8763_v55  ;;  %v8772_v49 = vld [vmem:[#allocation9 + $0x360] ss:$8 sps:$4 sm:$0xff]  }
 0x261   :  { %7073 = vmatpush1.bf16.msra.mxu1 %v8772_v49 }
 0x262   :  { %v3578_v63 = vpop.f32.mrb[36].mxu1  ;;  %5859 = vmatprep.mubr.bf16.mxu0 %v4885_v0 }
 0x263   :  { %v3580_v21 = vpop.f32.mrb[37].mxu1  ;;  %5860 = vmatmul.mubr.bf16.vlgmr.msra.gmra.mrb[64].mxu0 %v4884_v26  ;;  %v4772_v36 = vadd.f32 %v8711_v27, %v3578_v63  ;;  %v7639_v26 = vld [vmem:[#allocation9 + $0x264] ss:$8 sps:$4 sm:$0xff]   ;;  %v7637_v63 = vld [vmem:[#allocation9 + $0x260] ss:$8 sps:$4 sm:$0xff]  }
 0x264   :  { %v3582_v14 = vpop.f32.mrb[38].mxu1  ;;  %5941 = vmatpush1.bf16.msra.mxu0 %v7619_v46  ;;  %v4773_v42 = vadd.f32 %v8714_v29, %v3580_v21  ;;  %v8775_v21 = vld [vmem:[#allocation9 + $0x374] ss:$8 sps:$4 sm:$0xff]  }
 0x265   :  { %v4780_v57 = vadd.f32 %v8711_v27, %v3582_v14  ;;  %v3584_v53 = vpop.f32.mrb[39].mxu1  ;;  %5942 = vmatprep.subr.bf16.mxu0 %v7624_v48  ;;  %v7642_v14 = vld [vmem:[#allocation9 + $0x274] ss:$8 sps:$4 sm:$0xff]   ;;  %7058 = vmatprep.subr.bf16.mxu1 %v8775_v21 }
 0x266   :  { %v4781_v37 = vadd.f32 %v8714_v29, %v3584_v53  ;;  %v7640_v53 = vld [vmem:[#allocation9 + $0x270] ss:$8 sps:$4 sm:$0xff]  }
 0x267   :  { %v4892_v43 = vpack.c.bf16 %v4780_v57, %v4772_v36  ;;  %4285 = vmatmul.mubr.bf16.gmra.mrb[80].mxu1 %v7829_v59 }
 0x268   :  { %v4893_v7 = vpack.c.bf16 %v4781_v37, %v4773_v42  ;;  %5943 = vmatpush1.bf16.msra.mxu0 %v7622_v18  ;;  %4294 = vmatprep.mubr.bf16.mxu1 %v7830_v3  ;;  %v8790_v3 = vld [vmem:[#allocation9 + $0x380] ss:$8 sps:$4 sm:$0xff]  }
 0x269   :  { %5944 = vmatprep.subr.bf16.mxu0 %v7627_v8  ;;  %v8781_v8 = vld [vmem:[#allocation9 + $0x384] ss:$8 sps:$4 sm:$0xff]  }
 0x26a   :  { %v3588_v15 = vpop.f32.mrb[40].mxu1  ;;  %5869 = vmatprep.mubr.bf16.mxu0 %v4893_v7 }
 0x26b   :  { %v3590_v5 = vpop.f32.mrb[41].mxu1  ;;  %5870 = vmatmul.mubr.bf16.gmra.mrb[68].mxu0 %v4892_v43  ;;  %v4788_v4 = vadd.f32 %v8711_v27, %v3588_v15  ;;  %v7645_v43 = vld [vmem:[#allocation9 + $0x284] ss:$8 sps:$4 sm:$0xff]   ;;  %v7643_v15 = vld [vmem:[#allocation9 + $0x280] ss:$8 sps:$4 sm:$0xff]  }
 0x26c   :  { %v3592_v58 = vpop.f32.mrb[42].mxu1  ;;  %5945 = vmatpush1.bf16.msra.mxu0 %v7625_v41  ;;  %v4789_v50 = vadd.f32 %v8714_v29, %v3590_v5  ;;  %v8792_v5 = vld [vmem:[#allocation9 + $0x394] ss:$8 sps:$4 sm:$0xff]  }
 0x26d   :  { %v4796_v24 = vadd.f32 %v8711_v27, %v3592_v58  ;;  %v3594_v47 = vpop.f32.mrb[43].mxu1  ;;  %5946 = vmatprep.subr.bf16.mxu0 %v7630_v32  ;;  %v7648_v58 = vld [vmem:[#allocation9 + $0x294] ss:$8 sps:$4 sm:$0xff]  }
 0x26e   :  { %v4797_v45 = vadd.f32 %v8714_v29, %v3594_v47  ;;  %v7646_v47 = vld [vmem:[#allocation9 + $0x290] ss:$8 sps:$4 sm:$0xff]  }
 0x26f   :  { %v4900_v40 = vpack.c.bf16 %v4796_v24, %v4788_v4  ;;  %4295 = vmatmul.mubr.bf16.gmra.mrb[84].mxu1 %v7831_v23  ;;  %v8796_v24 = vld [vmem:[#allocation9 + $0x390] ss:$8 sps:$4 sm:$0xff]   ;;  %v7651_v23 = vld [vmem:[#allocation9 + $0x2a4] ss:$8 sps:$4 sm:$0xff]  }
 0x270   :  { %v4901_v2 = vpack.c.bf16 %v4797_v45, %v4789_v50  ;;  %5947 = vmatpush1.bf16.msra.mxu0 %v7628_v10  ;;  %4304 = vmatprep.mubr.bf16.mxu1 %v7832_v31 }
 0x271   :  { %5948 = vmatprep.subr.bf16.mxu0 %v7633_v39  ;;  %v8798_v39 = vld [vmem:[#allocation9 + $0x3a4] ss:$8 sps:$4 sm:$0xff]  }
 0x272   :  { %v3598_v52 = vpop.f32.mrb[44].mxu1  ;;  %5879 = vmatprep.mubr.bf16.mxu0 %v4901_v2 }
 0x273   :  { %v3600_v60 = vpop.f32.mrb[45].mxu1  ;;  %5880 = vmatmul.mubr.bf16.gmra.mrb[72].mxu0 %v4900_v40  ;;  %v4804_v20 = vadd.f32 %v8711_v27, %v3598_v52 }
 0x274   :  { %v3602_v6 = vpop.f32.mrb[46].mxu1  ;;  %5949 = vmatpush1.bf16.msra.mxu0 %v7631_v22  ;;  %v4805_v13 = vadd.f32 %v8714_v29, %v3600_v60  ;;  %v7649_v60 = vld [vmem:[#allocation9 + $0x2a0] ss:$8 sps:$4 sm:$0xff]  }
 0x275   :  { %v4812_v34 = vadd.f32 %v8711_v27, %v3602_v6  ;;  %v3604_v17 = vpop.f32.mrb[47].mxu1  ;;  %5950 = vmatprep.subr.bf16.mxu0 %v7636_v19  ;;  %v8806_v19 = vld [vmem:[#allocation9 + $0x3a0] ss:$8 sps:$4 sm:$0xff]   ;;  %v8808_v6 = vld [vmem:[#allocation9 + $0x3b4] ss:$8 sps:$4 sm:$0xff]  }
 0x276   :  { %v4813_v0 = vadd.f32 %v8714_v29, %v3604_v17  ;;  %v8812_v17 = vld [vmem:[#allocation9 + $0x3b0] ss:$8 sps:$4 sm:$0xff]  }
 0x277   :  { %v4908_v46 = vpack.c.bf16 %v4812_v34, %v4804_v20  ;;  %4305 = vmatmul.mubr.bf16.gmra.mrb[88].mxu1 %v8560_v54  ;;  %v8779_v54 = vld [vmem:[#allocation9 + $0x370] ss:$8 sps:$4 sm:$0xff]  }
 0x278   :  { %v4909_v48 = vpack.c.bf16 %v4813_v0, %v4805_v13  ;;  %5951 = vmatpush1.bf16.msra.mxu0 %v7634_v25  ;;  %4314 = vmatprep.mubr.bf16.mxu1 %v8569_v44  ;;  %v7654_v25 = vld [vmem:[#allocation9 + $0x2b4] ss:$8 sps:$4 sm:$0xff]   ;;  %v7652_v13 = vld [vmem:[#allocation9 + $0x2b0] ss:$8 sps:$4 sm:$0xff]   ;;  %v8814_v0 = vld [vmem:[#allocation9 + $0x3c4] ss:$8 sps:$4 sm:$0xff]  }
 0x279   :  { %5952 = vmatprep.subr.bf16.mxu0 %v7639_v26  ;;  %7074 = vmatpush1.bf16.msra.mxu1 %v8779_v54 }
 0x27a   :  { %v3608_v18 = vpop.f32.mrb[48].mxu1  ;;  %5889 = vmatprep.mubr.bf16.mxu0 %v4909_v48  ;;  %7059 = vmatprep.subr.bf16.mxu1 %v8781_v8 }
 0x27b   :  { %v3610_v36 = vpop.f32.mrb[49].mxu1  ;;  %5890 = vmatmul.mubr.bf16.gmra.mrb[76].mxu0 %v4908_v46  ;;  %v4820_v44 = vadd.f32 %v8711_v27, %v3608_v18 }
 0x27c   :  { %v3612_v57 = vpop.f32.mrb[50].mxu1  ;;  %5953 = vmatpush1.bf16.msra.mxu0 %v7637_v63  ;;  %v4821_v59 = vadd.f32 %v8714_v29, %v3610_v36 }
 0x27d   :  { %v4828_v42 = vadd.f32 %v8711_v27, %v3612_v57  ;;  %v3614_v37 = vpop.f32.mrb[51].mxu1  ;;  %5954 = vmatprep.subr.bf16.mxu0 %v7642_v14  ;;  %7075 = vmatpush1.bf16.msra.mxu1 %v8790_v3  ;;  %v7657_v14 = vld [vmem:[#allocation9 + $0x2c4] ss:$8 sps:$4 sm:$0xff]  }
 0x27e   :  { %v4829_v7 = vadd.f32 %v8714_v29, %v3614_v37  ;;  %7060 = vmatprep.subr.bf16.mxu1 %v8792_v5  ;;  %v8824_v37 = vld [vmem:[#allocation9 + $0x3d4] ss:$8 sps:$4 sm:$0xff]  }
 0x27f   :  { %v4916_v41 = vpack.c.bf16 %v4828_v42, %v4820_v44  ;;  %4315 = vmatmul.mubr.bf16.gmra.mrb[92].mxu1 %v8587_v1  ;;  %v7655_v42 = vld [vmem:[#allocation9 + $0x2c0] ss:$8 sps:$4 sm:$0xff]  }
 0x280   :  { %v4917_v32 = vpack.c.bf16 %v4829_v7, %v4821_v59  ;;  %5955 = vmatpush1.bf16.msra.mxu0 %v7640_v53  ;;  %v8822_v53 = vld [vmem:[#allocation9 + $0x3c0] ss:$8 sps:$4 sm:$0xff]  }
 0x281   :  { %5956 = vmatprep.subr.bf16.mxu0 %v7645_v43  ;;  %7076 = vmatpush1.bf16.msra.mxu1 %v8796_v24  ;;  %v7660_v43 = vld [vmem:[#allocation9 + $0x2d4] ss:$8 sps:$4 sm:$0xff]  }
 0x282   :  { %v3618_v10 = vpop.f32.mrb[52].mxu1  ;;  %5899 = vmatprep.mubr.bf16.mxu0 %v4917_v32  ;;  %7061 = vmatprep.subr.bf16.mxu1 %v8798_v39 }
 0x283   :  { %v3620_v4 = vpop.f32.mrb[53].mxu1  ;;  %5900 = vmatmul.mubr.bf16.gmra.mrb[80].mxu0 %v4916_v41  ;;  %v4836_v50 = vadd.f32 %v8711_v27, %v3618_v10  ;;  %v8828_v41 = vld [vmem:[#allocation9 + $0x3d0] ss:$8 sps:$4 sm:$0xff]  }
 0x284   :  { %v3622_v1 = vpop.f32.mrb[54].mxu1  ;;  %5957 = vmatpush1.bf16.msra.mxu0 %v7643_v15  ;;  %v4837_v2 = vadd.f32 %v8714_v29, %v3620_v4  ;;  %v7658_v15 = vld [vmem:[#allocation9 + $0x2d0] ss:$8 sps:$4 sm:$0xff]  }
 0x285   :  { %v4844_v45 = vadd.f32 %v8711_v27, %v3622_v1  ;;  %v3624_v40 = vpop.f32.mrb[55].mxu1  ;;  %5958 = vmatprep.subr.bf16.mxu0 %v7648_v58  ;;  %7077 = vmatpush1.bf16.msra.mxu1 %v8806_v19  ;;  %v7663_v1 = vld [vmem:[#allocation9 + $0x2e4] ss:$8 sps:$4 sm:$0xff]  }
 0x286   :  { %v4845_v22 = vadd.f32 %v8714_v29, %v3624_v40  ;;  %7062 = vmatprep.subr.bf16.mxu1 %v8808_v6 }
 0x287   :  { %v4924_v31 = vpack.c.bf16 %v4844_v45, %v4836_v50  ;;  %v4732_v45 = vsub.s32 4, %v8459_v28 }
 0x288   :  { %v4925_v52 = vpack.c.bf16 %v4845_v22, %v4837_v2  ;;  %5959 = vmatpush1.bf16.msra.mxu0 %v7646_v47  ;;  %v7661_v22 = vld [vmem:[#allocation9 + $0x2e0] ss:$8 sps:$4 sm:$0xff]  }
 0x289   :  { %5960 = vmatprep.subr.bf16.mxu0 %v7651_v23  ;;  %7078 = vmatpush1.bf16.msra.mxu1 %v8812_v17  ;;  %v4736_v23 = vsub.s32 5, %v8459_v28 }
 0x28a   :  { %v3628_v20 = vpop.f32.mrb[56].mxu1  ;;  %5909 = vmatprep.mubr.bf16.mxu0 %v4925_v52  ;;  %7063 = vmatprep.subr.bf16.mxu1 %v8814_v0 }
 0x28b   :  { %v3630_v34 = vpop.f32.mrb[57].mxu1  ;;  %5910 = vmatmul.mubr.bf16.gmra.mrb[84].mxu0 %v4924_v31  ;;  %v4852_v46 = vadd.f32 %v8711_v27, %v3628_v20  ;;  %v7666_v31 = vld [vmem:[#allocation9 + $0x2f4] ss:$8 sps:$4 sm:$0xff]   ;;  %v8847_v20 = vld [vmem:[#allocation9 + $0x3e0] ss:$8 sps:$4 sm:$0xff]  }
 0x28c   :  { %v3632_v26 = vpop.f32.mrb[58].mxu1  ;;  %5961 = vmatpush1.bf16.msra.mxu0 %v7649_v60  ;;  %v4853_v18 = vadd.f32 %v8714_v29, %v3630_v34  ;;  %v8842_v60 = vld [vmem:[#allocation9 + $0x3e4] ss:$8 sps:$4 sm:$0xff]  }
 0x28d   :  { %v4860_v48 = vadd.f32 %v8711_v27, %v3632_v26  ;;  %v3634_v63 = vpop.f32.mrb[59].mxu1  ;;  %5962 = vmatprep.subr.bf16.mxu0 %v7654_v25  ;;  %7079 = vmatpush1.bf16.msra.mxu1 %v8822_v53  ;;  %v7664_v26 = vld [vmem:[#allocation9 + $0x2f0] ss:$8 sps:$4 sm:$0xff]  }
 0x28e   :  { %v4861_v36 = vadd.f32 %v8714_v29, %v3634_v63  ;;  %7064 = vmatprep.subr.bf16.mxu1 %v8824_v37 }
 0x28f   :  { %v4932_v57 = vpack.c.bf16 %v4860_v48, %v4852_v46 }
 0x290   :  { %v4933_v44 = vpack.c.bf16 %v4861_v36, %v4853_v18  ;;  %5963 = vmatpush1.bf16.msra.mxu0 %v7652_v13 }
 0x291   :  { %5964 = vmatprep.subr.bf16.mxu0 %v7657_v14  ;;  %7080 = vmatpush1.bf16.msra.mxu1 %v8828_v41  ;;  %v8853_v14 = vld [vmem:[#allocation9 + $0x3f4] ss:$8 sps:$4 sm:$0xff]  }
 0x292   :  { %v3638_v59 = vpop.f32.mrb[60].mxu1  ;;  %5919 = vmatprep.mubr.bf16.mxu0 %v4933_v44  ;;  %7065 = vmatprep.subr.bf16.mxu1 %v8842_v60 }
 0x293   :  { %v3640_v7 = vpop.f32.mrb[61].mxu1  ;;  %5920 = vmatmul.mubr.bf16.gmra.mrb[88].mxu0 %v4932_v57  ;;  %v4868_v58 = vadd.f32 %v8711_v27, %v3638_v59  ;;  %v8857_v57 = vld [vmem:[#allocation9 + $0x3f0] ss:$8 sps:$4 sm:$0xff]  }
 0x294   :  { %v3642_v32 = vpop.f32.mrb[62].mxu1  ;;  %5965 = vmatpush1.bf16.msra.mxu0 %v7655_v42  ;;  %v4869_v47 = vadd.f32 %v8714_v29, %v3640_v7 }
 0x295   :  { %v4876_v10 = vadd.f32 %v8711_v27, %v3642_v32  ;;  %v3644_v4 = vpop.f32.mrb[63].mxu1  ;;  %5966 = vmatprep.subr.bf16.mxu0 %v7660_v43  ;;  %v8837_v27 = vld [vmem:[#allocation8] sm:$0xff]  ;;  %7081 = vmatpush1.bf16.msra.mxu1 %v8847_v20 }
 0x296   :  { %v4877_v50 = vadd.f32 %v8714_v29, %v3644_v4  ;;  %v8840_v52 = vrot.slane %v8837_v27, %v4732_v45  ;;  %v8845_v29 = vrot.slane %v8837_v27, %v4736_v23  ;;  %7066 = vmatprep.subr.bf16.mxu1 %v8853_v14 }
 0x297   :  { %v4940_v40 = vpack.c.bf16 %v4876_v10, %v4868_v58 }
 0x298   :  { %v4941_v2 = vpack.c.bf16 %v4877_v50, %v4869_v47  ;;  %5967 = vmatpush1.bf16.msra.mxu0 %v7658_v15 }
 0x299   :  { %5968 = vmatprep.subr.bf16.mxu0 %v7663_v1  ;;  %7082 = vmatpush1.bf16.msra.mxu1 %v8857_v57 }
 0x29a   :  { %5929 = vmatprep.mubr.bf16.mxu0 %v4941_v2 }
 0x29b   :  { %5930 = vmatmul.mubr.bf16.gmra.mrb[92].mxu0 %v4940_v40 }
 0x29c   :  { %v3907_v25 = vpop.f32.mrb[32].mxu0  ;;  %5969 = vmatpush1.bf16.msra.mxu0 %v7661_v22 }
 0x29d   :  { %v3909_v34 = vpop.f32.mrb[33].mxu0  ;;  %5970 = vmatprep.subr.bf16.mxu0 %v7666_v31  ;;  %v4758_v46 = vadd.f32 %v8840_v52, %v3907_v25 }
 0x29e   :  { %v3911_v13 = vpop.f32.mrb[34].mxu0  ;;  %v4759_v18 = vadd.f32 %v8845_v29, %v3909_v34 }
 0x29f   :  { %v4766_v48 = vadd.f32 %v8840_v52, %v3911_v13  ;;  %v3913_v63 = vpop.f32.mrb[35].mxu0 }
 0x2a0   :  { %v4767_v36 = vadd.f32 %v8845_v29, %v3913_v63  ;;  %5971 = vmatpush1.bf16.msra.mxu0 %v7664_v26 }
 0x2a1   :  { %v4886_v44 = vpack.c.bf16 %v4766_v48, %v4758_v46  ;;  %6053 = vmatprep.subr.bf16.mxu0 %v8716_v51 }
 0x2a2   :  { %v4887_v42 = vpack.c.bf16 %v4767_v36, %v4759_v18 }
 0x2a4   :  { %v3917_v43 = vpop.f32.mrb[36].mxu0  ;;  %5972 = vmatprep.mubr.bf16.mxu0 %v4887_v42 }
 0x2a5   :  { %v3919_v59 = vpop.f32.mrb[37].mxu0  ;;  %5973 = vmatmul.mubr.bf16.vlgmr.msra.gmra.mrb[64].mxu0 %v4886_v44  ;;  %v4774_v32 = vadd.f32 %v8840_v52, %v3917_v43 }
 0x2a6   :  { %v3921_v7 = vpop.f32.mrb[38].mxu0  ;;  %6054 = vmatpush1.bf16.msra.mxu0 %v8722_v30  ;;  %v4775_v10 = vadd.f32 %v8845_v29, %v3919_v59 }
 0x2a7   :  { %v4782_v15 = vadd.f32 %v8840_v52, %v3921_v7  ;;  %v3923_v58 = vpop.f32.mrb[39].mxu0  ;;  %6055 = vmatprep.subr.bf16.mxu0 %v8725_v16 }
 0x2a8   :  { %v4783_v51 = vadd.f32 %v8845_v29, %v3923_v58 }
 0x2a9   :  { %v4894_v4 = vpack.c.bf16 %v4782_v15, %v4774_v32 }
 0x2aa   :  { %v4895_v1 = vpack.c.bf16 %v4783_v51, %v4775_v10  ;;  %6056 = vmatpush1.bf16.msra.mxu0 %v8729_v61 }
 0x2ab   :  { %6057 = vmatprep.subr.bf16.mxu0 %v8731_v62 }
 0x2ac   :  { %v3927_v47 = vpop.f32.mrb[40].mxu0  ;;  %5982 = vmatprep.mubr.bf16.mxu0 %v4895_v1 }
 0x2ad   :  { %v3929_v30 = vpop.f32.mrb[41].mxu0  ;;  %5983 = vmatmul.mubr.bf16.gmra.mrb[68].mxu0 %v4894_v4  ;;  %v4790_v45 = vadd.f32 %v8840_v52, %v3927_v47 }
 0x2ae   :  { %v3931_v50 = vpop.f32.mrb[42].mxu0  ;;  %6058 = vmatpush1.bf16.msra.mxu0 %v8739_v38  ;;  %v4791_v23 = vadd.f32 %v8845_v29, %v3929_v30 }
 0x2af   :  { %v4798_v16 = vadd.f32 %v8840_v52, %v3931_v50  ;;  %v3933_v40 = vpop.f32.mrb[43].mxu0  ;;  %6059 = vmatprep.subr.bf16.mxu0 %v8741_v35 }
 0x2b0   :  { %v4799_v61 = vadd.f32 %v8845_v29, %v3933_v40 }
 0x2b1   :  { %v4902_v2 = vpack.c.bf16 %v4798_v16, %v4790_v45 }
 0x2b2   :  { %v4903_v62 = vpack.c.bf16 %v4799_v61, %v4791_v23  ;;  %6060 = vmatpush1.bf16.msra.mxu0 %v8745_v9 }
 0x2b3   :  { %6061 = vmatprep.subr.bf16.mxu0 %v8747_v12 }
 0x2b4   :  { %v3937_v22 = vpop.f32.mrb[44].mxu0  ;;  %5992 = vmatprep.mubr.bf16.mxu0 %v4903_v62 }
 0x2b5   :  { %v3939_v38 = vpop.f32.mrb[45].mxu0  ;;  %5993 = vmatmul.mubr.bf16.gmra.mrb[72].mxu0 %v4902_v2  ;;  %v4806_v25 = vadd.f32 %v8840_v52, %v3937_v22 }
 0x2b6   :  { %v3941_v31 = vpop.f32.mrb[46].mxu0  ;;  %6062 = vmatpush1.bf16.msra.mxu0 %v8755_v33  ;;  %v4807_v26 = vadd.f32 %v8845_v29, %v3939_v38 }
 0x2b7   :  { %v4814_v35 = vadd.f32 %v8840_v52, %v3941_v31  ;;  %v3943_v34 = vpop.f32.mrb[47].mxu0  ;;  %6063 = vmatprep.subr.bf16.mxu0 %v8757_v56 }
 0x2b8   :  { %v4815_v9 = vadd.f32 %v8845_v29, %v3943_v34 }
 0x2b9   :  { %v4910_v13 = vpack.c.bf16 %v4814_v35, %v4806_v25 }
 0x2ba   :  { %v4911_v12 = vpack.c.bf16 %v4815_v9, %v4807_v26  ;;  %6064 = vmatpush1.bf16.msra.mxu0 %v8761_v11 }
 0x2bb   :  { %6065 = vmatprep.subr.bf16.mxu0 %v8763_v55 }
 0x2bc   :  { %v3947_v46 = vpop.f32.mrb[48].mxu0  ;;  %6002 = vmatprep.mubr.bf16.mxu0 %v4911_v12 }
 0x2bd   :  { %v3949_v33 = vpop.f32.mrb[49].mxu0  ;;  %6003 = vmatmul.mubr.bf16.gmra.mrb[76].mxu0 %v4910_v13  ;;  %v4822_v63 = vadd.f32 %v8840_v52, %v3947_v46 }
 0x2be   :  { %v3951_v48 = vpop.f32.mrb[50].mxu0  ;;  %6066 = vmatpush1.bf16.msra.mxu0 %v8772_v49  ;;  %v4823_v36 = vadd.f32 %v8845_v29, %v3949_v33 }
 0x2bf   :  { %v4830_v56 = vadd.f32 %v8840_v52, %v3951_v48  ;;  %v3953_v18 = vpop.f32.mrb[51].mxu0  ;;  %6067 = vmatprep.subr.bf16.mxu0 %v8775_v21 }
 0x2c0   :  { %v4831_v11 = vadd.f32 %v8845_v29, %v3953_v18 }
 0x2c1   :  { %v4918_v44 = vpack.c.bf16 %v4830_v56, %v4822_v63 }
 0x2c2   :  { %v4919_v55 = vpack.c.bf16 %v4831_v11, %v4823_v36  ;;  %6068 = vmatpush1.bf16.msra.mxu0 %v8779_v54 }
 0x2c3   :  { %6069 = vmatprep.subr.bf16.mxu0 %v8781_v8 }
 0x2c4   :  { %v3957_v42 = vpop.f32.mrb[52].mxu0  ;;  %6012 = vmatprep.mubr.bf16.mxu0 %v4919_v55 }
 0x2c5   :  { %v3959_v49 = vpop.f32.mrb[53].mxu0  ;;  %6013 = vmatmul.mubr.bf16.gmra.mrb[80].mxu0 %v4918_v44  ;;  %v4838_v59 = vadd.f32 %v8840_v52, %v3957_v42 }
 0x2c6   :  { %v3961_v43 = vpop.f32.mrb[54].mxu0  ;;  %6070 = vmatpush1.bf16.msra.mxu0 %v8790_v3  ;;  %v4839_v32 = vadd.f32 %v8845_v29, %v3959_v49  ;;  %v7715_v49 = vld [vmem:[#allocation12] sm:$0xff]  }
 0x2c7   :  { %v4846_v21 = vadd.f32 %v8840_v52, %v3961_v43  ;;  %v3963_v7 = vpop.f32.mrb[55].mxu0  ;;  %6071 = vmatprep.subr.bf16.mxu0 %v8792_v5  ;;  %v7716_v43 = vld [vmem:[#allocation12 + $0x8] sm:$0xff]   ;;  %7019 = vmatprep.subr.bf16.mxu1 %v7715_v49 }
 0x2c8   :  { %v4847_v54 = vadd.f32 %v8845_v29, %v3963_v7 }
 0x2c9   :  { %v4926_v15 = vpack.c.bf16 %v4846_v21, %v4838_v59 }
 0x2ca   :  { %v4927_v8 = vpack.c.bf16 %v4847_v54, %v4839_v32  ;;  %6072 = vmatpush1.bf16.msra.mxu0 %v8796_v24 }
 0x2cb   :  { %6073 = vmatprep.subr.bf16.mxu0 %v8798_v39 }
 0x2cc   :  { %v3967_v58 = vpop.f32.mrb[56].mxu0  ;;  %6022 = vmatprep.mubr.bf16.mxu0 %v4927_v8 }
 0x2cd   :  { %v3969_v3 = vpop.f32.mrb[57].mxu0  ;;  %6023 = vmatmul.mubr.bf16.gmra.mrb[84].mxu0 %v4926_v15  ;;  %v4854_v51 = vadd.f32 %v8840_v52, %v3967_v58 }
 0x2ce   :  { %v3971_v10 = vpop.f32.mrb[58].mxu0  ;;  %6074 = vmatpush1.bf16.msra.mxu0 %v8806_v19  ;;  %v4855_v1 = vadd.f32 %v8845_v29, %v3969_v3 }
 0x2cf   :  { %v4862_v5 = vadd.f32 %v8840_v52, %v3971_v10  ;;  %v3973_v4 = vpop.f32.mrb[59].mxu0  ;;  %6075 = vmatprep.subr.bf16.mxu0 %v8808_v6 }
 0x2d0   :  { %v4863_v24 = vadd.f32 %v8845_v29, %v3973_v4 }
 0x2d1   :  { %v4934_v47 = vpack.c.bf16 %v4862_v5, %v4854_v51 }
 0x2d2   :  { %v4935_v39 = vpack.c.bf16 %v4863_v24, %v4855_v1  ;;  %6076 = vmatpush1.bf16.msra.mxu0 %v8812_v17 }
 0x2d3   :  { %6077 = vmatprep.subr.bf16.mxu0 %v8814_v0 }
 0x2d4   :  { %v3977_v30 = vpop.f32.mrb[60].mxu0  ;;  %6032 = vmatprep.mubr.bf16.mxu0 %v4935_v39 }
 0x2d5   :  { %v3979_v19 = vpop.f32.mrb[61].mxu0  ;;  %6033 = vmatmul.mubr.bf16.gmra.mrb[88].mxu0 %v4934_v47  ;;  %v4870_v45 = vadd.f32 %v8840_v52, %v3977_v30 }
 0x2d6   :  { %v3981_v50 = vpop.f32.mrb[62].mxu0  ;;  %6078 = vmatpush1.bf16.msra.mxu0 %v8822_v53  ;;  %v4871_v40 = vadd.f32 %v8845_v29, %v3979_v19  ;;  %v4740_v53 = vsub.s32 6, %v8459_v28 }
 0x2d7   :  { %v4878_v6 = vadd.f32 %v8840_v52, %v3981_v50  ;;  %v3983_v16 = vpop.f32.mrb[63].mxu0  ;;  %6079 = vmatprep.subr.bf16.mxu0 %v8824_v37  ;;  %v4744_v37 = vsub.s32 7, %v8459_v28 }
 0x2d8   :  { %v4879_v17 = vadd.f32 %v8845_v29, %v3983_v16  ;;  %v8924_v52 = vrot.slane %v8837_v27, %v4740_v53 }
 0x2d9   :  { %v4942_v23 = vpack.c.bf16 %v4878_v6, %v4870_v45 }
 0x2da   :  { %v4943_v0 = vpack.c.bf16 %v4879_v17, %v4871_v40  ;;  %6080 = vmatpush1.bf16.msra.mxu0 %v8828_v41  ;;  %v8927_v41 = vrot.slane %v8837_v27, %v4744_v37 }
 0x2db   :  { %6081 = vmatprep.subr.bf16.mxu0 %v8842_v60 }
 0x2dc   :  { %6042 = vmatprep.mubr.bf16.mxu0 %v4943_v0 }
 0x2dd   :  { %6043 = vmatmul.mubr.bf16.gmra.mrb[92].mxu0 %v4942_v23 }
 0x2de   :  { %6082 = vmatpush1.bf16.msra.mxu0 %v8847_v20 }
 0x2df   :  { %6083 = vmatprep.subr.bf16.mxu0 %v8853_v14 }
 0x2e2   :  { %6084 = vmatpush1.bf16.msra.mxu0 %v8857_v57 }
 0x31a   :  { %v4246_v29 = vpop.f32.mrb[64].mxu1 }
 0x31b   :  { %v4248_v60 = vpop.f32.mrb[65].mxu1  ;;  %v4760_v2 = vadd.f32 %v8924_v52, %v4246_v29 }
 0x31c   :  { %v4250_v61 = vpop.f32.mrb[66].mxu1  ;;  %v4761_v57 = vadd.f32 %v8927_v41, %v4248_v60 }
 0x31d   :  { %v4768_v20 = vadd.f32 %v8924_v52, %v4250_v61  ;;  %v4252_v14 = vpop.f32.mrb[67].mxu1 }
 0x31e   :  { %v4769_v62 = vadd.f32 %v8927_v41, %v4252_v14 }
 0x31f   :  { %v4888_v22 = vpack.c.bf16 %v4768_v20, %v4760_v2 }
 0x320   :  { %v4889_v28 = vpack.c.bf16 %v4769_v62, %v4761_v57 }
 0x322   :  { %v4256_v38 = vpop.f32.mrb[68].mxu1  ;;  %6085 = vmatprep.mubr.bf16.mxu0 %v4889_v28 }
 0x323   :  { %v4258_v31 = vpop.f32.mrb[69].mxu1  ;;  %6086 = vmatmul.mubr.bf16.vlgmr.msra.gmra.mrb[64].mxu0 %v4888_v22  ;;  %v4776_v27 = vadd.f32 %v8924_v52, %v4256_v38 }
 0x324   :  { %v4260_v25 = vpop.f32.mrb[70].mxu1  ;;  %v4777_v26 = vadd.f32 %v8927_v41, %v4258_v31 }
 0x325   :  { %v4784_v35 = vadd.f32 %v8924_v52, %v4260_v25  ;;  %v4262_v34 = vpop.f32.mrb[71].mxu1 }
 0x326   :  { %v4785_v9 = vadd.f32 %v8927_v41, %v4262_v34 }
 0x327   :  { %v4896_v13 = vpack.c.bf16 %v4784_v35, %v4776_v27 }
 0x328   :  { %v4897_v12 = vpack.c.bf16 %v4785_v9, %v4777_v26 }
 0x32a   :  { %v4266_v46 = vpop.f32.mrb[72].mxu1  ;;  %6095 = vmatprep.mubr.bf16.mxu0 %v4897_v12 }
 0x32b   :  { %v4268_v33 = vpop.f32.mrb[73].mxu1  ;;  %6096 = vmatmul.mubr.bf16.gmra.mrb[68].mxu0 %v4896_v13  ;;  %v4792_v63 = vadd.f32 %v8924_v52, %v4266_v46  ;;  %v7717_v46 = vld [vmem:[#allocation12 + $0x10] sm:$0xff]  }
 0x32c   :  { %v4270_v48 = vpop.f32.mrb[74].mxu1  ;;  %v4793_v36 = vadd.f32 %v8927_v41, %v4268_v33  ;;  %v7718_v33 = vld [vmem:[#allocation12 + $0x18] sm:$0xff]  }
 0x32d   :  { %v4800_v56 = vadd.f32 %v8924_v52, %v4270_v48  ;;  %v4272_v18 = vpop.f32.mrb[75].mxu1  ;;  %v7719_v48 = vld [vmem:[#allocation12 + $0x20] sm:$0xff]  }
 0x32e   :  { %v4801_v11 = vadd.f32 %v8927_v41, %v4272_v18 }
 0x32f   :  { %v4904_v44 = vpack.c.bf16 %v4800_v56, %v4792_v63  ;;  %v7720_v63 = vld [vmem:[#allocation12 + $0x28] sm:$0xff]   ;;  %v7721_v56 = vld [vmem:[#allocation12 + $0x30] sm:$0xff]  }
 0x330   :  { %v4905_v55 = vpack.c.bf16 %v4801_v11, %v4793_v36  ;;  %v7722_v11 = vld [vmem:[#allocation12 + $0x38] sm:$0xff]  }
 0x332   :  { %v4276_v42 = vpop.f32.mrb[76].mxu1  ;;  %6105 = vmatprep.mubr.bf16.mxu1 %v4905_v55 }
 0x333   :  { %v4278_v59 = vpop.f32.mrb[77].mxu1  ;;  %6106 = vmatmul.mubr.bf16.vlgmr.msra.gmra.mrb[96].mxu1 %v4904_v44  ;;  %v4808_v7 = vadd.f32 %v8924_v52, %v4276_v42 }
 0x334   :  { %v4280_v21 = vpop.f32.mrb[78].mxu1  ;;  %7020 = vmatpush3.bf16.msra.mxu1 %v7715_v49  ;;  %v4809_v15 = vadd.f32 %v8927_v41, %v4278_v59 }
 0x335   :  { %v4816_v32 = vadd.f32 %v8924_v52, %v4280_v21  ;;  %v4282_v54 = vpop.f32.mrb[79].mxu1  ;;  %7021 = vmatprep.subr.bf16.mxu1 %v7716_v43 }
 0x336   :  { %v4817_v8 = vadd.f32 %v8927_v41, %v4282_v54 }
 0x337   :  { %v4912_v58 = vpack.c.bf16 %v4816_v32, %v4808_v7 }
 0x338   :  { %v4913_v3 = vpack.c.bf16 %v4817_v8, %v4809_v15  ;;  %7022 = vmatpush3.bf16.msra.mxu1 %v7716_v43 }
 0x339   :  { %7023 = vmatprep.subr.bf16.mxu1 %v7717_v46 }
 0x33a   :  { %v4286_v10 = vpop.f32.mrb[80].mxu1  ;;  %6115 = vmatprep.mubr.bf16.mxu1 %v4913_v3 }
 0x33b   :  { %v4288_v51 = vpop.f32.mrb[81].mxu1  ;;  %6116 = vmatmul.mubr.bf16.gmra.mrb[100].mxu1 %v4912_v58  ;;  %v4824_v4 = vadd.f32 %v8924_v52, %v4286_v10 }
 0x33c   :  { %v4290_v5 = vpop.f32.mrb[82].mxu1  ;;  %v4825_v47 = vadd.f32 %v8927_v41, %v4288_v51  ;;  %7024 = vmatpush3.bf16.msra.mxu1 %v7717_v46 }
 0x33d   :  { %v4832_v1 = vadd.f32 %v8924_v52, %v4290_v5  ;;  %v4292_v24 = vpop.f32.mrb[83].mxu1  ;;  %7025 = vmatprep.subr.bf16.mxu1 %v7718_v33 }
 0x33e   :  { %v4833_v39 = vadd.f32 %v8927_v41, %v4292_v24 }
 0x33f   :  { %v4920_v30 = vpack.c.bf16 %v4832_v1, %v4824_v4 }
 0x340   :  { %v4921_v19 = vpack.c.bf16 %v4833_v39, %v4825_v47  ;;  %7026 = vmatpush3.bf16.msra.mxu1 %v7718_v33  ;;  %v8993_v47 = vld [vmem:[#allocation11] ss:$0 sm:$0xff] }
 0x341   :  { %7027 = vmatprep.subr.bf16.mxu1 %v7719_v48 }
 0x342   :  { %v4296_v50 = vpop.f32.mrb[84].mxu1  ;;  %6125 = vmatprep.mubr.bf16.mxu1 %v4921_v19 }
 0x343   :  { %v4298_v45 = vpop.f32.mrb[85].mxu1  ;;  %6126 = vmatmul.mubr.bf16.gmra.mrb[104].mxu1 %v4920_v30  ;;  %v4840_v16 = vadd.f32 %v8924_v52, %v4296_v50 }
 0x344   :  { %v4300_v6 = vpop.f32.mrb[86].mxu1  ;;  %v4841_v23 = vadd.f32 %v8927_v41, %v4298_v45  ;;  %7028 = vmatpush3.bf16.msra.mxu1 %v7719_v48 }
 0x345   :  { %v4848_v40 = vadd.f32 %v8924_v52, %v4300_v6  ;;  %v4302_v17 = vpop.f32.mrb[87].mxu1  ;;  %7029 = vmatprep.subr.bf16.mxu1 %v7720_v63 }
 0x346   :  { %v4849_v0 = vadd.f32 %v8927_v41, %v4302_v17 }
 0x347   :  { %v4928_v53 = vpack.c.bf16 %v4848_v40, %v4840_v16 }
 0x348   :  { %v4929_v37 = vpack.c.bf16 %v4849_v0, %v4841_v23  ;;  %7030 = vmatpush3.bf16.msra.mxu1 %v7720_v63 }
 0x349   :  { %7031 = vmatprep.subr.bf16.mxu1 %v7721_v56 }
 0x34a   :  { %v4306_v29 = vpop.f32.mrb[88].mxu1  ;;  %6135 = vmatprep.mubr.bf16.mxu1 %v4929_v37 }
 0x34b   :  { %v4308_v60 = vpop.f32.mrb[89].mxu1  ;;  %6136 = vmatmul.mubr.bf16.gmra.mrb[108].mxu1 %v4928_v53  ;;  %v4856_v2 = vadd.f32 %v8924_v52, %v4306_v29 }
 0x34c   :  { %v4310_v61 = vpop.f32.mrb[90].mxu1  ;;  %v4857_v57 = vadd.f32 %v8927_v41, %v4308_v60  ;;  %7032 = vmatpush3.bf16.msra.mxu1 %v7721_v56 }
 0x34d   :  { %v4864_v20 = vadd.f32 %v8924_v52, %v4310_v61  ;;  %v4312_v14 = vpop.f32.mrb[91].mxu1  ;;  %7033 = vmatprep.subr.bf16.mxu1 %v7722_v11 }
 0x34e   :  { %v4865_v62 = vadd.f32 %v8927_v41, %v4312_v14 }
 0x34f   :  { %v4936_v22 = vpack.c.bf16 %v4864_v20, %v4856_v2 }
 0x350   :  { %v4937_v28 = vpack.c.bf16 %v4865_v62, %v4857_v57  ;;  %7034 = vmatpush3.bf16.msra.mxu1 %v7722_v11 }
 0x352   :  { %v4316_v38 = vpop.f32.mrb[92].mxu1  ;;  %6145 = vmatprep.mubr.bf16.mxu1 %v4937_v28 }
 0x353   :  { %v4318_v31 = vpop.f32.mrb[93].mxu1  ;;  %6146 = vmatmul.mubr.bf16.gmra.mrb[112].mxu1 %v4936_v22  ;;  %v4872_v27 = vadd.f32 %v8924_v52, %v4316_v38 }
 0x354   :  { %v4320_v25 = vpop.f32.mrb[94].mxu1  ;;  %v4873_v26 = vadd.f32 %v8927_v41, %v4318_v31 }
 0x355   :  { %v4880_v35 = vadd.f32 %v8924_v52, %v4320_v25  ;;  %v4322_v34 = vpop.f32.mrb[95].mxu1 }
 0x356   :  { %v4881_v9 = vadd.f32 %v8927_v41, %v4322_v34 }
 0x357   :  { %v4944_v13 = vpack.c.bf16 %v4880_v35, %v4872_v27 }
 0x358   :  { %v4945_v12 = vpack.c.bf16 %v4881_v9, %v4873_v26 }
 0x35a   :  { %6155 = vmatprep.mubr.bf16.mxu1 %v4945_v12 }
 0x35b   :  { %6156 = vmatmul.mubr.bf16.gmra.mrb[116].mxu1 %v4944_v13 }
 0x388   :  { %v5994_v52 = vpop.f32.mrb[72].mxu0 }
 0x389   :  { %v5996_v18 = vpop.f32.mrb[73].mxu0 }
 0x38a   :  { %v5998_v41 = vpop.f32.mrb[74].mxu0 }
 0x38b   :  { %v6000_v36 = vpop.f32.mrb[75].mxu0 }
 0x390   :  { %v6004_v44 = vpop.f32.mrb[76].mxu0 }
 0x391   :  { %v6006_v55 = vpop.f32.mrb[77].mxu0 }
 0x392   :  { %v6008_v42 = vpop.f32.mrb[78].mxu0 }
 0x393   :  { %v6010_v49 = vpop.f32.mrb[79].mxu0 }
 0x398   :  { %v8961_v43 = vpop.f32.mrb[80].mxu0 }
 0x399   :  { %v8963_v59 = vpop.f32.mrb[81].mxu0 }
 0x39a   :  { %v8965_v21 = vpop.f32.mrb[82].mxu0 }
 0x39b   :  { %v8967_v7 = vpop.f32.mrb[83].mxu0 }
 0x3a0   :  { %v8969_v32 = vpop.f32.mrb[84].mxu0 }
 0x3a1   :  { %v8971_v54 = vpop.f32.mrb[85].mxu0 }
 0x3a2   :  { %v8973_v15 = vpop.f32.mrb[86].mxu0 }
 0x3a3   :  { %v8975_v8 = vpop.f32.mrb[87].mxu0 }
 0x3a8   :  { %v8977_v58 = vpop.f32.mrb[88].mxu0 }
 0x3a9   :  { %v8979_v3 = vpop.f32.mrb[89].mxu0 }
 0x3aa   :  { %v8981_v10 = vpop.f32.mrb[90].mxu0 }
 0x3ab   :  { %v8983_v51 = vpop.f32.mrb[91].mxu0 }
 0x3b0   :  { %v8985_v5 = vpop.f32.mrb[92].mxu0 }
 0x3b1   :  { %v8987_v4 = vpop.f32.mrb[93].mxu0 }
 0x3b2   :  { %v8989_v1 = vpop.f32.mrb[94].mxu0 }
 0x3b3   :  { %v8991_v24 = vpop.f32.mrb[95].mxu0 }
 0x3f6   :  { %v6087_v39 = vpop.f32.mrb[64].mxu0 }
 0x3f7   :  { %v6173_v30 = vadd.f32 %v8993_v47, %v6087_v39  ;;  %v8996_v19 = vpop.f32.mrb[65].mxu0 }
 0x3f8   :  { %v6091_v50 = vpop.f32.mrb[66].mxu0 }
 0x3f9   :  { %v6174_v45 = vadd.f32 %v8993_v47, %v6091_v50  ;;  %v8999_v6 = vpop.f32.mrb[67].mxu0  ;;  %7723 = vtanh.f32 %v6173_v30 }
 0x3fb   :  { %7725 = vtanh.f32 %v6174_v45 }
 0x3fe   :  { %v6097_v16 = vpop.f32.mrb[68].mxu0 }
 0x3ff   :  { %v6175_v40 = vadd.f32 %v8993_v47, %v6097_v16  ;;  %v9002_v17 = vpop.f32.mrb[69].mxu0 }
 0x400   :  { %v6101_v23 = vpop.f32.mrb[70].mxu0 }
 0x401   :  { %v6176_v0 = vadd.f32 %v8993_v47, %v6101_v23  ;;  %v9005_v53 = vpop.f32.mrb[71].mxu0  ;;  %7727 = vtanh.f32 %v6175_v40 }
 0x403   :  { %7729 = vtanh.f32 %v6176_v0  ;;  %v7724_v37 = vpop.eup %7723 }
 0x405   :  { %v7726_v29 = vpop.eup %7725 }
 0x406   :  { %v6107_v60 = vpop.f32.mrb[96].mxu1  ;;  %v6205_v61 = vpack.c.bf16 %v7726_v29, %v7724_v37 }
 0x407   :  { %v7115_v2 = vadd.f32 %v6107_v60, %v5994_v52  ;;  %v6109_v20 = vpop.f32.mrb[97].mxu1 }
 0x408   :  { %v9007_v14 = vadd.f32 %v6109_v20, %v5996_v18  ;;  %v6111_v57 = vpop.f32.mrb[98].mxu1  ;;  %7035 = vmatprep.mubr.bf16.mxu1 %v6205_v61 }
 0x409   :  { %v6177_v62 = vadd.f32 %v7115_v2, %v8993_v47  ;;  %v7117_v22 = vadd.f32 %v6111_v57, %v5998_v41  ;;  %v6113_v28 = vpop.f32.mrb[99].mxu1 }
 0x40a   :  { %v9010_v38 = vadd.f32 %v6113_v28, %v6000_v36 }
 0x40b   :  { %v6178_v31 = vadd.f32 %v7117_v22, %v8993_v47  ;;  %v7728_v25 = vpop.eup %7727  ;;  %7731 = vtanh.f32 %v6177_v62 }
 0x40d   :  { %v7730_v27 = vpop.eup %7729  ;;  %7733 = vtanh.f32 %v6178_v31 }
 0x40e   :  { %v6117_v35 = vpop.f32.mrb[100].mxu1  ;;  %v6206_v34 = vpack.c.bf16 %v7730_v27, %v7728_v25 }
 0x40f   :  { %v7119_v26 = vadd.f32 %v6117_v35, %v6004_v44  ;;  %v6119_v9 = vpop.f32.mrb[101].mxu1 }
 0x410   :  { %v9013_v13 = vadd.f32 %v6119_v9, %v6006_v55  ;;  %v6121_v12 = vpop.f32.mrb[102].mxu1  ;;  %7036 = vmatmul.mubr.bf16.vlgmr.msra.gmra.mrb[120].mxu1 %v6206_v34 }
 0x411   :  { %v6179_v46 = vadd.f32 %v7119_v26, %v8993_v47  ;;  %v7121_v33 = vadd.f32 %v6121_v12, %v6008_v42  ;;  %v6123_v48 = vpop.f32.mrb[103].mxu1 }
 0x412   :  { %v9016_v63 = vadd.f32 %v6123_v48, %v6010_v49 }
 0x413   :  { %v6180_v52 = vadd.f32 %v7121_v33, %v8993_v47  ;;  %7735 = vtanh.f32 %v6179_v46 }
 0x415   :  { %7737 = vtanh.f32 %v6180_v52  ;;  %v7732_v56 = vpop.eup %7731 }
 0x416   :  { %v6127_v18 = vpop.f32.mrb[104].mxu1 }
 0x417   :  { %v7734_v41 = vpop.eup %7733  ;;  %v7123_v36 = vadd.f32 %v6127_v18, %v8961_v43  ;;  %v6129_v11 = vpop.f32.mrb[105].mxu1 }
 0x418   :  { %v9021_v44 = vadd.f32 %v6129_v11, %v8963_v59  ;;  %v6131_v55 = vpop.f32.mrb[106].mxu1  ;;  %v6207_v39 = vpack.c.bf16 %v7734_v41, %v7732_v56 }
 0x419   :  { %v6181_v42 = vadd.f32 %v7123_v36, %v8993_v47  ;;  %v7125_v49 = vadd.f32 %v6131_v55, %v8965_v21  ;;  %v6133_v30 = vpop.f32.mrb[107].mxu1 }
 0x41a   :  { %v9026_v50 = vadd.f32 %v6133_v30, %v8967_v7  ;;  %7039 = vmatprep.mubr.bf16.mxu1 %v6207_v39  ;;  %v9059_v39 = vld [vmem:[#allocation14] ss:$0 sm:$0xff] }
 0x41b   :  { %v6182_v45 = vadd.f32 %v7125_v49, %v8993_v47  ;;  %7739 = vtanh.f32 %v6181_v42 }
 0x41d   :  { %7741 = vtanh.f32 %v6182_v45  ;;  %v7736_v43 = vpop.eup %7735 }
 0x41e   :  { %v6137_v16 = vpop.f32.mrb[108].mxu1 }
 0x41f   :  { %v7738_v40 = vpop.eup %7737  ;;  %v7127_v59 = vadd.f32 %v6137_v16, %v8969_v32  ;;  %v6139_v23 = vpop.f32.mrb[109].mxu1 }
 0x420   :  { %v9031_v0 = vadd.f32 %v6139_v23, %v8971_v54  ;;  %v6141_v37 = vpop.f32.mrb[110].mxu1  ;;  %v6208_v21 = vpack.c.bf16 %v7738_v40, %v7736_v43 }
 0x421   :  { %v6183_v29 = vadd.f32 %v7127_v59, %v8993_v47  ;;  %v7129_v7 = vadd.f32 %v6141_v37, %v8973_v15  ;;  %v6143_v60 = vpop.f32.mrb[111].mxu1 }
 0x422   :  { %v9036_v61 = vadd.f32 %v6143_v60, %v8975_v8  ;;  %7040 = vmatmul.mubr.bf16.gmra.mrb[124].mxu1 %v6208_v21 }
 0x423   :  { %v6184_v2 = vadd.f32 %v7129_v7, %v8993_v47  ;;  %7743 = vtanh.f32 %v6183_v29 }
 0x425   :  { %7745 = vtanh.f32 %v6184_v2  ;;  %v7740_v32 = vpop.eup %7739 }
 0x426   :  { %v6147_v20 = vpop.f32.mrb[112].mxu1 }
 0x427   :  { %v7742_v57 = vpop.eup %7741  ;;  %v7131_v54 = vadd.f32 %v6147_v20, %v8977_v58  ;;  %v6149_v62 = vpop.f32.mrb[113].mxu1 }
 0x428   :  { %v9041_v22 = vadd.f32 %v6149_v62, %v8979_v3  ;;  %v6151_v28 = vpop.f32.mrb[114].mxu1  ;;  %v6209_v15 = vpack.c.bf16 %v7742_v57, %v7740_v32 }
 0x429   :  { %v6185_v31 = vadd.f32 %v7131_v54, %v8993_v47  ;;  %v7133_v8 = vadd.f32 %v6151_v28, %v8981_v10  ;;  %v6153_v25 = vpop.f32.mrb[115].mxu1 }
 0x42a   :  { %v9046_v27 = vadd.f32 %v6153_v25, %v8983_v51  ;;  %7043 = vmatprep.mubr.bf16.mxu1 %v6209_v15 }
 0x42b   :  { %v6186_v35 = vadd.f32 %v7133_v8, %v8993_v47  ;;  %7747 = vtanh.f32 %v6185_v31 }
 0x42d   :  { %7749 = vtanh.f32 %v6186_v35  ;;  %v7744_v58 = vpop.eup %7743 }
 0x42e   :  { %v6157_v34 = vpop.f32.mrb[116].mxu1 }
 0x42f   :  { %v7746_v26 = vpop.eup %7745  ;;  %v7135_v3 = vadd.f32 %v6157_v34, %v8985_v5  ;;  %v6159_v9 = vpop.f32.mrb[117].mxu1 }
 0x430   :  { %v9051_v12 = vadd.f32 %v6159_v9, %v8987_v4  ;;  %v6161_v46 = vpop.f32.mrb[118].mxu1  ;;  %v6210_v10 = vpack.c.bf16 %v7746_v26, %v7744_v58 }
 0x431   :  { %v6187_v33 = vadd.f32 %v7135_v3, %v8993_v47  ;;  %v7137_v51 = vadd.f32 %v6161_v46, %v8989_v1  ;;  %v6163_v48 = vpop.f32.mrb[119].mxu1 }
 0x432   :  { %v9056_v52 = vadd.f32 %v6163_v48, %v8991_v24  ;;  %7044 = vmatmul.mubr.bf16.gmra.mrb[128].mxu1 %v6210_v10 }
 0x433   :  { %v6188_v56 = vadd.f32 %v7137_v51, %v8993_v47  ;;  %7751 = vtanh.f32 %v6187_v33 }
 0x435   :  { %7753 = vtanh.f32 %v6188_v56  ;;  %v7748_v5 = vpop.eup %7747 }
 0x437   :  { %v7750_v18 = vpop.eup %7749 }
 0x438   :  { %v6211_v41 = vpack.c.bf16 %v7750_v18, %v7748_v5 }
 0x43a   :  { %7047 = vmatprep.mubr.bf16.mxu1 %v6211_v41 }
 0x43d   :  { %v7752_v4 = vpop.eup %7751 }
 0x43f   :  { %v7754_v36 = vpop.eup %7753 }
 0x440   :  { %v6212_v11 = vpack.c.bf16 %v7754_v36, %v7752_v4 }
 0x442   :  { %7048 = vmatmul.mubr.bf16.gmra.mrb[132].mxu1 %v6212_v11 }
 0x4e3   :  { %v7037_v55 = vpop.f32.mrb[120].mxu1 }
 0x4e4   :  { %v6320_v1 = vadd.f32 %v7037_v55, %v9002_v17  ;;  %v6311_v24 = vpop.f32.mrb[121].mxu1 }
 0x4e5   :  { %v6312_v42 = vadd.f32 %v6311_v24, %v8996_v19  ;;  %v7038_v49 = vpop.f32.mrb[122].mxu1 }
 0x4e6   :  { %v6383_v47 = vadd.f32 %v9059_v39, %v6320_v1  ;;  %v6323_v30 = vadd.f32 %v7038_v49, %v9005_v53  ;;  %v6314_v45 = vpop.f32.mrb[123].mxu1 }
 0x4e7   :  { %v6381_v43 = vadd.f32 %v9059_v39, %v6312_v42  ;;  %v6315_v16 = vadd.f32 %v6314_v45, %v8999_v6 }
 0x4e8   :  { %6399 = vst [vmem:[#allocation15 + $0x10] sm:$0xff] %v6383_v47  ;;  %v6384_v40 = vadd.f32 %v9059_v39, %v6323_v30 }
 0x4e9   :  { %6397 = vst [vmem:[#allocation15] sm:$0xff] %v6381_v43  ;;  %v6382_v59 = vadd.f32 %v9059_v39, %v6315_v16 }
 0x4ea   :  { %6400 = vst [vmem:[#allocation15 + $0x18] sm:$0xff] %v6384_v40 }
 0x4eb   :  { %6398 = vst [vmem:[#allocation15 + $0x8] sm:$0xff] %v6382_v59 }
 0x4f5   :  { %v7041_v17 = vpop.f32.mrb[124].mxu1 }
 0x4f6   :  { %v6336_v19 = vadd.f32 %v9013_v13, %v7041_v17  ;;  %v6327_v23 = vpop.f32.mrb[125].mxu1 }
 0x4f7   :  { %v6328_v37 = vadd.f32 %v9007_v14, %v6327_v23  ;;  %v7042_v53 = vpop.f32.mrb[126].mxu1 }
 0x4f8   :  { %v6387_v21 = vadd.f32 %v9059_v39, %v6336_v19  ;;  %v6339_v29 = vadd.f32 %v9016_v63, %v7042_v53  ;;  %v6330_v6 = vpop.f32.mrb[127].mxu1 }
 0x4f9   :  { %v6385_v7 = vadd.f32 %v9059_v39, %v6328_v37  ;;  %v6331_v60 = vadd.f32 %v9010_v38, %v6330_v6 }
 0x4fa   :  { %6403 = vst [vmem:[#allocation15 + $0x30] sm:$0xff] %v6387_v21  ;;  %v6388_v2 = vadd.f32 %v9059_v39, %v6339_v29 }
 0x4fb   :  { %6401 = vst [vmem:[#allocation15 + $0x20] sm:$0xff] %v6385_v7  ;;  %v6386_v32 = vadd.f32 %v9059_v39, %v6331_v60 }
 0x4fc   :  { %6404 = vst [vmem:[#allocation15 + $0x38] sm:$0xff] %v6388_v2 }
 0x4fd   :  { %6402 = vst [vmem:[#allocation15 + $0x28] sm:$0xff] %v6386_v32 }
 0x505   :  { %v7045_v13 = vpop.f32.mrb[128].mxu1 }
 0x506   :  { %v6352_v14 = vadd.f32 %v9031_v0, %v7045_v13  ;;  %v6343_v20 = vpop.f32.mrb[129].mxu1 }
 0x507   :  { %v6344_v57 = vadd.f32 %v9021_v44, %v6343_v20  ;;  %v7046_v63 = vpop.f32.mrb[130].mxu1 }
 0x508   :  { %v6391_v54 = vadd.f32 %v9059_v39, %v6352_v14  ;;  %v6355_v62 = vadd.f32 %v9036_v61, %v7046_v63  ;;  %v6346_v38 = vpop.f32.mrb[131].mxu1 }
 0x509   :  { %v6389_v28 = vadd.f32 %v9059_v39, %v6344_v57  ;;  %v6347_v15 = vadd.f32 %v9026_v50, %v6346_v38 }
 0x50a   :  { %6407 = vst [vmem:[#allocation15 + $0x50] sm:$0xff] %v6391_v54  ;;  %v6392_v31 = vadd.f32 %v9059_v39, %v6355_v62 }
 0x50b   :  { %6405 = vst [vmem:[#allocation15 + $0x40] sm:$0xff] %v6389_v28  ;;  %v6390_v8 = vadd.f32 %v9059_v39, %v6347_v15 }
 0x50c   :  { %6408 = vst [vmem:[#allocation15 + $0x58] sm:$0xff] %v6392_v31 }
 0x50d   :  { %6406 = vst [vmem:[#allocation15 + $0x48] sm:$0xff] %v6390_v8 }
 0x515   :  { %v7049_v0 = vpop.f32.mrb[132].mxu1 }
 0x516   :  { %v6368_v44 = vadd.f32 %v9051_v12, %v7049_v0  ;;  %v6359_v25 = vpop.f32.mrb[133].mxu1 }
 0x517   :  { %v6360_v35 = vadd.f32 %v9041_v22, %v6359_v25  ;;  %v7050_v61 = vpop.f32.mrb[134].mxu1 }
 0x518   :  { %v6395_v58 = vadd.f32 %v9059_v39, %v6368_v44  ;;  %v6371_v34 = vadd.f32 %v9056_v52, %v7050_v61  ;;  %v6362_v50 = vpop.f32.mrb[135].mxu1 }
 0x519   :  { %v6393_v26 = vadd.f32 %v9059_v39, %v6360_v35  ;;  %v6363_v3 = vadd.f32 %v9046_v27, %v6362_v50 }
 0x51a   :  { %6411 = vst [vmem:[#allocation15 + $0x70] sm:$0xff] %v6395_v58  ;;  %v6396_v9 = vadd.f32 %v9059_v39, %v6371_v34 }
 0x51b   :  { %6409 = vst [vmem:[#allocation15 + $0x60] sm:$0xff] %v6393_v26  ;;  %v6394_v12 = vadd.f32 %v9059_v39, %v6363_v3 }
 0x51c   :  { %6412 = vst [vmem:[#allocation15 + $0x78] sm:$0xff] %v6396_v9 }
 0x51d   :  { %6410 = vst [vmem:[#allocation15 + $0x68] sm:$0xff] %v6394_v12 }
 0x51e   :  { %7999 = shalt.err (!%p7996_p4)
}
 0x51f   :  { %s8000_s22 = scalar_lea.hbm %s9115_s7, 2048 }
 0x520   :  { %p8001_p5 = scmp.ne.s32.totalorder %s9115_s7, %s8000_s22  ;;  %p8004_p6 = scmp.lt.u32.totalorder %s8000_s22, %s9115_s7 }
 0x522   :  { %p8006_p7 = pnand %p8004_p6, %p8001_p5 }
 0x524   :  { %8009 = shalt.err (!%p8006_p7)
}
 0x525   :  { %6424 = dma.vmem_to_hbm [thread:$0]  %s6419_s0, 2048, %s9115_s7, [#allocation5], %s8024_s1, %s8024_s1, %s8025_s25  }
 0x526   :  { %8018 = dma.done.wait [#allocation5], 2048  }
 0x527   :  { %8019 = vsyncadd [#allocation5], 4294965248 }
 0x528   :  { %6428 = vsyncpa [#allocation4], 1 }
 0x529   :  { %6429 = vsyncpa [#allocation7], 1 }
 0x52a   :  { %6430 = vsyncpa [#allocation10], 1 }
 0x52b   :  { %6431 = vsyncpa [#allocation13], 1 }
 0x52c   :  { %6432 = vsyncpa [#allocation5], 1 }

</bundles_post_ra>
